<compile_context>
chip_gen: v5e
topology: v5e:2x2
jax: 0.10.0
libtpu: 0.0.40
codegen_flags: <defaults>
</compile_context>

<pallas_src>
import jax
import jax.numpy as jnp
from jax.experimental import pallas as pl
from jax.experimental.pallas import tpu as pltpu

ARC = 'default'  # smart bias init constants b = [-5.5, -4.0]
LANE = 128

_VMEM = pl.BlockSpec(memory_space=pltpu.MemorySpace.VMEM)
_SMEM = pl.BlockSpec(memory_space=pltpu.MemorySpace.SMEM)
_CPARAMS = pltpu.CompilerParams(vmem_limit_bytes=32 * 1024 * 1024)


def _round_up(x, m):
    return (x + m - 1) // m * m


# ----------------------------------------------------------------------------
# Pallas kernels
# ----------------------------------------------------------------------------
def _conv_bn_prelu_kernel(a_ref, b_ref, g_ref, bt_ref, s_ref, o_ref):
    # Fused: (M, Kp) x (Kp, 128) MXU matmul (bf16 in, f32 acc)
    #        -> training-mode BatchNorm over rows -> PReLU.
    y = jnp.dot(a_ref[...], b_ref[...], preferred_element_type=jnp.float32)
    mean = jnp.mean(y, axis=0, keepdims=True)
    var = jnp.mean(jnp.square(y - mean), axis=0, keepdims=True)
    z = (y - mean) * jax.lax.rsqrt(var + 1e-5) * g_ref[...] + bt_ref[...]
    slope = s_ref[0]                      # SMEM scalar
    o_ref[...] = jnp.where(z > 0, z, slope * z)


def _conv_bias_prelu_kernel(a_ref, b_ref, bias_ref, s_ref, o_ref):
    # Fused: matmul + bias + PReLU (slope=1.0 == linear activation).
    z = (jnp.dot(a_ref[...], b_ref[...], preferred_element_type=jnp.float32)
         + bias_ref[...])
    slope = s_ref[0]
    o_ref[...] = jnp.where(z > 0, z, slope * z)


def _max4_kernel(a_ref, b_ref, c_ref, d_ref, o_ref):
    # 2x2/2 maxpool == elementwise max of the four shifted NHWC views (pure VPU).
    o_ref[...] = jnp.maximum(jnp.maximum(a_ref[...], b_ref[...]),
                             jnp.maximum(c_ref[...], d_ref[...]))


def _se_kernel(x_ref, w1_ref, w2_ref, o_ref):
    # Fused SE: spatial mean -> FC -> ReLU -> FC -> sigmoid -> broadcast scale.
    x = x_ref[...]                                          # (N, H*W, C)
    m = jnp.mean(x, axis=1)                                 # (N, C)
    h = jnp.maximum(
        jnp.dot(m, w1_ref[...], preferred_element_type=jnp.float32), 0.0)
    s = jax.nn.sigmoid(
        jnp.dot(h, w2_ref[...], preferred_element_type=jnp.float32))
    o_ref[...] = x * s[:, None, :]


def _add_kernel(a_ref, b_ref, o_ref):
    o_ref[...] = a_ref[...] + b_ref[...]


# ----------------------------------------------------------------------------
# Kernel wrappers (all activations are NHWC)
# ----------------------------------------------------------------------------
def _im2col_nhwc(x, k, pad):
    """x: (N, H, W, Cin) -> (N*H*W, k*k*Cin); channels-last keeps reshape free."""
    N, H, W, Cin = x.shape
    if k == 1:
        return x.reshape(N * H * W, Cin)
    xp = jnp.pad(x, ((0, 0), (pad, pad), (pad, pad), (0, 0)))
    cols = jnp.concatenate(
        [xp[:, i:i + H, j:j + W, :] for i in range(k) for j in range(k)], axis=-1)
    return cols.reshape(N * H * W, k * k * Cin)


def conv_block(x, p, mdef):
    """Fused Conv2d(stride 1) + [BN(training)+PReLU] or [bias+PReLU], NHWC in/out."""
    k = int(mdef['size'])
    assert int(mdef['stride']) == 1, "synthetic config uses stride-1 convs"
    pad = (k - 1) // 2 if int(mdef['pad']) else 0
    bn = int(mdef['batch_normalize'])

    N, H, W, Cin = x.shape
    w = p['weight']                         # torch layout (Cout, Cin, kh, kw)
    Cout = w.shape[0]
    M = N * H * W
    K = Cin * k * k
    Kp = _round_up(K, 128)                  # lane-dense A, 256-wide K where large
    Cp = LANE                               # lane-dense output (Cout <= 128 here)

    A = _im2col_nhwc(x, k, pad)
    A = jnp.pad(A, ((0, 0), (0, Kp - K))).astype(jnp.bfloat16)
    B = w.transpose(2, 3, 1, 0).reshape(K, Cout)     # (kh, kw, cin) -> cout
    B = jnp.pad(B, ((0, Kp - K), (0, Cp - Cout))).astype(jnp.bfloat16)
    slope = jnp.reshape(p.get('prelu', jnp.float32(1.0)), (1,)).astype(jnp.float32)

    if bn:
        gamma = jnp.pad(p['gamma'], (0, Cp - Cout)).reshape(1, Cp)
        beta = jnp.pad(p['beta'], (0, Cp - Cout)).reshape(1, Cp)
        y = pl.pallas_call(
            _conv_bn_prelu_kernel,
            out_shape=jax.ShapeDtypeStruct((M, Cp), jnp.float32),
            in_specs=[_VMEM, _VMEM, _VMEM, _VMEM, _SMEM],
            out_specs=_VMEM,
            compiler_params=_CPARAMS,
        )(A, B, gamma, beta, slope)
    else:
        bias = jnp.pad(p['bias'], (0, Cp - Cout)).reshape(1, Cp)
        TM = 128
        Mp = _round_up(M, TM)
        if Mp != M:
            A = jnp.pad(A, ((0, Mp - M), (0, 0)))
        y = pl.pallas_call(
            _conv_bias_prelu_kernel,
            out_shape=jax.ShapeDtypeStruct((Mp, Cp), jnp.float32),
            grid=(Mp // TM,),
            in_specs=[
                pl.BlockSpec((TM, Kp), lambda i: (i, 0)),
                pl.BlockSpec((Kp, Cp), lambda i: (0, 0)),
                pl.BlockSpec((1, Cp), lambda i: (0, 0)),
                _SMEM,
            ],
            out_specs=pl.BlockSpec((TM, Cp), lambda i: (i, 0)),
            compiler_params=pltpu.CompilerParams(
                dimension_semantics=("parallel",),
                vmem_limit_bytes=32 * 1024 * 1024),
        )(A, B, bias, slope)
        y = y[:M]

    return y[:, :Cout].reshape(N, H, W, Cout)


def maxpool2x2(x):
    """2x2 stride-2 max pool on NHWC via elementwise max of four shifted views."""
    N, H, W, C = x.shape
    Ho, Wo = H // 2, W // 2
    views = [x[:, i::2, j::2, :].reshape(N, Ho * Wo * C)
             for i in range(2) for j in range(2)]
    y = pl.pallas_call(
        _max4_kernel,
        out_shape=jax.ShapeDtypeStruct((N, Ho * Wo * C), jnp.float32),
        in_specs=[_VMEM] * 4,
        out_specs=_VMEM,
        compiler_params=_CPARAMS,
    )(*views)
    return y.reshape(N, Ho, Wo, C)


def se_layer(x, w1, w2):
    """SELayer: one fused kernel (mean + FC/ReLU/FC/sigmoid + scale), NHWC."""
    N, H, W, C = x.shape
    hid = w1.shape[0]
    hp = _round_up(hid, 128)                       # lane-dense hidden activation
    w1t = jnp.pad(w1.T, ((0, 0), (0, hp - hid)))   # (C, hp)
    w2t = jnp.pad(w2.T, ((0, hp - hid), (0, 0)))   # (hp, C)
    out = pl.pallas_call(
        _se_kernel,
        out_shape=jax.ShapeDtypeStruct((N, H * W, C), jnp.float32),
        in_specs=[_VMEM, _VMEM, _VMEM],
        out_specs=_VMEM,
        compiler_params=_CPARAMS,
    )(x.reshape(N, H * W, C), w1t, w2t)
    return out.reshape(N, H, W, C)


def shortcut_add(a, b):
    N, H, W, C = a.shape
    out = pl.pallas_call(
        _add_kernel,
        out_shape=jax.ShapeDtypeStruct((N, H * W * C), jnp.float32),
        in_specs=[_VMEM, _VMEM],
        out_specs=_VMEM,
        compiler_params=_CPARAMS,
    )(a.reshape(N, H * W * C), b.reshape(N, H * W * C))
    return out.reshape(N, H, W, C)


def upsample_nearest(x, s):
    # nn.Upsample(scale_factor=s, mode='nearest') -- pure index duplication (glue)
    return jnp.repeat(jnp.repeat(x, s, axis=1), s, axis=2)


def yolo_forward_train(x_nhwc, na, nc):
    # Matches torch: p.view(bs, na, nc+6, ny, nx).permute(0, 1, 3, 4, 2)
    bs, ny, nx, _ = x_nhwc.shape
    no = nc + 6
    return x_nhwc.reshape(bs, ny, nx, na, no).transpose(0, 3, 1, 2, 4)


# ----------------------------------------------------------------------------
# Synthetic Darknet config (stands in for parse_model_cfg output)
# ----------------------------------------------------------------------------
def make_module_defs():
    return [
        dict(type='convolutional', batch_normalize=1, filters=8, size=3, stride=1, pad=1, activation='leaky'),
        dict(type='maxpool', size=2, stride=2),
        dict(type='convolutional', batch_normalize=1, filters=16, size=3, stride=1, pad=1, activation='leaky'),
        dict(type='se', channels=16),
        dict(type='convolutional', batch_normalize=1, filters=16, size=3, stride=1, pad=1, activation='leaky'),
        dict(type='shortcut', **{'from': -2}),
        dict(type='upsample', stride=2),
        dict(type='route', layers='-1,-7'),
        dict(type='convolutional', batch_normalize=0, filters=24, size=1, stride=1, pad=1, activation='linear'),
        dict(type='yolo', mask='0-2', classes=2,
             anchors=[[10.0, 13.0, 0.0], [16.0, 30.0, 0.0], [33.0, 23.0, 0.0]]),
    ]


def init_params(module_defs, in_channels, key):
    params = {}
    out_filters = [in_channels]
    for i, mdef in enumerate(module_defs):
        mtype = mdef['type']
        if mtype == 'convolutional':
            bn = int(mdef['batch_normalize'])
            f = int(mdef['filters'])
            k = int(mdef['size'])
            cin = out_filters[-1]
            key, kw, kb, kg, kbt = jax.random.split(key, 5)
            p = {'weight': 0.1 * jax.random.normal(kw, (f, cin, k, k), jnp.float32)}
            if bn:
                p['gamma'] = 1.0 + 0.1 * jax.random.normal(kg, (f,), jnp.float32)
                p['beta'] = 0.1 * jax.random.normal(kbt, (f,), jnp.float32)
            else:
                p['bias'] = 0.1 * jax.random.normal(kb, (f,), jnp.float32)
            if mdef['activation'] == 'leaky':
                p['prelu'] = jnp.float32(0.1)  # nn.PReLU(num_parameters=1, init=0.1)
            params[i] = p
            out_filters.append(f)
        elif mtype == 'se':
            c = int(mdef['channels'])
            r = 16
            hid = max(c // r, 1)
            key, k1, k2 = jax.random.split(key, 3)
            params[i] = {
                'w1': 0.3 * jax.random.normal(k1, (hid, c), jnp.float32),
                'w2': 0.3 * jax.random.normal(k2, (c, hid), jnp.float32),
            }
            out_filters.append(out_filters[-1])
        elif mtype == 'route':
            layers = [int(l) for l in str(mdef['layers']).split(',')]
            f = sum(out_filters[l + 1] if l > 0 else out_filters[l] for l in layers)
            out_filters.append(f)
        elif mtype == 'shortcut':
            out_filters.append(out_filters[int(mdef['from'])])
        elif mtype == 'yolo':
            # smart bias init (arc='default' -> b = [-5.5, -4.0]) on preceding conv
            m0, m1 = [int(v) for v in mdef['mask'].split('-')]
            na = m1 - m0 + 1
            prev = i - 1
            if prev in params and 'bias' in params[prev]:
                b = params[prev]['bias'].reshape(na, -1)
                b = b.at[:, 5].add(-5.5 - b[:, 5].mean())
                b = b.at[:, 6:].add(-4.0 - b[:, 6:].mean())
                params[prev]['bias'] = b.reshape(-1)
            out_filters.append(out_filters[-1])
        else:  # maxpool, upsample
            out_filters.append(out_filters[-1])
    return params


def darknet_forward(params, module_defs, x_nchw):
    """Training-mode Darknet forward: returns list of YOLO prediction tensors p."""
    x = x_nchw.transpose(0, 2, 3, 1)  # single NCHW->NHWC relayout at the boundary
    layer_outputs = []
    output = []
    for i, mdef in enumerate(module_defs):
        mtype = mdef['type']
        if mtype == 'convolutional':
            x = conv_block(x, params[i], mdef)
        elif mtype == 'maxpool':
            assert int(mdef['size']) == 2 and int(mdef['stride']) == 2
            x = maxpool2x2(x)
        elif mtype == 'se':
            x = se_layer(x, params[i]['w1'], params[i]['w2'])
        elif mtype == 'upsample':
            x = upsample_nearest(x, int(mdef['stride']))
        elif mtype == 'route':
            layers = [int(l) for l in str(mdef['layers']).split(',')]
            if len(layers) == 1:
                x = layer_outputs[layers[0]]
            else:
                x = jnp.concatenate([layer_outputs[l] for l in layers], axis=-1)
        elif mtype == 'shortcut':
            x = shortcut_add(x, layer_outputs[int(mdef['from'])])
        elif mtype == 'yolo':
            m0, m1 = [int(v) for v in mdef['mask'].split('-')]
            na = m1 - m0 + 1
            x = yolo_forward_train(x, na=na, nc=int(mdef['classes']))
            output.append(x)
        layer_outputs.append(x)
    return output


# ----------------------------------------------------------------------------
if __name__ == "__main__":
    key = jax.random.PRNGKey(0)
    key, kx = jax.random.split(key)
    x = jax.random.normal(kx, (2, 4, 16, 16), jnp.float32)  # NCHW, matches torch API

    module_defs = make_module_defs()
    params = init_params(module_defs, in_channels=4, key=key)

    fwd = jax.jit(lambda p, xin: darknet_forward(p, module_defs, xin))
    out = fwd(params, x)
    out = jax.block_until_ready(out)

    # One YOLO head: (bs, na, ny, nx, nc + 6) = (2, 3, 16, 16, 8)
    assert len(out) == 1 and out[0].shape == (2, 3, 16, 16, 8), out[0].shape
    assert bool(jnp.all(jnp.isfinite(out[0])))
    print("KERNEL_OK")
</pallas_src>

<mosaic_0001>
module attributes {stable_mosaic.version = 11 : i64} {
  func.func @_conv_bn_prelu_kernel(%arg0: memref<512x128xbf16, #tpu.memory_space<vmem>>, %arg1: memref<128x128xbf16, #tpu.memory_space<vmem>>, %arg2: memref<1x128xf32, #tpu.memory_space<vmem>>, %arg3: memref<1x128xf32, #tpu.memory_space<vmem>>, %arg4: memref<1xf32, #tpu.memory_space<smem>>, %arg5: memref<512x128xf32, #tpu.memory_space<vmem>>) attributes {dimension_semantics = [], scalar_prefetch = 0 : i64, scratch_operands = 0 : i64, tpu.core_type = #tpu.core_type<tc>} {
    %c0 = arith.constant 0 : index
    %c0_0 = arith.constant 0 : index
    %0 = vector.load %arg0[%c0, %c0_0] : memref<512x128xbf16, #tpu.memory_space<vmem>>, vector<512x128xbf16>
    %c0_1 = arith.constant 0 : index
    %c0_2 = arith.constant 0 : index
    %1 = vector.load %arg1[%c0_1, %c0_2] : memref<128x128xbf16, #tpu.memory_space<vmem>>, vector<128x128xbf16>
    %cst = arith.constant dense<0.000000e+00> : vector<512x128xf32>
    %2 = tpu.matmul %0, %1, %cst {dimension_numbers = #tpu.dot_dimension_numbers<[1], [0], [0], [1], [0, 0, 1, 1], [], []>} : vector<512x128xbf16>, vector<128x128xbf16>, vector<512x128xf32> -> vector<512x128xf32>
    %cst_3 = arith.constant dense<0.000000e+00> : vector<128xf32>
    %3 = vector.multi_reduction <add>, %2, %cst_3 [0] : vector<512x128xf32> to vector<128xf32>
    %4 = vector.shape_cast %3 : vector<128xf32> to vector<1x128xf32>
    %cst_4 = arith.constant 5.120000e+02 : f32
    %5 = vector.broadcast %cst_4 : f32 to vector<1x128xf32>
    %6 = arith.divf %4, %5 : vector<1x128xf32>
    %7 = vector.broadcast %6 : vector<1x128xf32> to vector<512x128xf32>
    %8 = arith.subf %2, %7 : vector<512x128xf32>
    %9 = arith.mulf %8, %8 : vector<512x128xf32>
    %cst_5 = arith.constant dense<0.000000e+00> : vector<128xf32>
    %10 = vector.multi_reduction <add>, %9, %cst_5 [0] : vector<512x128xf32> to vector<128xf32>
    %11 = vector.shape_cast %10 : vector<128xf32> to vector<1x128xf32>
    %cst_6 = arith.constant 5.120000e+02 : f32
    %12 = vector.broadcast %cst_6 : f32 to vector<1x128xf32>
    %13 = arith.divf %11, %12 : vector<1x128xf32>
    %14 = vector.broadcast %6 : vector<1x128xf32> to vector<512x128xf32>
    %15 = arith.subf %2, %14 : vector<512x128xf32>
    %cst_7 = arith.constant 9.99999974E-6 : f32
    %16 = vector.broadcast %cst_7 : f32 to vector<1x128xf32>
    %17 = arith.addf %13, %16 : vector<1x128xf32>
    %18 = math.rsqrt %17 : vector<1x128xf32>
    %19 = vector.broadcast %18 : vector<1x128xf32> to vector<512x128xf32>
    %20 = arith.mulf %15, %19 : vector<512x128xf32>
    %c0_8 = arith.constant 0 : index
    %c0_9 = arith.constant 0 : index
    %21 = vector.load %arg2[%c0_8, %c0_9] : memref<1x128xf32, #tpu.memory_space<vmem>>, vector<1x128xf32>
    %22 = vector.broadcast %21 : vector<1x128xf32> to vector<512x128xf32>
    %23 = arith.mulf %20, %22 : vector<512x128xf32>
    %c0_10 = arith.constant 0 : index
    %c0_11 = arith.constant 0 : index
    %24 = vector.load %arg3[%c0_10, %c0_11] : memref<1x128xf32, #tpu.memory_space<vmem>>, vector<1x128xf32>
    %25 = vector.broadcast %24 : vector<1x128xf32> to vector<512x128xf32>
    %26 = arith.addf %23, %25 : vector<512x128xf32>
    %c0_12 = arith.constant 0 : index
    %27 = memref.load %arg4[%c0_12] : memref<1xf32, #tpu.memory_space<smem>>
    %cst_13 = arith.constant 0.000000e+00 : f32
    %28 = vector.broadcast %cst_13 : f32 to vector<512x128xf32>
    %29 = arith.cmpf ogt, %26, %28 : vector<512x128xf32>
    %30 = vector.broadcast %27 : f32 to vector<512x128xf32>
    %31 = arith.mulf %30, %26 : vector<512x128xf32>
    %32 = arith.select %29, %26, %31 : vector<512x128xi1>, vector<512x128xf32>
    %c0_14 = arith.constant 0 : index
    %c0_15 = arith.constant 0 : index
    %33 = vector.load %arg5[%c0_14, %c0_15] : memref<512x128xf32, #tpu.memory_space<vmem>>, vector<512x128xf32>
    tpu.vector_store %arg5[%c0_14, %c0_15], %32 {strides = array<i32>} : memref<512x128xf32, #tpu.memory_space<vmem>>, vector<512x128xf32>,
    return
  }
}

module attributes {stable_mosaic.version = 11 : i64} {
  func.func @_max4_kernel(%arg0: memref<2x512xf32, #tpu.memory_space<vmem>>, %arg1: memref<2x512xf32, #tpu.memory_space<vmem>>, %arg2: memref<2x512xf32, #tpu.memory_space<vmem>>, %arg3: memref<2x512xf32, #tpu.memory_space<vmem>>, %arg4: memref<2x512xf32, #tpu.memory_space<vmem>>) attributes {dimension_semantics = [], scalar_prefetch = 0 : i64, scratch_operands = 0 : i64, tpu.core_type = #tpu.core_type<tc>} {
    %c0 = arith.constant 0 : index
    %c0_0 = arith.constant 0 : index
    %0 = vector.load %arg0[%c0, %c0_0] : memref<2x512xf32, #tpu.memory_space<vmem>>, vector<2x512xf32>
    %c0_1 = arith.constant 0 : index
    %c0_2 = arith.constant 0 : index
    %1 = vector.load %arg1[%c0_1, %c0_2] : memref<2x512xf32, #tpu.memory_space<vmem>>, vector<2x512xf32>
    %2 = arith.maximumf %0, %1 : vector<2x512xf32>
    %c0_3 = arith.constant 0 : index
    %c0_4 = arith.constant 0 : index
    %3 = vector.load %arg2[%c0_3, %c0_4] : memref<2x512xf32, #tpu.memory_space<vmem>>, vector<2x512xf32>
    %c0_5 = arith.constant 0 : index
    %c0_6 = arith.constant 0 : index
    %4 = vector.load %arg3[%c0_5, %c0_6] : memref<2x512xf32, #tpu.memory_space<vmem>>, vector<2x512xf32>
    %5 = arith.maximumf %3, %4 : vector<2x512xf32>
    %6 = arith.maximumf %2, %5 : vector<2x512xf32>
    %c0_7 = arith.constant 0 : index
    %c0_8 = arith.constant 0 : index
    %7 = vector.load %arg4[%c0_7, %c0_8] : memref<2x512xf32, #tpu.memory_space<vmem>>, vector<2x512xf32>
    tpu.vector_store %arg4[%c0_7, %c0_8], %6 {strides = array<i32>} : memref<2x512xf32, #tpu.memory_space<vmem>>, vector<2x512xf32>,
    return
  }
}

module attributes {stable_mosaic.version = 11 : i64} {
  func.func @_conv_bn_prelu_kernel(%arg0: memref<128x128xbf16, #tpu.memory_space<vmem>>, %arg1: memref<128x128xbf16, #tpu.memory_space<vmem>>, %arg2: memref<1x128xf32, #tpu.memory_space<vmem>>, %arg3: memref<1x128xf32, #tpu.memory_space<vmem>>, %arg4: memref<1xf32, #tpu.memory_space<smem>>, %arg5: memref<128x128xf32, #tpu.memory_space<vmem>>) attributes {dimension_semantics = [], scalar_prefetch = 0 : i64, scratch_operands = 0 : i64, tpu.core_type = #tpu.core_type<tc>} {
    %c0 = arith.constant 0 : index
    %c0_0 = arith.constant 0 : index
    %0 = vector.load %arg0[%c0, %c0_0] : memref<128x128xbf16, #tpu.memory_space<vmem>>, vector<128x128xbf16>
    %c0_1 = arith.constant 0 : index
    %c0_2 = arith.constant 0 : index
    %1 = vector.load %arg1[%c0_1, %c0_2] : memref<128x128xbf16, #tpu.memory_space<vmem>>, vector<128x128xbf16>
    %cst = arith.constant dense<0.000000e+00> : vector<128x128xf32>
    %2 = tpu.matmul %0, %1, %cst {dimension_numbers = #tpu.dot_dimension_numbers<[1], [0], [0], [1], [0, 0, 1, 1], [], []>} : vector<128x128xbf16>, vector<128x128xbf16>, vector<128x128xf32> -> vector<128x128xf32>
    %cst_3 = arith.constant dense<0.000000e+00> : vector<128xf32>
    %3 = vector.multi_reduction <add>, %2, %cst_3 [0] : vector<128x128xf32> to vector<128xf32>
    %4 = vector.shape_cast %3 : vector<128xf32> to vector<1x128xf32>
    %cst_4 = arith.constant 1.280000e+02 : f32
    %5 = vector.broadcast %cst_4 : f32 to vector<1x128xf32>
    %6 = arith.divf %4, %5 : vector<1x128xf32>
    %7 = vector.broadcast %6 : vector<1x128xf32> to vector<128x128xf32>
    %8 = arith.subf %2, %7 : vector<128x128xf32>
    %9 = arith.mulf %8, %8 : vector<128x128xf32>
    %cst_5 = arith.constant dense<0.000000e+00> : vector<128xf32>
    %10 = vector.multi_reduction <add>, %9, %cst_5 [0] : vector<128x128xf32> to vector<128xf32>
    %11 = vector.shape_cast %10 : vector<128xf32> to vector<1x128xf32>
    %cst_6 = arith.constant 1.280000e+02 : f32
    %12 = vector.broadcast %cst_6 : f32 to vector<1x128xf32>
    %13 = arith.divf %11, %12 : vector<1x128xf32>
    %14 = vector.broadcast %6 : vector<1x128xf32> to vector<128x128xf32>
    %15 = arith.subf %2, %14 : vector<128x128xf32>
    %cst_7 = arith.constant 9.99999974E-6 : f32
    %16 = vector.broadcast %cst_7 : f32 to vector<1x128xf32>
    %17 = arith.addf %13, %16 : vector<1x128xf32>
    %18 = math.rsqrt %17 : vector<1x128xf32>
    %19 = vector.broadcast %18 : vector<1x128xf32> to vector<128x128xf32>
    %20 = arith.mulf %15, %19 : vector<128x128xf32>
    %c0_8 = arith.constant 0 : index
    %c0_9 = arith.constant 0 : index
    %21 = vector.load %arg2[%c0_8, %c0_9] : memref<1x128xf32, #tpu.memory_space<vmem>>, vector<1x128xf32>
    %22 = vector.broadcast %21 : vector<1x128xf32> to vector<128x128xf32>
    %23 = arith.mulf %20, %22 : vector<128x128xf32>
    %c0_10 = arith.constant 0 : index
    %c0_11 = arith.constant 0 : index
    %24 = vector.load %arg3[%c0_10, %c0_11] : memref<1x128xf32, #tpu.memory_space<vmem>>, vector<1x128xf32>
    %25 = vector.broadcast %24 : vector<1x128xf32> to vector<128x128xf32>
    %26 = arith.addf %23, %25 : vector<128x128xf32>
    %c0_12 = arith.constant 0 : index
    %27 = memref.load %arg4[%c0_12] : memref<1xf32, #tpu.memory_space<smem>>
    %cst_13 = arith.constant 0.000000e+00 : f32
    %28 = vector.broadcast %cst_13 : f32 to vector<128x128xf32>
    %29 = arith.cmpf ogt, %26, %28 : vector<128x128xf32>
    %30 = vector.broadcast %27 : f32 to vector<128x128xf32>
    %31 = arith.mulf %30, %26 : vector<128x128xf32>
    %32 = arith.select %29, %26, %31 : vector<128x128xi1>, vector<128x128xf32>
    %c0_14 = arith.constant 0 : index
    %c0_15 = arith.constant 0 : index
    %33 = vector.load %arg5[%c0_14, %c0_15] : memref<128x128xf32, #tpu.memory_space<vmem>>, vector<128x128xf32>
    tpu.vector_store %arg5[%c0_14, %c0_15], %32 {strides = array<i32>} : memref<128x128xf32, #tpu.memory_space<vmem>>, vector<128x128xf32>,
    return
  }
}

module attributes {stable_mosaic.version = 11 : i64} {
  func.func @_se_kernel(%arg0: memref<2x64x16xf32, #tpu.memory_space<vmem>>, %arg1: memref<16x128xf32, #tpu.memory_space<vmem>>, %arg2: memref<128x16xf32, #tpu.memory_space<vmem>>, %arg3: memref<2x64x16xf32, #tpu.memory_space<vmem>>) attributes {dimension_semantics = [], scalar_prefetch = 0 : i64, scratch_operands = 0 : i64, tpu.core_type = #tpu.core_type<tc>} {
    %c0 = arith.constant 0 : index
    %c0_0 = arith.constant 0 : index
    %c0_1 = arith.constant 0 : index
    %0 = vector.load %arg0[%c0, %c0_0, %c0_1] : memref<2x64x16xf32, #tpu.memory_space<vmem>>, vector<2x64x16xf32>
    %cst = arith.constant dense<0.000000e+00> : vector<2x16xf32>
    %1 = vector.multi_reduction <add>, %0, %cst [1] : vector<2x64x16xf32> to vector<2x16xf32>
    %cst_2 = arith.constant 6.400000e+01 : f32
    %2 = vector.broadcast %cst_2 : f32 to vector<2x16xf32>
    %3 = arith.divf %1, %2 : vector<2x16xf32>
    %c0_3 = arith.constant 0 : index
    %c0_4 = arith.constant 0 : index
    %4 = vector.load %arg1[%c0_3, %c0_4] : memref<16x128xf32, #tpu.memory_space<vmem>>, vector<16x128xf32>
    %cst_5 = arith.constant dense<0.000000e+00> : vector<2x128xf32>
    %5 = tpu.matmul %3, %4, %cst_5 {dimension_numbers = #tpu.dot_dimension_numbers<[1], [0], [0], [1], [0, 0, 1, 1], [], []>} : vector<2x16xf32>, vector<16x128xf32>, vector<2x128xf32> -> vector<2x128xf32>
    %cst_6 = arith.constant 0.000000e+00 : f32
    %6 = vector.broadcast %cst_6 : f32 to vector<2x128xf32>
    %7 = arith.maximumf %5, %6 : vector<2x128xf32>
    %c0_7 = arith.constant 0 : index
    %c0_8 = arith.constant 0 : index
    %8 = vector.load %arg2[%c0_7, %c0_8] : memref<128x16xf32, #tpu.memory_space<vmem>>, vector<128x16xf32>
    %cst_9 = arith.constant dense<0.000000e+00> : vector<2x16xf32>
    %9 = tpu.matmul %7, %8, %cst_9 {dimension_numbers = #tpu.dot_dimension_numbers<[1], [0], [0], [1], [0, 0, 1, 1], [], []>} : vector<2x128xf32>, vector<128x16xf32>, vector<2x16xf32> -> vector<2x16xf32>
    %10 = arith.negf %9 : vector<2x16xf32>
    %11 = math.exp %10 : vector<2x16xf32>
    %cst_10 = arith.constant 1.000000e+00 : f32
    %12 = vector.broadcast %cst_10 : f32 to vector<2x16xf32>
    %13 = arith.addf %12, %11 : vector<2x16xf32>
    %14 = arith.divf %12, %13 : vector<2x16xf32>
    %15 = vector.shape_cast %14 : vector<2x16xf32> to vector<2x1x16xf32>
    %16 = vector.broadcast %15 : vector<2x1x16xf32> to vector<2x64x16xf32>
    %17 = arith.mulf %0, %16 : vector<2x64x16xf32>
    %c0_11 = arith.constant 0 : index
    %c0_12 = arith.constant 0 : index
    %c0_13 = arith.constant 0 : index
    %18 = vector.load %arg3[%c0_11, %c0_12, %c0_13] : memref<2x64x16xf32, #tpu.memory_space<vmem>>, vector<2x64x16xf32>
    tpu.vector_store %arg3[%c0_11, %c0_12, %c0_13], %17 {strides = array<i32>} : memref<2x64x16xf32, #tpu.memory_space<vmem>>, vector<2x64x16xf32>,
    return
  }
}

module attributes {stable_mosaic.version = 11 : i64} {
  func.func @_conv_bn_prelu_kernel(%arg0: memref<128x256xbf16, #tpu.memory_space<vmem>>, %arg1: memref<256x128xbf16, #tpu.memory_space<vmem>>, %arg2: memref<1x128xf32, #tpu.memory_space<vmem>>, %arg3: memref<1x128xf32, #tpu.memory_space<vmem>>, %arg4: memref<1xf32, #tpu.memory_space<smem>>, %arg5: memref<128x128xf32, #tpu.memory_space<vmem>>) attributes {dimension_semantics = [], scalar_prefetch = 0 : i64, scratch_operands = 0 : i64, tpu.core_type = #tpu.core_type<tc>} {
    %c0 = arith.constant 0 : index
    %c0_0 = arith.constant 0 : index
    %0 = vector.load %arg0[%c0, %c0_0] : memref<128x256xbf16, #tpu.memory_space<vmem>>, vector<128x256xbf16>
    %c0_1 = arith.constant 0 : index
    %c0_2 = arith.constant 0 : index
    %1 = vector.load %arg1[%c0_1, %c0_2] : memref<256x128xbf16, #tpu.memory_space<vmem>>, vector<256x128xbf16>
    %cst = arith.constant dense<0.000000e+00> : vector<128x128xf32>
    %2 = tpu.matmul %0, %1, %cst {dimension_numbers = #tpu.dot_dimension_numbers<[1], [0], [0], [1], [0, 0, 1, 1], [], []>} : vector<128x256xbf16>, vector<256x128xbf16>, vector<128x128xf32> -> vector<128x128xf32>
    %cst_3 = arith.constant dense<0.000000e+00> : vector<128xf32>
    %3 = vector.multi_reduction <add>, %2, %cst_3 [0] : vector<128x128xf32> to vector<128xf32>
    %4 = vector.shape_cast %3 : vector<128xf32> to vector<1x128xf32>
    %cst_4 = arith.constant 1.280000e+02 : f32
    %5 = vector.broadcast %cst_4 : f32 to vector<1x128xf32>
    %6 = arith.divf %4, %5 : vector<1x128xf32>
    %7 = vector.broadcast %6 : vector<1x128xf32> to vector<128x128xf32>
    %8 = arith.subf %2, %7 : vector<128x128xf32>
    %9 = arith.mulf %8, %8 : vector<128x128xf32>
    %cst_5 = arith.constant dense<0.000000e+00> : vector<128xf32>
    %10 = vector.multi_reduction <add>, %9, %cst_5 [0] : vector<128x128xf32> to vector<128xf32>
    %11 = vector.shape_cast %10 : vector<128xf32> to vector<1x128xf32>
    %cst_6 = arith.constant 1.280000e+02 : f32
    %12 = vector.broadcast %cst_6 : f32 to vector<1x128xf32>
    %13 = arith.divf %11, %12 : vector<1x128xf32>
    %14 = vector.broadcast %6 : vector<1x128xf32> to vector<128x128xf32>
    %15 = arith.subf %2, %14 : vector<128x128xf32>
    %cst_7 = arith.constant 9.99999974E-6 : f32
    %16 = vector.broadcast %cst_7 : f32 to vector<1x128xf32>
    %17 = arith.addf %13, %16 : vector<1x128xf32>
    %18 = math.rsqrt %17 : vector<1x128xf32>
    %19 = vector.broadcast %18 : vector<1x128xf32> to vector<128x128xf32>
    %20 = arith.mulf %15, %19 : vector<128x128xf32>
    %c0_8 = arith.constant 0 : index
    %c0_9 = arith.constant 0 : index
    %21 = vector.load %arg2[%c0_8, %c0_9] : memref<1x128xf32, #tpu.memory_space<vmem>>, vector<1x128xf32>
    %22 = vector.broadcast %21 : vector<1x128xf32> to vector<128x128xf32>
    %23 = arith.mulf %20, %22 : vector<128x128xf32>
    %c0_10 = arith.constant 0 : index
    %c0_11 = arith.constant 0 : index
    %24 = vector.load %arg3[%c0_10, %c0_11] : memref<1x128xf32, #tpu.memory_space<vmem>>, vector<1x128xf32>
    %25 = vector.broadcast %24 : vector<1x128xf32> to vector<128x128xf32>
    %26 = arith.addf %23, %25 : vector<128x128xf32>
    %c0_12 = arith.constant 0 : index
    %27 = memref.load %arg4[%c0_12] : memref<1xf32, #tpu.memory_space<smem>>
    %cst_13 = arith.constant 0.000000e+00 : f32
    %28 = vector.broadcast %cst_13 : f32 to vector<128x128xf32>
    %29 = arith.cmpf ogt, %26, %28 : vector<128x128xf32>
    %30 = vector.broadcast %27 : f32 to vector<128x128xf32>
    %31 = arith.mulf %30, %26 : vector<128x128xf32>
    %32 = arith.select %29, %26, %31 : vector<128x128xi1>, vector<128x128xf32>
    %c0_14 = arith.constant 0 : index
    %c0_15 = arith.constant 0 : index
    %33 = vector.load %arg5[%c0_14, %c0_15] : memref<128x128xf32, #tpu.memory_space<vmem>>, vector<128x128xf32>
    tpu.vector_store %arg5[%c0_14, %c0_15], %32 {strides = array<i32>} : memref<128x128xf32, #tpu.memory_space<vmem>>, vector<128x128xf32>,
    return
  }
}

module attributes {stable_mosaic.version = 11 : i64} {
  func.func @_add_kernel(%arg0: memref<2x1024xf32, #tpu.memory_space<vmem>>, %arg1: memref<2x1024xf32, #tpu.memory_space<vmem>>, %arg2: memref<2x1024xf32, #tpu.memory_space<vmem>>) attributes {dimension_semantics = [], scalar_prefetch = 0 : i64, scratch_operands = 0 : i64, tpu.core_type = #tpu.core_type<tc>} {
    %c0 = arith.constant 0 : index
    %c0_0 = arith.constant 0 : index
    %0 = vector.load %arg0[%c0, %c0_0] : memref<2x1024xf32, #tpu.memory_space<vmem>>, vector<2x1024xf32>
    %c0_1 = arith.constant 0 : index
    %c0_2 = arith.constant 0 : index
    %1 = vector.load %arg1[%c0_1, %c0_2] : memref<2x1024xf32, #tpu.memory_space<vmem>>, vector<2x1024xf32>
    %2 = arith.addf %0, %1 : vector<2x1024xf32>
    %c0_3 = arith.constant 0 : index
    %c0_4 = arith.constant 0 : index
    %3 = vector.load %arg2[%c0_3, %c0_4] : memref<2x1024xf32, #tpu.memory_space<vmem>>, vector<2x1024xf32>
    tpu.vector_store %arg2[%c0_3, %c0_4], %2 {strides = array<i32>} : memref<2x1024xf32, #tpu.memory_space<vmem>>, vector<2x1024xf32>,
    return
  }
}

module attributes {stable_mosaic.version = 11 : i64} {
  func.func @_conv_bias_prelu_kernel(%arg0: i32, %arg1: memref<128x128xbf16, #tpu.memory_space<vmem>>, %arg2: memref<128x128xbf16, #tpu.memory_space<vmem>>, %arg3: memref<1x128xf32, #tpu.memory_space<vmem>>, %arg4: memref<1xf32, #tpu.memory_space<smem>>, %arg5: memref<128x128xf32, #tpu.memory_space<vmem>>) attributes {dimension_semantics = [#tpu.dimension_semantics<parallel>], iteration_bounds = array<i64: 4>, scalar_prefetch = 0 : i64, scratch_operands = 0 : i64, tpu.core_type = #tpu.core_type<tc>, window_params = [{transform_indices = @transform_0, window_bounds = array<i64: 128, 128>}, {pipeline_mode = #tpu.pipeline_mode<synchronous>, transform_indices = @transform_1, window_bounds = array<i64: 128, 128>}, {pipeline_mode = #tpu.pipeline_mode<synchronous>, transform_indices = @transform_2, window_bounds = array<i64: 1, 128>}, {transform_indices = @transform_3, window_bounds = array<i64: 1>}, {transform_indices = @transform_4, window_bounds = array<i64: 128, 128>}]} {
    %c0 = arith.constant 0 : index
    %c0_0 = arith.constant 0 : index
    %0 = vector.load %arg1[%c0, %c0_0] : memref<128x128xbf16, #tpu.memory_space<vmem>>, vector<128x128xbf16>
    %c0_1 = arith.constant 0 : index
    %c0_2 = arith.constant 0 : index
    %1 = vector.load %arg2[%c0_1, %c0_2] : memref<128x128xbf16, #tpu.memory_space<vmem>>, vector<128x128xbf16>
    %cst = arith.constant dense<0.000000e+00> : vector<128x128xf32>
    %2 = tpu.matmul %0, %1, %cst {dimension_numbers = #tpu.dot_dimension_numbers<[1], [0], [0], [1], [0, 0, 1, 1], [], []>} : vector<128x128xbf16>, vector<128x128xbf16>, vector<128x128xf32> -> vector<128x128xf32>
    %c0_3 = arith.constant 0 : index
    %c0_4 = arith.constant 0 : index
    %3 = vector.load %arg3[%c0_3, %c0_4] : memref<1x128xf32, #tpu.memory_space<vmem>>, vector<1x128xf32>
    %4 = vector.broadcast %3 : vector<1x128xf32> to vector<128x128xf32>
    %5 = arith.addf %2, %4 : vector<128x128xf32>
    %c0_5 = arith.constant 0 : index
    %6 = memref.load %arg4[%c0_5] : memref<1xf32, #tpu.memory_space<smem>>
    %cst_6 = arith.constant 0.000000e+00 : f32
    %7 = vector.broadcast %cst_6 : f32 to vector<128x128xf32>
    %8 = arith.cmpf ogt, %5, %7 : vector<128x128xf32>
    %9 = vector.broadcast %6 : f32 to vector<128x128xf32>
    %10 = arith.mulf %9, %5 : vector<128x128xf32>
    %11 = arith.select %8, %5, %10 : vector<128x128xi1>, vector<128x128xf32>
    %c0_7 = arith.constant 0 : index
    %c0_8 = arith.constant 0 : index
    %12 = vector.load %arg5[%c0_7, %c0_8] : memref<128x128xf32, #tpu.memory_space<vmem>>, vector<128x128xf32>
    tpu.vector_store %arg5[%c0_7, %c0_8], %11 {strides = array<i32>} : memref<128x128xf32, #tpu.memory_space<vmem>>, vector<128x128xf32>,
    return
  }
  func.func @transform_0(%arg0: i32) -> (i32, i32) {
    %c0_i32 = arith.constant 0 : i32
    %c0_i32_0 = arith.constant 0 : i32
    return %arg0, %c0_i32 : i32, i32
  }
  func.func @transform_1(%arg0: i32) -> (i32, i32) {
    %c0_i32 = arith.constant 0 : i32
    %c0_i32_0 = arith.constant 0 : i32
    %c0_i32_1 = arith.constant 0 : i32
    return %c0_i32, %c0_i32_0 : i32, i32
  }
  func.func @transform_2(%arg0: i32) -> (i32, i32) {
    %c0_i32 = arith.constant 0 : i32
    %c0_i32_0 = arith.constant 0 : i32
    %c0_i32_1 = arith.constant 0 : i32
    return %c0_i32, %c0_i32_0 : i32, i32
  }
  func.func @transform_3(%arg0: i32) -> i32 {
    %c0_i32 = arith.constant 0 : i32
    %c0_i32_0 = arith.constant 0 : i32
    return %c0_i32 : i32
  }
  func.func @transform_4(%arg0: i32) -> (i32, i32) {
    %c0_i32 = arith.constant 0 : i32
    %c0_i32_0 = arith.constant 0 : i32
    return %arg0, %c0_i32 : i32, i32
  }
}

</mosaic_0001>

<bundles_post_ra>
// kernel: _lambda_.8
= control target key start
LH: loop header
LB: loop body
LE: loop exit
PB: predicated region body
PF: predicated region fallthrough
CT: control target
= control target key end

     0   :  { %s69_s0 = inlined_call_operand.vmem [shape: f32[2,512], index: 0, kind: input, shape index: {}]   ;;  %s70_s1 = inlined_call_operand.vmem [shape: f32[2,512], index: 1, kind: input, shape index: {}]   ;;  %s71_s2 = inlined_call_operand.vmem [shape: f32[2,512], index: 2, kind: input, shape index: {}]   ;;  %s72_s3 = inlined_call_operand.vmem [shape: f32[2,512], index: 3, kind: input, shape index: {}]   ;;  %s73_s4 = inlined_call_operand.vmem [shape: f32[2,512], index: 4, kind: output, shape index: {}]  }
   0x1   :  { %v17_v0 = vld [vmem:[%s69_s0] sm:$0xff] }
   0x2   :  { %v18_v1 = vld [vmem:[%s70_s1] sm:$0xff] }
   0x3   :  { %v20_v2 = vld [vmem:[%s71_s2] sm:$0xff]  ;;  %v19_v3 = vmax.f32 %v17_v0, %v18_v1 }
   0x4   :  { %v21_v4 = vld [vmem:[%s72_s3] sm:$0xff] }
   0x5   :  { %v22_v5 = vmax.f32 %v20_v2, %v21_v4 }
   0x7   :  { %v23_v6 = vmax.f32 %v19_v3, %v22_v5 }
   0x9   :  { %24 = vst [vmem:[%s73_s4] sm:$0xff] %v23_v6 }

// kernel: _lambda_.7
= control target key start
LH: loop header
LB: loop body
LE: loop exit
PB: predicated region body
PF: predicated region fallthrough
CT: control target
= control target key end

     0   :  { %s3165_s1 = inlined_call_operand.vmem [shape: bf16[128,128], index: 1, kind: input, shape index: {}]   ;;  %s3166_s0 = inlined_call_operand.vmem [shape: bf16[512,128], index: 0, kind: input, shape index: {}]   ;;  %s3167_s2 = inlined_call_operand.vmem [shape: f32[1,128], index: 2, kind: input, shape index: {}]   ;;  %s3168_s3 = inlined_call_operand.vmem [shape: f32[1,128], index: 3, kind: input, shape index: {}]   ;;  %s3169_s4 = inlined_call_operand.<no memory space> [shape: f32[1], index: 4, kind: input, shape index: {}]   ;;  %s3170_s5 = inlined_call_operand.vmem [shape: f32[512,128], index: 5, kind: output, shape index: {}]  }
   0x1   :  { %v1457_v0 = vld [vmem:[%s3165_s1 + $0x38] sm:$0xff]  ;;  %v1456_v1 = vld [vmem:[%s3165_s1 + $0x30] sm:$0xff]  ;;  %v1455_v2 = vld [vmem:[%s3165_s1 + $0x28] sm:$0xff] }
   0x2   :  { %341 = vmatpush.bf16.msra.mxu0 %v1457_v0  ;;  %1458 = vmatpush.bf16.msra.mxu1 %v1457_v0  ;;  %v1454_v3 = vld [vmem:[%s3165_s1 + $0x20] sm:$0xff]  ;;  %v1453_v4 = vld [vmem:[%s3165_s1 + $0x18] sm:$0xff]  ;;  %v1452_v5 = vld [vmem:[%s3165_s1 + $0x10] sm:$0xff] }
   0x3   :  { %1459 = vmatpush.bf16.msra.mxu2 %v1457_v0  ;;  %1460 = vmatpush.bf16.msra.mxu3 %v1457_v0  ;;  %v1451_v6 = vld [vmem:[%s3165_s1 + $0x8] sm:$0xff]  ;;  %v1450_v7 = vld [vmem:[%s3165_s1] sm:$0xff]  ;;  %v1420_v13 = vld [vmem:[%s3166_s0 + $0x10] sm:$0xff] }
   0x4   :  { %v1418_v8 = vld [vmem:[%s3166_s0] sm:$0xff]  ;;  %v1419_v10 = vld [vmem:[%s3166_s0 + $0x8] sm:$0xff]  ;;  %v1428_v14 = vld [vmem:[%s3166_s0 + $0x50] sm:$0xff] }
   0x5   :  { %v1426_v9 = vld [vmem:[%s3166_s0 + $0x40] sm:$0xff]  ;;  %v1427_v11 = vld [vmem:[%s3166_s0 + $0x48] sm:$0xff]  ;;  %v1421_v16 = vld [vmem:[%s3166_s0 + $0x18] sm:$0xff] }
   0x6   :  { %342 = vmatpush.bf16.msra.mxu0 %v1456_v1  ;;  %1461 = vmatpush.bf16.msra.mxu1 %v1456_v1  ;;  %v1434_v12 = vld [vmem:[%s3166_s0 + $0x80] sm:$0xff]  ;;  %v1435_v15 = vld [vmem:[%s3166_s0 + $0x88] sm:$0xff]  ;;  %v1429_v17 = vld [vmem:[%s3166_s0 + $0x58] sm:$0xff] }
   0x7   :  { %1462 = vmatpush.bf16.msra.mxu2 %v1456_v1  ;;  %1463 = vmatpush.bf16.msra.mxu3 %v1456_v1  ;;  %v1436_v18 = vld [vmem:[%s3166_s0 + $0x90] sm:$0xff]  ;;  %v1442_v19 = vld [vmem:[%s3166_s0 + $0xc0] sm:$0xff]  ;;  %v1437_v22 = vld [vmem:[%s3166_s0 + $0x98] sm:$0xff] }
   0x8   :  { %v1422_v20 = vld [vmem:[%s3166_s0 + $0x20] sm:$0xff]  ;;  %v1443_v23 = vld [vmem:[%s3166_s0 + $0xc8] sm:$0xff]  ;;  %v1444_v27 = vld [vmem:[%s3166_s0 + $0xd0] sm:$0xff] }
   0x9   :  { %v1430_v21 = vld [vmem:[%s3166_s0 + $0x60] sm:$0xff]  ;;  %v1423_v24 = vld [vmem:[%s3166_s0 + $0x28] sm:$0xff]  ;;  %v1424_v28 = vld [vmem:[%s3166_s0 + $0x30] sm:$0xff] }
   0xa   :  { %343 = vmatpush.bf16.msra.mxu0 %v1455_v2  ;;  %1464 = vmatpush.bf16.msra.mxu1 %v1455_v2  ;;  %v1431_v25 = vld [vmem:[%s3166_s0 + $0x68] sm:$0xff]  ;;  %v1438_v26 = vld [vmem:[%s3166_s0 + $0xa0] sm:$0xff]  ;;  %v1432_v29 = vld [vmem:[%s3166_s0 + $0x70] sm:$0xff] }
   0xb   :  { %1465 = vmatpush.bf16.msra.mxu2 %v1455_v2  ;;  %1466 = vmatpush.bf16.msra.mxu3 %v1455_v2  ;;  %v1439_v30 = vld [vmem:[%s3166_s0 + $0xa8] sm:$0xff]  ;;  %v1445_v31 = vld [vmem:[%s3166_s0 + $0xd8] sm:$0xff]  ;;  %v1440_v34 = vld [vmem:[%s3166_s0 + $0xb0] sm:$0xff] }
   0xc   :  { %v1425_v32 = vld [vmem:[%s3166_s0 + $0x38] sm:$0xff]  ;;  %v1446_v35 = vld [vmem:[%s3166_s0 + $0xe0] sm:$0xff]  ;;  %v1447_v38 = vld [vmem:[%s3166_s0 + $0xe8] sm:$0xff] }
   0xd   :  { %v1433_v33 = vld [vmem:[%s3166_s0 + $0x78] sm:$0xff]  ;;  %v1448_v43 = vld [vmem:[%s3166_s0 + $0xf0] sm:$0xff] }
   0xe   :  { %344 = vmatpush.bf16.msra.mxu0 %v1454_v3  ;;  %1467 = vmatpush.bf16.msra.mxu1 %v1454_v3  ;;  %v1441_v37 = vld [vmem:[%s3166_s0 + $0xb8] sm:$0xff] }
   0xf   :  { %1468 = vmatpush.bf16.msra.mxu2 %v1454_v3  ;;  %1469 = vmatpush.bf16.msra.mxu3 %v1454_v3  ;;  %v1449_v48 = vld [vmem:[%s3166_s0 + $0xf8] sm:$0xff] }
  0x12   :  { %345 = vmatpush.bf16.msra.mxu0 %v1453_v4  ;;  %1470 = vmatpush.bf16.msra.mxu1 %v1453_v4 }
  0x13   :  { %1471 = vmatpush.bf16.msra.mxu2 %v1453_v4  ;;  %1472 = vmatpush.bf16.msra.mxu3 %v1453_v4 }
  0x16   :  { %346 = vmatpush.bf16.msra.mxu0 %v1452_v5  ;;  %1473 = vmatpush.bf16.msra.mxu1 %v1452_v5 }
  0x17   :  { %1474 = vmatpush.bf16.msra.mxu2 %v1452_v5  ;;  %1475 = vmatpush.bf16.msra.mxu3 %v1452_v5 }
  0x1a   :  { %347 = vmatpush.bf16.msra.mxu0 %v1451_v6  ;;  %1476 = vmatpush.bf16.msra.mxu1 %v1451_v6 }
  0x1b   :  { %1477 = vmatpush.bf16.msra.mxu2 %v1451_v6  ;;  %1478 = vmatpush.bf16.msra.mxu3 %v1451_v6 }
  0x1e   :  { %348 = vmatpush.bf16.msra.mxu0 %v1450_v7  ;;  %1479 = vmatpush.bf16.msra.mxu1 %v1450_v7 }
  0x1f   :  { %1480 = vmatpush.bf16.msra.mxu2 %v1450_v7  ;;  %1481 = vmatpush.bf16.msra.mxu3 %v1450_v7 }
  0x21   :  { %349 = vmatmul.bf16.vlgmr.msra.gmra.mxu0 %v1418_v8  ;;  %389 = vmatmul.bf16.vlgmr.msra.gmra.mxu1 %v1426_v9 }
  0x22   :  { %429 = vmatmul.bf16.vlgmr.msra.gmra.mxu2 %v1434_v12  ;;  %469 = vmatmul.bf16.vlgmr.msra.gmra.mxu3 %v1442_v19 }
  0x31   :  { %354 = vmatmul.bf16.gmra.mxu0 %v1419_v10  ;;  %394 = vmatmul.bf16.gmra.mxu1 %v1427_v11 }
  0x32   :  { %434 = vmatmul.bf16.gmra.mxu2 %v1435_v15  ;;  %474 = vmatmul.bf16.gmra.mxu3 %v1443_v23 }
  0x41   :  { %359 = vmatmul.bf16.gmra.mxu0 %v1420_v13  ;;  %399 = vmatmul.bf16.gmra.mxu1 %v1428_v14 }
  0x42   :  { %439 = vmatmul.bf16.gmra.mxu2 %v1436_v18  ;;  %479 = vmatmul.bf16.gmra.mxu3 %v1444_v27 }
  0x51   :  { %364 = vmatmul.bf16.gmra.mxu0 %v1421_v16  ;;  %404 = vmatmul.bf16.gmra.mxu1 %v1429_v17 }
  0x52   :  { %444 = vmatmul.bf16.gmra.mxu2 %v1437_v22  ;;  %484 = vmatmul.bf16.gmra.mxu3 %v1445_v31 }
  0x61   :  { %369 = vmatmul.bf16.gmra.mxu0 %v1422_v20  ;;  %409 = vmatmul.bf16.gmra.mxu1 %v1430_v21 }
  0x62   :  { %449 = vmatmul.bf16.gmra.mxu2 %v1438_v26  ;;  %489 = vmatmul.bf16.gmra.mxu3 %v1446_v35 }
  0x71   :  { %374 = vmatmul.bf16.gmra.mxu0 %v1423_v24  ;;  %414 = vmatmul.bf16.gmra.mxu1 %v1431_v25 }
  0x72   :  { %454 = vmatmul.bf16.gmra.mxu2 %v1439_v30  ;;  %494 = vmatmul.bf16.gmra.mxu3 %v1447_v38 }
  0x81   :  { %379 = vmatmul.bf16.gmra.mxu0 %v1424_v28  ;;  %419 = vmatmul.bf16.gmra.mxu1 %v1432_v29 }
  0x82   :  { %459 = vmatmul.bf16.gmra.mxu2 %v1440_v34  ;;  %499 = vmatmul.bf16.gmra.mxu3 %v1448_v43 }
  0x91   :  { %384 = vmatmul.bf16.gmra.mxu0 %v1425_v32  ;;  %424 = vmatmul.bf16.gmra.mxu1 %v1433_v33 }
  0x92   :  { %464 = vmatmul.bf16.gmra.mxu2 %v1441_v37  ;;  %504 = vmatmul.bf16.gmra.mxu3 %v1449_v48 }
  0x9e   :  { %v1628_v36 = vpop.f32.mrf.mxu0  ;;  %v1636_v39 = vpop.f32.mrf.mxu1 }
  0xa5   :  { %v1658_v49 = vpop.f32.mrf.mxu2  ;;  %v1680_v60 = vpop.f32.mrf.mxu3 }
  0xa6   :  { %v1638_v40 = vpop.f32.mrf.mxu0  ;;  %v1640_v41 = vpop.f32.mrf.mxu1  ;;  %3210 = vst [vmem:[#allocation3_spill] sm:$0xff] %v1658_v49 }
  0xa7   :  { %3212 = vst [vmem:[#allocation5_spill] sm:$0xff] %v1680_v60  ;;  %v510_v7 = vadd.f32 %v1638_v40, %v1628_v36 }
  0xad   :  { %v1664_v52 = vpop.f32.mrf.mxu2  ;;  %v1688_v0 = vpop.f32.mrf.mxu3 }
  0xae   :  { %v1642_v42 = vpop.f32.mrf.mxu0  ;;  %v1647_v44 = vpop.f32.mrf.mxu1  ;;  %3211 = vst [vmem:[#allocation4_spill] sm:$0xff] %v1664_v52 }
  0xaf   :  { %v511_v9 = vadd.f32 %v510_v7, %v1642_v42 }
  0xb5   :  { %v1670_v55 = vpop.f32.mrf.mxu2  ;;  %v1696_v4 = vpop.f32.mrf.mxu3 }
  0xb6   :  { %v1649_v45 = vpop.f32.mrf.mxu0  ;;  %v1653_v47 = vpop.f32.mrf.mxu1 }
  0xb7   :  { %v512_v12 = vadd.f32 %v511_v9, %v1649_v45 }
  0xbd   :  { %v1678_v59 = vpop.f32.mrf.mxu2  ;;  %v1709_v11 = vpop.f32.mrf.mxu3 }
  0xbe   :  { %v1651_v46 = vpop.f32.mrf.mxu0  ;;  %v1662_v51 = vpop.f32.mrf.mxu1 }
  0xbf   :  { %v513_v13 = vadd.f32 %v512_v12, %v1651_v46 }
  0xc5   :  { %v1686_v63 = vpop.f32.mrf.mxu2  ;;  %v1722_v20 = vpop.f32.mrf.mxu3 }
  0xc6   :  { %v1660_v50 = vpop.f32.mrf.mxu0  ;;  %v1668_v54 = vpop.f32.mrf.mxu1  ;;  %3216 = vst [vmem:[#allocation9_spill] sm:$0xff] %v1722_v20 }
  0xc7   :  { %v514_v14 = vadd.f32 %v513_v13, %v1660_v50 }
  0xcd   :  { %v1694_v3 = vpop.f32.mrf.mxu2  ;;  %v1735_v29 = vpop.f32.mrf.mxu3 }
  0xce   :  { %v1666_v53 = vpop.f32.mrf.mxu0  ;;  %v1674_v57 = vpop.f32.mrf.mxu1  ;;  %3213 = vst [vmem:[#allocation6_spill] sm:$0xff] %v1694_v3 }
  0xcf   :  { %v515_v16 = vadd.f32 %v514_v14, %v1666_v53  ;;  %3217 = vst [vmem:[#allocation10_spill] sm:$0xff] %v1735_v29 }
  0xd5   :  { %v1704_v8 = vpop.f32.mrf.mxu2  ;;  %v1748_v43 = vpop.f32.mrf.mxu3 }
  0xd6   :  { %v1672_v56 = vpop.f32.mrf.mxu0  ;;  %v1684_v62 = vpop.f32.mrf.mxu1  ;;  %3214 = vst [vmem:[#allocation7_spill] sm:$0xff] %v1704_v8 }
  0xd7   :  { %v516_v19 = vadd.f32 %v515_v16, %v1672_v56  ;;  %3218 = vst [vmem:[#allocation11_spill] sm:$0xff] %v1748_v43 }
  0xdd   :  { %v1719_v18 = vpop.f32.mrf.mxu2 }
  0xde   :  { %v1676_v58 = vpop.f32.mrf.mxu0  ;;  %v1692_v2 = vpop.f32.mrf.mxu1  ;;  %3215 = vst [vmem:[#allocation8_spill] sm:$0xff] %v1719_v18 }
  0xdf   :  { %v517_v21 = vadd.f32 %v516_v19, %v1676_v58  ;;  %v1759_v19 = vpop.f32.mrf.mxu3 }
  0xe0   :  { %3220 = vst [vmem:[#allocation13_spill] sm:$0xff] %v1759_v19 }
  0xe5   :  { %v1732_v27 = vpop.f32.mrf.mxu2 }
  0xe6   :  { %v1682_v61 = vpop.f32.mrf.mxu0  ;;  %v1700_v6 = vpop.f32.mrf.mxu1 }
  0xe7   :  { %v518_v22 = vadd.f32 %v517_v21, %v1682_v61 }
  0xed   :  { %v1745_v37 = vpop.f32.mrf.mxu2 }
  0xee   :  { %v1690_v1 = vpop.f32.mrf.mxu0  ;;  %v1714_v15 = vpop.f32.mrf.mxu1 }
  0xef   :  { %v519_v23 = vadd.f32 %v518_v22, %v1690_v1 }
  0xf5   :  { %v1756_v14 = vpop.f32.mrf.mxu2 }
  0xf6   :  { %v1698_v5 = vpop.f32.mrf.mxu0  ;;  %v1729_v25 = vpop.f32.mrf.mxu1  ;;  %3219 = vst [vmem:[#allocation12_spill] sm:$0xff] %v1756_v14 }
  0xf7   :  { %v520_v26 = vadd.f32 %v519_v23, %v1698_v5 }
  0xfe   :  { %v1707_v10 = vpop.f32.mrf.mxu0  ;;  %v1742_v34 = vpop.f32.mrf.mxu1 }
  0xff   :  { %v521_v28 = vadd.f32 %v520_v26, %v1707_v10 }
 0x106   :  { %v1717_v17 = vpop.f32.mrf.mxu0  ;;  %v1753_v12 = vpop.f32.mrf.mxu1 }
 0x107   :  { %v522_v30 = vadd.f32 %v521_v28, %v1717_v17 }
 0x10e   :  { %v1727_v24 = vpop.f32.mrf.mxu0  ;;  %v1764_v26 = vpop.f32.mrf.mxu1 }
 0x10f   :  { %v523_v31 = vadd.f32 %v522_v30, %v1727_v24  ;;  %3221 = vst [vmem:[#allocation14_spill] sm:$0xff] %v1764_v26  ;;  %v1767_v30 = vpop.f32.mrf.mxu2 }
 0x110   :  { %3222 = vst [vmem:[#allocation15_spill] sm:$0xff] %v1767_v30 }
 0x116   :  { %v1739_v32 = vpop.f32.mrf.mxu0 }
 0x117   :  { %v524_v33 = vadd.f32 %v523_v31, %v1739_v32 }
 0x119   :  { %v525_v35 = vadd.f32 %v524_v33, %v1636_v39  ;;  %v1770_v33 = vpop.f32.mrf.mxu3 }
 0x11a   :  { %3223 = vst [vmem:[#allocation16_spill] sm:$0xff] %v1770_v33 }
 0x11b   :  { %v526_v38 = vadd.f32 %v525_v35, %v1640_v41 }
 0x11d   :  { %v527_v48 = vadd.f32 %v526_v38, %v1647_v44 }
 0x11f   :  { %v528_v7 = vadd.f32 %v527_v48, %v1653_v47 }
 0x121   :  { %v529_v9 = vadd.f32 %v528_v7, %v1662_v51  ;;  %v1775_v7 = vpop.f32.mrf.mxu1 }
 0x123   :  { %v530_v13 = vadd.f32 %v529_v9, %v1668_v54 }
 0x125   :  { %v531_v16 = vadd.f32 %v530_v13, %v1674_v57  ;;  %v1778_v13 = vpop.f32.mrf.mxu2 }
 0x127   :  { %v532_v21 = vadd.f32 %v531_v16, %v1684_v62 }
 0x129   :  { %v533_v22 = vadd.f32 %v532_v21, %v1692_v2  ;;  %v1781_v21 = vpop.f32.mrf.mxu3 }
 0x12a   :  { %3224 = vst [vmem:[#allocation17_spill] sm:$0xff] %v1781_v21 }
 0x12b   :  { %v534_v23 = vadd.f32 %v533_v22, %v1700_v6 }
 0x12d   :  { %v535_v28 = vadd.f32 %v534_v23, %v1714_v15 }
 0x12f   :  { %v536_v31 = vadd.f32 %v535_v28, %v1729_v25 }
 0x131   :  { %v537_v35 = vadd.f32 %v536_v31, %v1742_v34 }
 0x133   :  { %v538_v38 = vadd.f32 %v537_v35, %v1753_v12  ;;  %v1787_v35 = vpop.f32.mrf.mxu2 }
 0x135   :  { %v539_v48 = vadd.f32 %v538_v38, %v1764_v26  ;;  %v1790_v26 = vpop.f32.mrf.mxu3 }
 0x136   :  { %3225 = vst [vmem:[#allocation18_spill] sm:$0xff] %v1790_v26 }
 0x137   :  { %v540_v9 = vadd.f32 %v539_v48, %v1775_v7 }
 0x139   :  { %v541_v16 = vadd.f32 %v540_v9, %v1658_v49 }
 0x13b   :  { %v542_v22 = vadd.f32 %v541_v16, %v1664_v52  ;;  %v1796_v52 = vpop.f32.mrf.mxu2 }
 0x13d   :  { %v543_v23 = vadd.f32 %v542_v22, %v1670_v55 }
 0x13f   :  { %v544_v28 = vadd.f32 %v543_v23, %v1678_v59  ;;  %v1799_v23 = vpop.f32.mrf.mxu3 }
 0x141   :  { %v545_v31 = vadd.f32 %v544_v28, %v1686_v63 }
 0x143   :  { %v546_v38 = vadd.f32 %v545_v31, %v1694_v3 }
 0x145   :  { %v547_v48 = vadd.f32 %v546_v38, %v1704_v8  ;;  %v467_v8 = vpop.f32.mrf.mxu2 }
 0x147   :  { %v548_v9 = vadd.f32 %v547_v48, %v1719_v18  ;;  %v1805_v18 = vpop.f32.mrf.mxu3 }
 0x148   :  { %3226 = vst [vmem:[#allocation19_spill] sm:$0xff] %v1805_v18 }
 0x149   :  { %v549_v49 = vadd.f32 %v548_v9, %v1732_v27 }
 0x14b   :  { %v550_v16 = vadd.f32 %v549_v49, %v1745_v37 }
 0x14d   :  { %v551_v22 = vadd.f32 %v550_v16, %v1756_v14 }
 0x14f   :  { %v552_v28 = vadd.f32 %v551_v22, %v1767_v30  ;;  %v1812_v30 = vpop.f32.mrf.mxu3 }
 0x151   :  { %v553_v31 = vadd.f32 %v552_v28, %v1778_v13 }
 0x153   :  { %v554_v3 = vadd.f32 %v553_v31, %v1787_v35 }
 0x155   :  { %v555_v38 = vadd.f32 %v554_v3, %v1796_v52 }
 0x157   :  { %v556_v48 = vadd.f32 %v555_v38, %v467_v8 }
 0x159   :  { %v557_v49 = vadd.f32 %v556_v48, %v1680_v60  ;;  %v1819_v60 = vpop.f32.mrf.mxu3 }
 0x15b   :  { %v558_v9 = vadd.f32 %v557_v49, %v1688_v0 }
 0x15d   :  { %v559_v16 = vadd.f32 %v558_v9, %v1696_v4 }
 0x15f   :  { %v560_v14 = vadd.f32 %v559_v16, %v1709_v11  ;;  %v1489_v16 = vmov 512.0  }
 0x160   :  { %1485 = vrcp.f32 %v1489_v16 }
 0x161   :  { %v561_v22 = vadd.f32 %v560_v14, %v1722_v20 }
 0x163   :  { %v562_v28 = vadd.f32 %v561_v22, %v1735_v29 }
 0x165   :  { %v563_v3 = vadd.f32 %v562_v28, %v1748_v43  ;;  %v507_v43 = vpop.f32.mrf.mxu3 }
 0x167   :  { %v564_v31 = vadd.f32 %v563_v3, %v1759_v19  ;;  %v1486_v19 = vpop.eup %1485 }
 0x168   :  { %vm584_vm0 = vweird.f32 %v1486_v19 }
 0x169   :  { %v565_v38 = vadd.f32 %v564_v31, %v1770_v33 }
 0x16b   :  { %v566_v48 = vadd.f32 %v565_v38, %v1781_v21  ;;  %v580_v38 = vmul.f32 512.0, %v1486_v19 }
 0x16d   :  { %v567_v49 = vadd.f32 %v566_v48, %v1790_v26  ;;  %v581_v29 = vsub.f32 1.0, %v580_v38 }
 0x16f   :  { %v568_v9 = vadd.f32 %v567_v49, %v1799_v23  ;;  %v582_v48 = vmul.f32 %v1486_v19, %v581_v29 }
 0x171   :  { %v569_v14 = vadd.f32 %v568_v9, %v1805_v18  ;;  %v583_v49 = vadd.f32 %v1486_v19, %v582_v48 }
 0x173   :  { %v570_v22 = vadd.f32 %v569_v14, %v1812_v30  ;;  %v1826_v18 = vsel %vm584_vm0, %v1486_v19, %v583_v49 }
 0x175   :  { %v571_v28 = vadd.f32 %v570_v22, %v1819_v60 }
 0x177   :  { %v572_v3 = vadd.f32 %v571_v28, %v507_v43 }
 0x179   :  { %v573_v31 = vrot.slane %v572_v3, 4 }
 0x17b   :  { %v574_v33 = vadd.f32 %v573_v31, %v572_v3 }
 0x17d   :  { %v575_v21 = vrot.slane %v574_v33, 2 }
 0x17f   :  { %v576_v20 = vadd.f32 %v575_v21, %v574_v33 }
 0x181   :  { %v577_v26 = vrot.slane %v576_v20, 1 }
 0x183   :  { %v578_v9 = vadd.f32 %v577_v26, %v576_v20 }
 0x185   :  { %v1829_v14 = vmul.f32 %v1826_v18, %v578_v9 }
 0x187   :  { %v1832_v16 = vsub.f32 %v467_v8, %v1829_v14  ;;  %v1835_v22 = vsub.f32 %v507_v43, %v1829_v14  ;;  %v1839_v28 = vsub.f32 %v1628_v36, %v1829_v14  ;;  %v1843_v29 = vsub.f32 %v1638_v40, %v1829_v14 }
 0x188   :  { %v1847_v20 = vsub.f32 %v1642_v42, %v1829_v14  ;;  %v1855_v43 = vsub.f32 %v1649_v45, %v1829_v14  ;;  %v1859_v36 = vsub.f32 %v1651_v46, %v1829_v14  ;;  %v1865_v42 = vsub.f32 %v1660_v50, %v1829_v14 }
 0x189   :  { %3227 = vst [vmem:[#allocation20_spill] sm:$0xff] %v1832_v16  ;;  %v651_v19 = vmul.f32 %v1839_v28, %v1839_v28  ;;  %v652_v8 = vmul.f32 %v1843_v29, %v1843_v29  ;;  %v1871_v45 = vsub.f32 %v1666_v53, %v1829_v14  ;;  %v1877_v31 = vsub.f32 %v1672_v56, %v1829_v14 }
 0x18a   :  { %v653_v40 = vmul.f32 %v1847_v20, %v1847_v20  ;;  %v654_v33 = vmul.f32 %v1855_v43, %v1855_v43  ;;  %v655_v46 = vmul.f32 %v1859_v36, %v1859_v36  ;;  %v656_v50 = vmul.f32 %v1865_v42, %v1865_v42 }
 0x18b   :  { %v715_v26 = vadd.f32 %v652_v8, %v651_v19  ;;  %v1883_v48 = vsub.f32 %v1676_v58, %v1829_v14  ;;  %v657_v53 = vmul.f32 %v1871_v45, %v1871_v45  ;;  %v1889_v9 = vsub.f32 %v1682_v61, %v1829_v14 }
 0x18c   :  { %v658_v56 = vmul.f32 %v1877_v31, %v1877_v31  ;;  %v1895_v8 = vsub.f32 %v1690_v1, %v1829_v14 }
 0x18d   :  { %v716_v21 = vadd.f32 %v715_v26, %v653_v40  ;;  %v659_v58 = vmul.f32 %v1883_v48, %v1883_v48  ;;  %v1901_v26 = vsub.f32 %v1698_v5, %v1829_v14  ;;  %v660_v61 = vmul.f32 %v1889_v9, %v1889_v9 }
 0x18e   :  { %v661_v1 = vmul.f32 %v1895_v8, %v1895_v8 }
 0x18f   :  { %v717_v3 = vadd.f32 %v716_v21, %v654_v33  ;;  %v1907_v21 = vsub.f32 %v1707_v10, %v1829_v14  ;;  %v662_v5 = vmul.f32 %v1901_v26, %v1901_v26 }
 0x191   :  { %v718_v38 = vadd.f32 %v717_v3, %v655_v46  ;;  %v1913_v3 = vsub.f32 %v1717_v17, %v1829_v14  ;;  %v663_v10 = vmul.f32 %v1907_v21, %v1907_v21 }
 0x193   :  { %v719_v49 = vadd.f32 %v718_v38, %v656_v50  ;;  %v1919_v38 = vsub.f32 %v1727_v24, %v1829_v14  ;;  %v664_v17 = vmul.f32 %v1913_v3, %v1913_v3 }
 0x195   :  { %v720_v19 = vadd.f32 %v719_v49, %v657_v53  ;;  %v1925_v49 = vsub.f32 %v1739_v32, %v1829_v14  ;;  %v665_v24 = vmul.f32 %v1919_v38, %v1919_v38 }
 0x197   :  { %v721_v40 = vadd.f32 %v720_v19, %v658_v56  ;;  %v1931_v19 = vsub.f32 %v1636_v39, %v1829_v14  ;;  %v666_v32 = vmul.f32 %v1925_v49, %v1925_v49 }
 0x199   :  { %v722_v33 = vadd.f32 %v721_v40, %v659_v58  ;;  %v1937_v40 = vsub.f32 %v1640_v41, %v1829_v14  ;;  %v667_v39 = vmul.f32 %v1931_v19, %v1931_v19 }
 0x19b   :  { %v723_v46 = vadd.f32 %v722_v33, %v660_v61  ;;  %v1943_v33 = vsub.f32 %v1647_v44, %v1829_v14  ;;  %v668_v41 = vmul.f32 %v1937_v40, %v1937_v40 }
 0x19d   :  { %v724_v50 = vadd.f32 %v723_v46, %v661_v1  ;;  %v1949_v46 = vsub.f32 %v1653_v47, %v1829_v14  ;;  %v669_v44 = vmul.f32 %v1943_v33, %v1943_v33 }
 0x19f   :  { %v725_v53 = vadd.f32 %v724_v50, %v662_v5  ;;  %v1955_v50 = vsub.f32 %v1662_v51, %v1829_v14  ;;  %v670_v47 = vmul.f32 %v1949_v46, %v1949_v46 }
 0x1a1   :  { %v726_v56 = vadd.f32 %v725_v53, %v663_v10  ;;  %v1961_v53 = vsub.f32 %v1668_v54, %v1829_v14  ;;  %v671_v51 = vmul.f32 %v1955_v50, %v1955_v50 }
 0x1a3   :  { %v727_v58 = vadd.f32 %v726_v56, %v664_v17  ;;  %v1967_v56 = vsub.f32 %v1674_v57, %v1829_v14  ;;  %v672_v54 = vmul.f32 %v1961_v53, %v1961_v53 }
 0x1a5   :  { %v728_v61 = vadd.f32 %v727_v58, %v665_v24  ;;  %v1973_v58 = vsub.f32 %v1684_v62, %v1829_v14  ;;  %v673_v57 = vmul.f32 %v1967_v56, %v1967_v56 }
 0x1a7   :  { %v729_v1 = vadd.f32 %v728_v61, %v666_v32  ;;  %v1979_v61 = vsub.f32 %v1692_v2, %v1829_v14  ;;  %v674_v62 = vmul.f32 %v1973_v58, %v1973_v58 }
 0x1a9   :  { %v730_v5 = vadd.f32 %v729_v1, %v667_v39  ;;  %v1985_v1 = vsub.f32 %v1700_v6, %v1829_v14  ;;  %v675_v2 = vmul.f32 %v1979_v61, %v1979_v61 }
 0x1ab   :  { %v731_v10 = vadd.f32 %v730_v5, %v668_v41  ;;  %v1991_v5 = vsub.f32 %v1714_v15, %v1829_v14  ;;  %v676_v6 = vmul.f32 %v1985_v1, %v1985_v1 }
 0x1ad   :  { %v732_v17 = vadd.f32 %v731_v10, %v669_v44  ;;  %v1997_v10 = vsub.f32 %v1729_v25, %v1829_v14  ;;  %v677_v15 = vmul.f32 %v1991_v5, %v1991_v5 }
 0x1af   :  { %v733_v24 = vadd.f32 %v732_v17, %v670_v47  ;;  %v2003_v17 = vsub.f32 %v1742_v34, %v1829_v14  ;;  %v678_v25 = vmul.f32 %v1997_v10, %v1997_v10 }
 0x1b1   :  { %v734_v32 = vadd.f32 %v733_v24, %v671_v51  ;;  %v2009_v24 = vsub.f32 %v1753_v12, %v1829_v14  ;;  %v679_v34 = vmul.f32 %v2003_v17, %v2003_v17 }
 0x1b3   :  { %v735_v39 = vadd.f32 %v734_v32, %v672_v54  ;;  %v3228_v32 = vld [vmem:[#allocation14_spill] sm:$0xff]  ;;  %v680_v12 = vmul.f32 %v2009_v24, %v2009_v24 }
 0x1b5   :  { %v736_v41 = vadd.f32 %v735_v39, %v673_v57  ;;  %v2015_v57 = vsub.f32 %v3228_v32, %v1829_v14 }
 0x1b7   :  { %v737_v44 = vadd.f32 %v736_v41, %v674_v62  ;;  %v2021_v62 = vsub.f32 %v1775_v7, %v1829_v14 }
 0x1b9   :  { %v738_v47 = vadd.f32 %v737_v44, %v675_v2  ;;  %v3229_v2 = vld [vmem:[#allocation3_spill] sm:$0xff]  ;;  %v682_v7 = vmul.f32 %v2021_v62, %v2021_v62 }
 0x1ba   :  { %v2027_v44 = vsub.f32 %v3229_v2, %v1829_v14  ;;  %v2051_v2 = vsub.f32 %v1686_v63, %v1829_v14 }
 0x1bb   :  { %v739_v51 = vadd.f32 %v738_v47, %v676_v6  ;;  %v681_v6 = vmul.f32 %v2015_v57, %v2015_v57 }
 0x1bc   :  { %v683_v32 = vmul.f32 %v2027_v44, %v2027_v44  ;;  %v687_v63 = vmul.f32 %v2051_v2, %v2051_v2 }
 0x1bd   :  { %v740_v54 = vadd.f32 %v739_v51, %v677_v15  ;;  %v3230_v15 = vld [vmem:[#allocation4_spill] sm:$0xff] }
 0x1be   :  { %v2033_v51 = vsub.f32 %v3230_v15, %v1829_v14 }
 0x1bf   :  { %v741_v39 = vadd.f32 %v740_v54, %v678_v25  ;;  %v2039_v54 = vsub.f32 %v1670_v55, %v1829_v14 }
 0x1c0   :  { %3231 = vst [vmem:[#allocation14_spill] sm:$0xff] %v2033_v51 }
 0x1c1   :  { %v742_v41 = vadd.f32 %v741_v39, %v679_v34  ;;  %3232 = vst [vmem:[#allocation3_spill] sm:$0xff] %v2039_v54  ;;  %v2045_v39 = vsub.f32 %v1678_v59, %v1829_v14  ;;  %v685_v55 = vmul.f32 %v2039_v54, %v2039_v54 }
 0x1c3   :  { %v743_v47 = vadd.f32 %v742_v41, %v680_v12  ;;  %v684_v12 = vmul.f32 %v2033_v51, %v2033_v51  ;;  %v686_v59 = vmul.f32 %v2045_v39, %v2045_v39 }
 0x1c5   :  { %v744_v25 = vadd.f32 %v743_v47, %v681_v6  ;;  %v3233_v47 = vld [vmem:[#allocation6_spill] sm:$0xff] }
 0x1c6   :  { %v2057_v15 = vsub.f32 %v3233_v47, %v1829_v14  ;;  %v2075_v47 = vsub.f32 %v1732_v27, %v1829_v14 }
 0x1c7   :  { %v745_v34 = vadd.f32 %v744_v25, %v682_v7  ;;  %v3235_v25 = vld [vmem:[#allocation7_spill] sm:$0xff] }
 0x1c8   :  { %3234 = vst [vmem:[#allocation4_spill] sm:$0xff] %v2057_v15  ;;  %v2063_v51 = vsub.f32 %v3235_v25, %v1829_v14  ;;  %v2081_v25 = vsub.f32 %v1745_v37, %v1829_v14  ;;  %v691_v27 = vmul.f32 %v2075_v47, %v2075_v47 }
 0x1c9   :  { %v746_v41 = vadd.f32 %v745_v34, %v683_v32  ;;  %v3237_v34 = vld [vmem:[#allocation8_spill] sm:$0xff] }
 0x1ca   :  { %3236 = vst [vmem:[#allocation6_spill] sm:$0xff] %v2063_v51  ;;  %v2069_v54 = vsub.f32 %v3237_v34, %v1829_v14  ;;  %v3238_v34 = vld [vmem:[#allocation12_spill] sm:$0xff]  ;;  %v692_v37 = vmul.f32 %v2081_v25, %v2081_v25 }
 0x1cb   :  { %v747_v6 = vadd.f32 %v746_v41, %v684_v12  ;;  %v688_v12 = vmul.f32 %v2057_v15, %v2057_v15  ;;  %v2087_v15 = vsub.f32 %v3238_v34, %v1829_v14  ;;  %v2105_v34 = vsub.f32 %v1787_v35, %v1829_v14 }
 0x1cd   :  { %v748_v7 = vadd.f32 %v747_v6, %v685_v55  ;;  %v689_v55 = vmul.f32 %v2063_v51, %v2063_v51 }
 0x1cf   :  { %v749_v32 = vadd.f32 %v748_v7, %v686_v59  ;;  %v690_v59 = vmul.f32 %v2069_v54, %v2069_v54 }
 0x1d1   :  { %v750_v41 = vadd.f32 %v749_v32, %v687_v63  ;;  %v3239_v32 = vld [vmem:[#allocation15_spill] sm:$0xff] }
 0x1d2   :  { %v2093_v51 = vsub.f32 %v3239_v32, %v1829_v14  ;;  %v2111_v32 = vsub.f32 %v1796_v52, %v1829_v14  ;;  %v2125_v52 = vsub.f32 %v1688_v0, %v1829_v14 }
 0x1d3   :  { %v751_v6 = vadd.f32 %v750_v41, %v688_v12  ;;  %v2099_v41 = vsub.f32 %v1778_v13, %v1829_v14 }
 0x1d4   :  { %3240 = vst [vmem:[#allocation7_spill] sm:$0xff] %v2093_v51  ;;  %v700_v0 = vmul.f32 %v2125_v52, %v2125_v52 }
 0x1d5   :  { %v752_v7 = vadd.f32 %v751_v6, %v689_v55  ;;  %v693_v55 = vmul.f32 %v2087_v15, %v2087_v15  ;;  %v695_v13 = vmul.f32 %v2099_v41, %v2099_v41  ;;  %3243 = vst [vmem:[#allocation12_spill] sm:$0xff] %v2125_v52 }
 0x1d7   :  { %v753_v63 = vadd.f32 %v752_v7, %v690_v59  ;;  %v694_v59 = vmul.f32 %v2093_v51, %v2093_v51  ;;  %v697_v51 = vmul.f32 %v2111_v32, %v2111_v32 }
 0x1d9   :  { %v754_v12 = vadd.f32 %v753_v63, %v691_v27  ;;  %v696_v63 = vmul.f32 %v2105_v34, %v2105_v34 }
 0x1db   :  { %v755_v6 = vadd.f32 %v754_v12, %v692_v37  ;;  %v3241_v12 = vld [vmem:[#allocation5_spill] sm:$0xff] }
 0x1dc   :  { %v2119_v35 = vsub.f32 %v3241_v12, %v1829_v14  ;;  %v2137_v12 = vsub.f32 %v1709_v11, %v1829_v14 }
 0x1dd   :  { %v756_v7 = vadd.f32 %v755_v6, %v693_v55  ;;  %v698_v6 = vmul.f32 %v1832_v16, %v1832_v16 }
 0x1de   :  { %3242 = vst [vmem:[#allocation8_spill] sm:$0xff] %v2119_v35  ;;  %v702_v11 = vmul.f32 %v2137_v12, %v2137_v12 }
 0x1df   :  { %v757_v27 = vadd.f32 %v756_v7, %v694_v59  ;;  %v2131_v7 = vsub.f32 %v1696_v4, %v1829_v14  ;;  %3245 = vst [vmem:[#allocation5_spill] sm:$0xff] %v2137_v12 }
 0x1e1   :  { %v758_v37 = vadd.f32 %v757_v27, %v695_v13  ;;  %3244 = vst [vmem:[#allocation15_spill] sm:$0xff] %v2131_v7  ;;  %v699_v13 = vmul.f32 %v2119_v35, %v2119_v35  ;;  %v701_v4 = vmul.f32 %v2131_v7, %v2131_v7 }
 0x1e3   :  { %v759_v55 = vadd.f32 %v758_v37, %v696_v63  ;;  %v3246_v37 = vld [vmem:[#allocation9_spill] sm:$0xff] }
 0x1e4   :  { %v2143_v16 = vsub.f32 %v3246_v37, %v1829_v14  ;;  %v3251_v37 = vld [vmem:[#allocation13_spill] sm:$0xff] }
 0x1e5   :  { %v760_v59 = vadd.f32 %v759_v55, %v697_v51  ;;  %v3248_v55 = vld [vmem:[#allocation10_spill] sm:$0xff]  ;;  %v2161_v7 = vsub.f32 %v3251_v37, %v1829_v14 }
 0x1e6   :  { %3247 = vst [vmem:[#allocation9_spill] sm:$0xff] %v2143_v16  ;;  %v2149_v35 = vsub.f32 %v3248_v55, %v1829_v14  ;;  %v3252_v55 = vld [vmem:[#allocation16_spill] sm:$0xff]  ;;  %v3256_v37 = vld [vmem:[#allocation18_spill] sm:$0xff] }
 0x1e7   :  { %v761_v27 = vadd.f32 %v760_v59, %v698_v6  ;;  %v3250_v59 = vld [vmem:[#allocation11_spill] sm:$0xff]  ;;  %v2167_v12 = vsub.f32 %v3252_v55, %v1829_v14  ;;  %v2185_v55 = vsub.f32 %v1799_v23, %v1829_v14  ;;  %v2199_v23 = vsub.f32 %v1812_v30, %v1829_v14 }
 0x1e8   :  { %3249 = vst [vmem:[#allocation10_spill] sm:$0xff] %v2149_v35  ;;  %v2155_v52 = vsub.f32 %v3250_v59, %v1829_v14  ;;  %v3254_v59 = vld [vmem:[#allocation17_spill] sm:$0xff]  ;;  %v714_v30 = vmul.f32 %v1835_v22, %v1835_v22 }
 0x1e9   :  { %v762_v63 = vadd.f32 %v761_v27, %v699_v13  ;;  %v703_v13 = vmul.f32 %v2143_v16, %v2143_v16  ;;  %3253 = vst [vmem:[#allocation11_spill] sm:$0xff] %v2167_v12  ;;  %v2173_v16 = vsub.f32 %v3254_v59, %v1829_v14 }
 0x1ea   :  { %3258 = vst [vmem:[#allocation17_spill] sm:$0xff] %v2185_v55 }
 0x1eb   :  { %v763_v51 = vadd.f32 %v762_v63, %v700_v0  ;;  %v704_v0 = vmul.f32 %v2149_v35, %v2149_v35  ;;  %3255 = vst [vmem:[#allocation13_spill] sm:$0xff] %v2173_v16  ;;  %v2179_v35 = vsub.f32 %v3256_v37, %v1829_v14 }
 0x1ed   :  { %v764_v6 = vadd.f32 %v763_v51, %v701_v4  ;;  %v705_v4 = vmul.f32 %v2155_v52, %v2155_v52  ;;  %3257 = vst [vmem:[#allocation16_spill] sm:$0xff] %v2179_v35  ;;  %v709_v59 = vmul.f32 %v2179_v35, %v2179_v35 }
 0x1ef   :  { %v765_v27 = vadd.f32 %v764_v6, %v702_v11  ;;  %v706_v11 = vmul.f32 %v2161_v7, %v2161_v7 }
 0x1f1   :  { %v766_v63 = vadd.f32 %v765_v27, %v703_v13  ;;  %v707_v13 = vmul.f32 %v2167_v12, %v2167_v12  ;;  %v710_v12 = vmul.f32 %v2185_v55, %v2185_v55 }
 0x1f3   :  { %v767_v51 = vadd.f32 %v766_v63, %v704_v0  ;;  %v708_v0 = vmul.f32 %v2173_v16, %v2173_v16 }
 0x1f5   :  { %v768_v6 = vadd.f32 %v767_v51, %v705_v4  ;;  %v3259_v51 = vld [vmem:[#allocation19_spill] sm:$0xff] }
 0x1f6   :  { %v2193_v37 = vsub.f32 %v3259_v51, %v1829_v14  ;;  %3261 = vst [vmem:[#allocation19_spill] sm:$0xff] %v2199_v23 }
 0x1f7   :  { %v769_v27 = vadd.f32 %v768_v6, %v706_v11 }
 0x1f8   :  { %3260 = vst [vmem:[#allocation18_spill] sm:$0xff] %v2193_v37 }
 0x1f9   :  { %v770_v63 = vadd.f32 %v769_v27, %v707_v13  ;;  %v711_v13 = vmul.f32 %v2193_v37, %v2193_v37 }
 0x1fb   :  { %v771_v4 = vadd.f32 %v770_v63, %v708_v0  ;;  %v2205_v0 = vsub.f32 %v1819_v60, %v1829_v14  ;;  %v712_v63 = vmul.f32 %v2199_v23, %v2199_v23 }
 0x1fd   :  { %v772_v11 = vadd.f32 %v771_v4, %v709_v59  ;;  %3262 = vst [vmem:[#allocation21_spill] sm:$0xff] %v2205_v0  ;;  %v713_v59 = vmul.f32 %v2205_v0, %v2205_v0 }
 0x1ff   :  { %v773_v6 = vadd.f32 %v772_v11, %v710_v12 }
 0x201   :  { %v774_v27 = vadd.f32 %v773_v6, %v711_v13 }
 0x203   :  { %v775_v51 = vadd.f32 %v774_v27, %v712_v63 }
 0x205   :  { %v776_v12 = vadd.f32 %v775_v51, %v713_v59 }
 0x207   :  { %v777_v4 = vadd.f32 %v776_v12, %v714_v30 }
 0x209   :  { %v778_v11 = vrot.slane %v777_v4, 4 }
 0x20b   :  { %v779_v55 = vadd.f32 %v778_v11, %v777_v4  ;;  %v3265_v4 = vld [vmem:[#allocation14_spill] sm:$0xff]  ;;  %v3266_v11 = vld [vmem:[#allocation3_spill] sm:$0xff] }
 0x20d   :  { %v780_v37 = vrot.slane %v779_v55, 2 }
 0x20f   :  { %v781_v6 = vadd.f32 %v780_v37, %v779_v55 }
 0x211   :  { %v782_v13 = vrot.slane %v781_v6, 1 }
 0x213   :  { %v783_v35 = vadd.f32 %v782_v13, %v781_v6  ;;  %v3267_v6 = vld [vmem:[#allocation4_spill] sm:$0xff]  ;;  %v3268_v13 = vld [vmem:[#allocation6_spill] sm:$0xff] }
 0x215   :  { %v784_v60 = vmul.f32 %v783_v35, %v1826_v18  ;;  %v2221_v18 = vld [vmem:[%s3167_s2] ss:$0 sm:$0xff] }
 0x217   :  { %v785_v14 = vadd.f32 1e-05, %v784_v60 }
 0x219   :  { %1487 = vrsqrt.f32 %v785_v14  ;;  %vm792_vm2 = vweird.f32 %v785_v14 }
 0x21f   :  { %v1488_v23 = vpop.eup %1487 }
 0x220   :  { %v787_v27 = vmul.f32 %v1488_v23, %v785_v14  ;;  %vm793_vm1 = vweird.f32 %v1488_v23 }
 0x221   :  { %vm794_vm3 = vmor %vm792_vm2, %vm793_vm1 }
 0x222   :  { %v788_v63 = vmul.f32 %v1488_v23, %v787_v27 }
 0x224   :  { %v789_v16 = vmul.f32 0.5, %v788_v63  ;;  %v3269_v63 = vld [vmem:[#allocation7_spill] sm:$0xff] }
 0x226   :  { %v790_v0 = vsub.f32 1.5, %v789_v16 }
 0x228   :  { %v791_v51 = vmul.f32 %v1488_v23, %v790_v0 }
 0x22a   :  { %v2214_v59 = vsel %vm794_vm3, %v1488_v23, %v791_v51 }
 0x22b   :  { %v859_v55 = vmul.f32 %v2214_v59, %v1835_v22  ;;  %v2225_v35 = vmul.f32 %v2214_v59, %v1839_v28  ;;  %v2229_v16 = vmul.f32 %v2214_v59, %v1843_v29  ;;  %v2233_v37 = vmul.f32 %v2214_v59, %v1847_v20  ;;  %v2239_v22 = vld [vmem:[%s3168_s3] ss:$0 sm:$0xff] }
 0x22c   :  { %3263 = vst [vmem:[#allocation22_spill] sm:$0xff] %v2239_v22  ;;  %v2243_v0 = vmul.f32 %v2214_v59, %v1855_v43  ;;  %v2247_v28 = vmul.f32 %v2214_v59, %v1859_v36  ;;  %v2251_v29 = vmul.f32 %v2214_v59, %v1865_v42  ;;  %v2255_v20 = vmul.f32 %v2214_v59, %v1871_v45 }
 0x22d   :  { %v927_v23 = vmul.f32 %v2221_v18, %v859_v55  ;;  %v2259_v12 = vmul.f32 %v2214_v59, %v1877_v31  ;;  %v2263_v43 = vmul.f32 %v2214_v59, %v1883_v48  ;;  %v2267_v36 = vmul.f32 %v2214_v59, %v1889_v9  ;;  %v3270_v55 = vld [vmem:[#allocation20_spill] sm:$0xff] }
 0x22e   :  { %v2271_v42 = vmul.f32 %v2214_v59, %v1895_v8  ;;  %v2275_v45 = vmul.f32 %v2214_v59, %v1901_v26  ;;  %v2279_v31 = vmul.f32 %v2214_v59, %v1907_v21  ;;  %v2283_v48 = vmul.f32 %v2214_v59, %v1913_v3 }
 0x22f   :  { %v2287_v9 = vmul.f32 %v2214_v59, %v1919_v38  ;;  %v2291_v8 = vmul.f32 %v2214_v59, %v1925_v49  ;;  %v2295_v26 = vmul.f32 %v2214_v59, %v1931_v19  ;;  %v2299_v21 = vmul.f32 %v2214_v59, %v1937_v40 }
 0x230   :  { %v2302_v30 = vadd.f32 %v2239_v22, %v927_v23  ;;  %v2306_v3 = vmul.f32 %v2214_v59, %v1943_v33  ;;  %v2310_v38 = vmul.f32 %v2214_v59, %v1949_v46  ;;  %v2314_v49 = vmul.f32 %v2214_v59, %v1955_v50  ;;  %v3271_v23 = vld [vmem:[#allocation8_spill] sm:$0xff]  ;;  %v3282_v22 = vld [vmem:[#allocation11_spill] sm:$0xff] }
 0x231   :  { %v2318_v19 = vmul.f32 %v2214_v59, %v1961_v53  ;;  %v2322_v40 = vmul.f32 %v2214_v59, %v1967_v56  ;;  %v2326_v33 = vmul.f32 %v2214_v59, %v1973_v58  ;;  %v2330_v46 = vmul.f32 %v2214_v59, %v1979_v61 }
 0x232   :  { %3264 = vst [vmem:[#allocation23_spill] sm:$0xff] %v2302_v30  ;;  %v2334_v50 = vmul.f32 %v2214_v59, %v1985_v1  ;;  %v2338_v53 = vmul.f32 %v2214_v59, %v1991_v5  ;;  %v2342_v56 = vmul.f32 %v2214_v59, %v1997_v10  ;;  %v2346_v58 = vmul.f32 %v2214_v59, %v2003_v17  ;;  %v3278_v30 = vld [vmem:[#allocation10_spill] sm:$0xff] }
 0x233   :  { %v2350_v61 = vmul.f32 %v2214_v59, %v2009_v24  ;;  %v2354_v1 = vmul.f32 %v2214_v59, %v2015_v57  ;;  %v2358_v5 = vmul.f32 %v2214_v59, %v2021_v62  ;;  %v2362_v10 = vmul.f32 %v2214_v59, %v2027_v44 }
 0x234   :  { %v2366_v17 = vmul.f32 %v2214_v59, %v3265_v4  ;;  %v2370_v24 = vmul.f32 %v2214_v59, %v3266_v11  ;;  %v2374_v57 = vmul.f32 %v2214_v59, %v2045_v39  ;;  %v2378_v62 = vmul.f32 %v2214_v59, %v2051_v2  ;;  %v3272_v11 = vld [vmem:[#allocation12_spill] sm:$0xff] }
 0x235   :  { %v2382_v44 = vmul.f32 %v2214_v59, %v3267_v6  ;;  %v2386_v60 = vmul.f32 %v2214_v59, %v3268_v13  ;;  %v2390_v14 = vmul.f32 %v2214_v59, %v2069_v54  ;;  %v2394_v39 = vmul.f32 %v2214_v59, %v2075_v47  ;;  %v3273_v6 = vld [vmem:[#allocation15_spill] sm:$0xff]  ;;  %v3274_v13 = vld [vmem:[#allocation5_spill] sm:$0xff] }
 0x236   :  { %v2398_v2 = vmul.f32 %v2214_v59, %v2081_v25  ;;  %v2402_v27 = vmul.f32 %v2214_v59, %v2087_v15  ;;  %v2406_v51 = vmul.f32 %v2214_v59, %v3269_v63  ;;  %v2410_v54 = vmul.f32 %v2214_v59, %v2099_v41  ;;  %v3276_v63 = vld [vmem:[#allocation9_spill] sm:$0xff] }
 0x237   :  { %v2414_v47 = vmul.f32 %v2214_v59, %v2105_v34  ;;  %v2418_v25 = vmul.f32 %v2214_v59, %v2111_v32  ;;  %v2422_v15 = vmul.f32 %v2214_v59, %v3270_v55  ;;  %v2426_v4 = vmul.f32 %v2214_v59, %v3271_v23 }
 0x238   :  { %v2430_v41 = vmul.f32 %v2214_v59, %v3272_v11  ;;  %v2434_v34 = vmul.f32 %v2214_v59, %v3273_v6  ;;  %v2438_v32 = vmul.f32 %v2214_v59, %v3274_v13  ;;  %v2442_v55 = vmul.f32 %v2214_v59, %v3276_v63 }
 0x239   :  { %v2446_v23 = vmul.f32 %v2214_v59, %v3278_v30  ;;  %v2450_v11 = vmul.f32 %v2214_v59, %v2155_v52  ;;  %v2454_v6 = vmul.f32 %v2214_v59, %v2161_v7  ;;  %v2458_v13 = vmul.f32 %v2214_v59, %v3282_v22 }
 0x23a   :  { %3275 = vst [vmem:[#allocation14_spill] sm:$0xff] %v2438_v32  ;;  %v3284_v32 = vld [vmem:[#allocation13_spill] sm:$0xff] }
 0x23b   :  { %3277 = vst [vmem:[#allocation3_spill] sm:$0xff] %v2442_v55  ;;  %v2462_v63 = vmul.f32 %v2214_v59, %v3284_v32  ;;  %v3285_v55 = vld [vmem:[#allocation16_spill] sm:$0xff] }
 0x23c   :  { %3279 = vst [vmem:[#allocation4_spill] sm:$0xff] %v2446_v23  ;;  %v2466_v30 = vmul.f32 %v2214_v59, %v3285_v55  ;;  %v3287_v23 = vld [vmem:[#allocation17_spill] sm:$0xff]  ;;  %v864_v55 = vmul.f32 %v2221_v18, %v2225_v35  ;;  %v2502_v35 = vmul.f32 %v2221_v18, %v2255_v20  ;;  %v2526_v20 = vmul.f32 %v2221_v18, %v2279_v31 }
 0x23d   :  { %3280 = vst [vmem:[#allocation6_spill] sm:$0xff] %v2450_v11  ;;  %v2470_v52 = vmul.f32 %v2214_v59, %v3287_v23  ;;  %v3288_v11 = vld [vmem:[#allocation18_spill] sm:$0xff]  ;;  %v866_v23 = vmul.f32 %v2221_v18, %v2233_v37  ;;  %v2510_v37 = vmul.f32 %v2221_v18, %v2263_v43  ;;  %v2534_v43 = vmul.f32 %v2221_v18, %v2287_v9 }
 0x23e   :  { %3281 = vst [vmem:[#allocation7_spill] sm:$0xff] %v2454_v6  ;;  %v2474_v7 = vmul.f32 %v2214_v59, %v3288_v11  ;;  %v3289_v6 = vld [vmem:[#allocation19_spill] sm:$0xff]  ;;  %v867_v11 = vmul.f32 %v2221_v18, %v2243_v0  ;;  %v2514_v0 = vmul.f32 %v2221_v18, %v2267_v36  ;;  %v2538_v36 = vmul.f32 %v2221_v18, %v2291_v8 }
 0x23f   :  { %3283 = vst [vmem:[#allocation20_spill] sm:$0xff] %v2458_v13  ;;  %v2478_v22 = vmul.f32 %v2214_v59, %v3289_v6  ;;  %v3290_v13 = vld [vmem:[#allocation21_spill] sm:$0xff]  ;;  %v2494_v6 = vmul.f32 %v2221_v18, %v2247_v28  ;;  %v2518_v28 = vmul.f32 %v2221_v18, %v2271_v42  ;;  %v2542_v42 = vmul.f32 %v2221_v18, %v2295_v26 }
 0x240   :  { %3286 = vst [vmem:[#allocation8_spill] sm:$0xff] %v2466_v30  ;;  %v2482_v32 = vmul.f32 %v2214_v59, %v3290_v13  ;;  %v865_v30 = vmul.f32 %v2221_v18, %v2229_v16  ;;  %v2498_v59 = vmul.f32 %v2221_v18, %v2251_v29  ;;  %v2506_v16 = vmul.f32 %v2221_v18, %v2259_v12 }
 0x241   :  { %v2522_v29 = vmul.f32 %v2221_v18, %v2275_v45  ;;  %v2530_v12 = vmul.f32 %v2221_v18, %v2283_v48  ;;  %v2546_v45 = vmul.f32 %v2221_v18, %v2299_v21  ;;  %v2550_v31 = vmul.f32 %v2221_v18, %v2306_v3 }
 0x242   :  { %v2554_v48 = vmul.f32 %v2221_v18, %v2310_v38  ;;  %v2558_v9 = vmul.f32 %v2221_v18, %v2314_v49  ;;  %v2562_v8 = vmul.f32 %v2221_v18, %v2318_v19  ;;  %v2566_v26 = vmul.f32 %v2221_v18, %v2322_v40  ;;  %v3298_v13 = vld [vmem:[#allocation3_spill] sm:$0xff] }
 0x243   :  { %v2570_v21 = vmul.f32 %v2221_v18, %v2326_v33  ;;  %v2574_v3 = vmul.f32 %v2221_v18, %v2330_v46  ;;  %v2578_v38 = vmul.f32 %v2221_v18, %v2334_v50  ;;  %v2582_v49 = vmul.f32 %v2221_v18, %v2338_v53 }
 0x244   :  { %v2586_v19 = vmul.f32 %v2221_v18, %v2342_v56  ;;  %v2590_v40 = vmul.f32 %v2221_v18, %v2346_v58  ;;  %v2594_v33 = vmul.f32 %v2221_v18, %v2350_v61  ;;  %v2598_v46 = vmul.f32 %v2221_v18, %v2354_v1 }
 0x245   :  { %v2602_v50 = vmul.f32 %v2221_v18, %v2358_v5  ;;  %v2606_v53 = vmul.f32 %v2221_v18, %v2362_v10  ;;  %v2610_v56 = vmul.f32 %v2221_v18, %v2366_v17  ;;  %v2614_v58 = vmul.f32 %v2221_v18, %v2370_v24 }
 0x246   :  { %v2618_v61 = vmul.f32 %v2221_v18, %v2374_v57  ;;  %v2622_v1 = vmul.f32 %v2221_v18, %v2378_v62  ;;  %v2626_v5 = vmul.f32 %v2221_v18, %v2382_v44  ;;  %v2630_v10 = vmul.f32 %v2221_v18, %v2386_v60 }
 0x247   :  { %v2634_v17 = vmul.f32 %v2221_v18, %v2390_v14  ;;  %v2638_v24 = vmul.f32 %v2221_v18, %v2394_v39  ;;  %v2642_v57 = vmul.f32 %v2221_v18, %v2398_v2  ;;  %v2646_v62 = vmul.f32 %v2221_v18, %v2402_v27 }
 0x248   :  { %v2650_v44 = vmul.f32 %v2221_v18, %v2406_v51  ;;  %v2654_v60 = vmul.f32 %v2221_v18, %v2410_v54  ;;  %v2658_v14 = vmul.f32 %v2221_v18, %v2414_v47  ;;  %v2662_v39 = vmul.f32 %v2221_v18, %v2418_v25  ;;  %v3296_v47 = vld [vmem:[#allocation14_spill] sm:$0xff] }
 0x249   :  { %v2666_v2 = vmul.f32 %v2221_v18, %v2422_v15  ;;  %v2670_v27 = vmul.f32 %v2221_v18, %v2426_v4  ;;  %v2674_v51 = vmul.f32 %v2221_v18, %v2430_v41  ;;  %v2678_v54 = vmul.f32 %v2221_v18, %v2434_v34 }
 0x24a   :  { %3291 = vst [vmem:[#allocation12_spill] sm:$0xff] %v2662_v39  ;;  %v2682_v25 = vmul.f32 %v2221_v18, %v3296_v47  ;;  %v2686_v15 = vmul.f32 %v2221_v18, %v3298_v13  ;;  %v3306_v13 = vld [vmem:[#allocation20_spill] sm:$0xff] }
 0x24b   :  { %3292 = vst [vmem:[#allocation15_spill] sm:$0xff] %v2666_v2  ;;  %v3300_v2 = vld [vmem:[#allocation4_spill] sm:$0xff] }
 0x24c   :  { %3293 = vst [vmem:[#allocation5_spill] sm:$0xff] %v2670_v27  ;;  %v2690_v4 = vmul.f32 %v2221_v18, %v3300_v2  ;;  %v3301_v27 = vld [vmem:[#allocation6_spill] sm:$0xff]  ;;  %v2709_v2 = vmul.f32 %v2221_v18, %v2462_v63 }
 0x24d   :  { %3294 = vst [vmem:[#allocation9_spill] sm:$0xff] %v2674_v51  ;;  %v2694_v41 = vmul.f32 %v2221_v18, %v3301_v27  ;;  %v3303_v51 = vld [vmem:[#allocation7_spill] sm:$0xff] }
 0x24e   :  { %3295 = vst [vmem:[#allocation10_spill] sm:$0xff] %v2678_v54  ;;  %v2698_v34 = vmul.f32 %v2221_v18, %v3303_v51  ;;  %v3305_v54 = vld [vmem:[#allocation22_spill] sm:$0xff]  ;;  %v2715_v51 = vstv %s3169_s4 }
 0x24f   :  { %3297 = vst [vmem:[#allocation11_spill] sm:$0xff] %v2682_v25  ;;  %v932_v39 = vadd.f32 %v3305_v54, %v864_v55  ;;  %v933_v47 = vadd.f32 %v3305_v54, %v865_v30  ;;  %v934_v25 = vadd.f32 %v3305_v54, %v866_v23  ;;  %v935_v27 = vadd.f32 %v3305_v54, %v867_v11  ;;  %v3309_v55 = vld [vmem:[#allocation8_spill] sm:$0xff] }
 0x250   :  { %3299 = vst [vmem:[#allocation13_spill] sm:$0xff] %v2686_v15  ;;  %v2705_v15 = vmul.f32 %v2221_v18, %v3306_v13  ;;  %v2719_v30 = vmul.f32 %v2221_v18, %v3309_v55  ;;  %v2723_v23 = vmul.f32 %v2221_v18, %v2470_v52  ;;  %v2727_v13 = vmul.f32 %v2221_v18, %v2474_v7 }
 0x251   :  { %3302 = vst [vmem:[#allocation16_spill] sm:$0xff] %v2694_v41  ;;  %v936_v63 = vadd.f32 %v3305_v54, %v2494_v6  ;;  %v2733_v11 = vmul.f32 %v2221_v18, %v2478_v22  ;;  %v937_v55 = vadd.f32 %v3305_v54, %v2498_v59  ;;  %v938_v52 = vadd.f32 %v3305_v54, %v2502_v35 }
 0x252   :  { %3304 = vst [vmem:[#allocation17_spill] sm:$0xff] %v2698_v34  ;;  %v939_v7 = vadd.f32 %v3305_v54, %v2506_v16  ;;  %v1063_v6 = vmul.f32 %v2715_v51, %v933_v47  ;;  %v1064_v22 = vmul.f32 %v2715_v51, %v934_v25  ;;  %vm997_vm4 = vcmp.gt.f32.partialorder %v932_v39, 0.0 }
 0x253   :  { %3307 = vst [vmem:[#allocation18_spill] sm:$0xff] %v2705_v15  ;;  %vm998_vm5 = vcmp.gt.f32.partialorder %v933_v47, 0.0  ;;  %vm999_vm6 = vcmp.gt.f32.partialorder %v934_v25, 0.0  ;;  %v941_v59 = vadd.f32 %v3305_v54, %v2514_v0  ;;  %vm1000_vm7 = vcmp.gt.f32.partialorder %v935_v27, 0.0 }
 0x254   :  { %3308 = vst [vmem:[#allocation19_spill] sm:$0xff] %v2709_v2  ;;  %v2737_v2 = vmul.f32 %v2221_v18, %v2482_v32  ;;  %v1065_v18 = vmul.f32 %v2715_v51, %v935_v27  ;;  %v940_v32 = vadd.f32 %v3305_v54, %v2510_v37  ;;  %v1066_v35 = vmul.f32 %v2715_v51, %v936_v63 }
 0x255   :  { %3310 = vst [vmem:[#allocation21_spill] sm:$0xff] %v2719_v30  ;;  %v942_v16 = vadd.f32 %v3305_v54, %v2518_v28  ;;  %vm1001_vm8 = vcmp.gt.f32.partialorder %v936_v63, 0.0  ;;  %vm1002_vm9 = vcmp.gt.f32.partialorder %v937_v55, 0.0  ;;  %v1127_v30 = vsel %vm998_vm5, %v933_v47, %v1063_v6 }
 0x256   :  { %3311 = vst [vmem:[#allocation14_spill] sm:$0xff] %v2723_v23  ;;  %v1128_v15 = vsel %vm999_vm6, %v934_v25, %v1064_v22  ;;  %v943_v37 = vadd.f32 %v3305_v54, %v2522_v29  ;;  %vm1003_vm10 = vcmp.gt.f32.partialorder %v938_v52, 0.0  ;;  %v1069_v0 = vmul.f32 %v2715_v51, %v939_v7 }
 0x257   :  { %3312 = vst [vmem:[#allocation3_spill] sm:$0xff] %v2727_v13  ;;  %v1062_v13 = vmul.f32 %v2715_v51, %v932_v39  ;;  %v1129_v34 = vsel %vm1000_vm7, %v935_v27, %v1065_v18  ;;  %v944_v28 = vadd.f32 %v3305_v54, %v2526_v20  ;;  %vm1004_vm11 = vcmp.gt.f32.partialorder %v939_v7, 0.0 }
 0x258   :  { %3313 = vst [vmem:[#allocation4_spill] sm:$0xff] %v2733_v11  ;;  %v1068_v11 = vmul.f32 %v2715_v51, %v938_v52  ;;  %v1070_v41 = vmul.f32 %v2715_v51, %v940_v32  ;;  %v945_v29 = vadd.f32 %v3305_v54, %v2530_v12  ;;  %vm1005_vm12 = vcmp.gt.f32.partialorder %v940_v32, 0.0 }
 0x259   :  { %3314 = vst [vmem:[#allocation6_spill] sm:$0xff] %v2737_v2  ;;  %v1067_v2 = vmul.f32 %v2715_v51, %v937_v55  ;;  %v1126_v23 = vsel %vm997_vm4, %v932_v39, %v1062_v13  ;;  %v1130_v39 = vsel %vm1001_vm8, %v936_v63, %v1066_v35  ;;  %v1071_v25 = vmul.f32 %v2715_v51, %v941_v59 }
 0x25a   :  { %1190 = vst [vmem:[%s3170_s5] sm:$0xff] %v1126_v23  ;;  %v946_v20 = vadd.f32 %v3305_v54, %v2534_v43  ;;  %vm1006_vm13 = vcmp.gt.f32.partialorder %v941_v59, 0.0  ;;  %v1072_v27 = vmul.f32 %v2715_v51, %v942_v16  ;;  %v947_v12 = vadd.f32 %v3305_v54, %v2538_v36 }
 0x25b   :  { %1191 = vst [vmem:[%s3170_s5 + $0x8] sm:$0xff] %v1127_v30  ;;  %v1131_v47 = vsel %vm1002_vm9, %v937_v55, %v1067_v2  ;;  %v1132_v30 = vsel %vm1003_vm10, %v938_v52, %v1068_v11  ;;  %vm1007_vm14 = vcmp.gt.f32.partialorder %v942_v16, 0.0  ;;  %v1073_v2 = vmul.f32 %v2715_v51, %v943_v37 }
 0x25c   :  { %1192 = vst [vmem:[%s3170_s5 + $0x10] sm:$0xff] %v1128_v15  ;;  %v1133_v15 = vsel %vm1004_vm11, %v939_v7, %v1069_v0  ;;  %v948_v43 = vadd.f32 %v3305_v54, %v2542_v42  ;;  %vm1008_vm15 = vcmp.gt.f32.partialorder %v943_v37, 0.0  ;;  %v1074_v23 = vmul.f32 %v2715_v51, %v944_v28 }
 0x25d   :  { %1193 = vst [vmem:[%s3170_s5 + $0x18] sm:$0xff] %v1129_v34  ;;  %v1134_v34 = vsel %vm1005_vm12, %v940_v32, %v1070_v41  ;;  %v949_v36 = vadd.f32 %v3305_v54, %v2546_v45  ;;  %vm1009_vm0 = vcmp.gt.f32.partialorder %v944_v28, 0.0  ;;  %v1075_v13 = vmul.f32 %v2715_v51, %v945_v29 }
 0x25e   :  { %1194 = vst [vmem:[%s3170_s5 + $0x20] sm:$0xff] %v1130_v39  ;;  %v1135_v63 = vsel %vm1006_vm13, %v941_v59, %v1071_v25  ;;  %v950_v42 = vadd.f32 %v3305_v54, %v2550_v31  ;;  %vm1010_vm1 = vcmp.gt.f32.partialorder %v945_v29, 0.0  ;;  %v1076_v41 = vmul.f32 %v2715_v51, %v946_v20 }
 0x25f   :  { %1195 = vst [vmem:[%s3170_s5 + $0x28] sm:$0xff] %v1131_v47  ;;  %v1136_v11 = vsel %vm1007_vm14, %v942_v16, %v1072_v27  ;;  %v951_v45 = vadd.f32 %v3305_v54, %v2554_v48  ;;  %vm1011_vm2 = vcmp.gt.f32.partialorder %v946_v20, 0.0  ;;  %v1077_v55 = vmul.f32 %v2715_v51, %v947_v12 }
 0x260   :  { %1196 = vst [vmem:[%s3170_s5 + $0x30] sm:$0xff] %v1132_v30  ;;  %v1137_v52 = vsel %vm1008_vm15, %v943_v37, %v1073_v2  ;;  %v952_v31 = vadd.f32 %v3305_v54, %v2558_v9  ;;  %vm1012_vm3 = vcmp.gt.f32.partialorder %v947_v12, 0.0  ;;  %v1078_v7 = vmul.f32 %v2715_v51, %v948_v43 }
 0x261   :  { %1197 = vst [vmem:[%s3170_s5 + $0x38] sm:$0xff] %v1133_v15  ;;  %v1138_v6 = vsel %vm1009_vm0, %v944_v28, %v1074_v23  ;;  %v953_v48 = vadd.f32 %v3305_v54, %v2562_v8  ;;  %vm1013_vm4 = vcmp.gt.f32.partialorder %v948_v43, 0.0  ;;  %v1079_v22 = vmul.f32 %v2715_v51, %v949_v36 }
 0x262   :  { %1198 = vst [vmem:[%s3170_s5 + $0x40] sm:$0xff] %v1134_v34  ;;  %v1139_v18 = vsel %vm1010_vm1, %v945_v29, %v1075_v13  ;;  %v954_v9 = vadd.f32 %v3305_v54, %v2566_v26  ;;  %vm1014_vm5 = vcmp.gt.f32.partialorder %v949_v36, 0.0  ;;  %v1080_v32 = vmul.f32 %v2715_v51, %v950_v42 }
 0x263   :  { %1199 = vst [vmem:[%s3170_s5 + $0x48] sm:$0xff] %v1135_v63  ;;  %v1140_v59 = vsel %vm1011_vm2, %v946_v20, %v1076_v41  ;;  %v955_v8 = vadd.f32 %v3305_v54, %v2570_v21  ;;  %vm1015_vm6 = vcmp.gt.f32.partialorder %v950_v42, 0.0  ;;  %v1081_v35 = vmul.f32 %v2715_v51, %v951_v45 }
 0x264   :  { %1200 = vst [vmem:[%s3170_s5 + $0x50] sm:$0xff] %v1136_v11  ;;  %v1141_v16 = vsel %vm1012_vm3, %v947_v12, %v1077_v55  ;;  %v956_v26 = vadd.f32 %v3305_v54, %v2574_v3  ;;  %vm1016_vm7 = vcmp.gt.f32.partialorder %v951_v45, 0.0  ;;  %v1082_v37 = vmul.f32 %v2715_v51, %v952_v31 }
 0x265   :  { %1201 = vst [vmem:[%s3170_s5 + $0x58] sm:$0xff] %v1137_v52  ;;  %v1142_v0 = vsel %vm1013_vm4, %v948_v43, %v1078_v7  ;;  %v957_v21 = vadd.f32 %v3305_v54, %v2578_v38  ;;  %vm1017_vm8 = vcmp.gt.f32.partialorder %v952_v31, 0.0  ;;  %v1083_v28 = vmul.f32 %v2715_v51, %v953_v48 }
 0x266   :  { %1202 = vst [vmem:[%s3170_s5 + $0x60] sm:$0xff] %v1138_v6  ;;  %v1143_v39 = vsel %vm1014_vm5, %v949_v36, %v1079_v22  ;;  %v958_v3 = vadd.f32 %v3305_v54, %v2582_v49  ;;  %vm1018_vm9 = vcmp.gt.f32.partialorder %v953_v48, 0.0  ;;  %v1084_v29 = vmul.f32 %v2715_v51, %v954_v9 }
 0x267   :  { %1203 = vst [vmem:[%s3170_s5 + $0x68] sm:$0xff] %v1139_v18  ;;  %v1144_v25 = vsel %vm1015_vm6, %v950_v42, %v1080_v32  ;;  %v959_v38 = vadd.f32 %v3305_v54, %v2586_v19  ;;  %vm1019_vm10 = vcmp.gt.f32.partialorder %v954_v9, 0.0  ;;  %v1085_v47 = vmul.f32 %v2715_v51, %v955_v8 }
 0x268   :  { %1204 = vst [vmem:[%s3170_s5 + $0x70] sm:$0xff] %v1140_v59  ;;  %v1145_v20 = vsel %vm1016_vm7, %v951_v45, %v1081_v35  ;;  %v960_v49 = vadd.f32 %v3305_v54, %v2590_v40  ;;  %vm1020_vm11 = vcmp.gt.f32.partialorder %v955_v8, 0.0  ;;  %v1086_v27 = vmul.f32 %v2715_v51, %v956_v26 }
 0x269   :  { %1205 = vst [vmem:[%s3170_s5 + $0x78] sm:$0xff] %v1141_v16  ;;  %v1146_v30 = vsel %vm1017_vm8, %v952_v31, %v1082_v37  ;;  %v961_v19 = vadd.f32 %v3305_v54, %v2594_v33  ;;  %vm1021_vm12 = vcmp.gt.f32.partialorder %v956_v26, 0.0  ;;  %v1087_v12 = vmul.f32 %v2715_v51, %v957_v21 }
 0x26a   :  { %1206 = vst [vmem:[%s3170_s5 + $0x80] sm:$0xff] %v1142_v0  ;;  %v1147_v2 = vsel %vm1018_vm9, %v953_v48, %v1083_v28  ;;  %v962_v40 = vadd.f32 %v3305_v54, %v2598_v46  ;;  %vm1022_vm13 = vcmp.gt.f32.partialorder %v957_v21, 0.0  ;;  %v1088_v15 = vmul.f32 %v2715_v51, %v958_v3 }
 0x26b   :  { %1207 = vst [vmem:[%s3170_s5 + $0x88] sm:$0xff] %v1143_v39  ;;  %v1148_v43 = vsel %vm1019_vm10, %v954_v9, %v1084_v29  ;;  %v963_v33 = vadd.f32 %v3305_v54, %v2602_v50  ;;  %vm1023_vm14 = vcmp.gt.f32.partialorder %v958_v3, 0.0  ;;  %v1089_v23 = vmul.f32 %v2715_v51, %v959_v38 }
 0x26c   :  { %1208 = vst [vmem:[%s3170_s5 + $0x90] sm:$0xff] %v1144_v25  ;;  %v1149_v34 = vsel %vm1020_vm11, %v955_v8, %v1085_v47  ;;  %v964_v46 = vadd.f32 %v3305_v54, %v2606_v53  ;;  %vm1024_vm15 = vcmp.gt.f32.partialorder %v959_v38, 0.0  ;;  %v1090_v36 = vmul.f32 %v2715_v51, %v960_v49 }
 0x26d   :  { %1209 = vst [vmem:[%s3170_s5 + $0x98] sm:$0xff] %v1145_v20  ;;  %v1150_v13 = vsel %vm1021_vm12, %v956_v26, %v1086_v27  ;;  %v965_v50 = vadd.f32 %v3305_v54, %v2610_v56  ;;  %vm1025_vm0 = vcmp.gt.f32.partialorder %v960_v49, 0.0  ;;  %v1091_v63 = vmul.f32 %v2715_v51, %v961_v19  ;;  %v3317_v27 = vld [vmem:[#allocation5_spill] sm:$0xff] }
 0x26e   :  { %1210 = vst [vmem:[%s3170_s5 + $0xa0] sm:$0xff] %v1146_v30  ;;  %v1151_v42 = vsel %vm1022_vm13, %v957_v21, %v1087_v12  ;;  %v966_v53 = vadd.f32 %v3305_v54, %v2614_v58  ;;  %vm1026_vm1 = vcmp.gt.f32.partialorder %v961_v19, 0.0  ;;  %v1092_v41 = vmul.f32 %v2715_v51, %v962_v40 }
 0x26f   :  { %1211 = vst [vmem:[%s3170_s5 + $0xa8] sm:$0xff] %v1147_v2  ;;  %v1152_v11 = vsel %vm1023_vm14, %v958_v3, %v1088_v15  ;;  %v967_v56 = vadd.f32 %v3305_v54, %v2618_v61  ;;  %vm1027_vm2 = vcmp.gt.f32.partialorder %v962_v40, 0.0  ;;  %v1093_v45 = vmul.f32 %v2715_v51, %v963_v33  ;;  %v3318_v2 = vld [vmem:[#allocation9_spill] sm:$0xff] }
 0x270   :  { %1212 = vst [vmem:[%s3170_s5 + $0xb0] sm:$0xff] %v1148_v43  ;;  %v1153_v55 = vsel %vm1024_vm15, %v959_v38, %v1089_v23  ;;  %v968_v58 = vadd.f32 %v3305_v54, %v2622_v1  ;;  %vm1028_vm3 = vcmp.gt.f32.partialorder %v963_v33, 0.0  ;;  %v1094_v52 = vmul.f32 %v2715_v51, %v964_v46 }
 0x271   :  { %1213 = vst [vmem:[%s3170_s5 + $0xb8] sm:$0xff] %v1149_v34  ;;  %v1154_v31 = vsel %vm1025_vm0, %v960_v49, %v1090_v36  ;;  %v969_v61 = vadd.f32 %v3305_v54, %v2626_v5  ;;  %vm1029_vm4 = vcmp.gt.f32.partialorder %v964_v46, 0.0  ;;  %v1095_v7 = vmul.f32 %v2715_v51, %v965_v50  ;;  %v3320_v36 = vld [vmem:[#allocation11_spill] sm:$0xff] }
 0x272   :  { %1214 = vst [vmem:[%s3170_s5 + $0xc0] sm:$0xff] %v1150_v13  ;;  %v1155_v6 = vsel %vm1026_vm1, %v961_v19, %v1091_v63  ;;  %v970_v1 = vadd.f32 %v3305_v54, %v2630_v10  ;;  %vm1030_vm5 = vcmp.gt.f32.partialorder %v965_v50, 0.0  ;;  %v1096_v48 = vmul.f32 %v2715_v51, %v966_v53 }
 0x273   :  { %1215 = vst [vmem:[%s3170_s5 + $0xc8] sm:$0xff] %v1151_v42  ;;  %v1156_v22 = vsel %vm1027_vm2, %v962_v40, %v1092_v41  ;;  %v971_v5 = vadd.f32 %v3305_v54, %v2634_v17  ;;  %vm1031_vm6 = vcmp.gt.f32.partialorder %v966_v53, 0.0  ;;  %v1097_v18 = vmul.f32 %v2715_v51, %v967_v56  ;;  %v3321_v42 = vld [vmem:[#allocation13_spill] sm:$0xff] }
 0x274   :  { %1216 = vst [vmem:[%s3170_s5 + $0xd0] sm:$0xff] %v1152_v11  ;;  %v1157_v9 = vsel %vm1028_vm3, %v963_v33, %v1093_v45  ;;  %v972_v10 = vadd.f32 %v3305_v54, %v2638_v24  ;;  %vm1032_vm7 = vcmp.gt.f32.partialorder %v967_v56, 0.0  ;;  %v1098_v32 = vmul.f32 %v2715_v51, %v968_v58  ;;  %v3319_v33 = vld [vmem:[#allocation10_spill] sm:$0xff] }
 0x275   :  { %1217 = vst [vmem:[%s3170_s5 + $0xd8] sm:$0xff] %v1153_v55  ;;  %v1158_v59 = vsel %vm1029_vm4, %v964_v46, %v1094_v52  ;;  %v973_v17 = vadd.f32 %v3305_v54, %v2642_v57  ;;  %vm1033_vm8 = vcmp.gt.f32.partialorder %v968_v58, 0.0  ;;  %v1099_v8 = vmul.f32 %v2715_v51, %v969_v61 }
 0x276   :  { %1218 = vst [vmem:[%s3170_s5 + $0xe0] sm:$0xff] %v1154_v31  ;;  %v1159_v35 = vsel %vm1030_vm5, %v965_v50, %v1095_v7  ;;  %v974_v24 = vadd.f32 %v3305_v54, %v2646_v62  ;;  %vm1034_vm9 = vcmp.gt.f32.partialorder %v969_v61, 0.0  ;;  %v1100_v16 = vmul.f32 %v2715_v51, %v970_v1 }
 0x277   :  { %1219 = vst [vmem:[%s3170_s5 + $0xe8] sm:$0xff] %v1155_v6  ;;  %v1160_v26 = vsel %vm1031_vm6, %v966_v53, %v1096_v48  ;;  %v975_v57 = vadd.f32 %v3305_v54, %v2650_v44  ;;  %vm1035_vm10 = vcmp.gt.f32.partialorder %v970_v1, 0.0  ;;  %v1101_v37 = vmul.f32 %v2715_v51, %v971_v5  ;;  %v3324_v48 = vld [vmem:[#allocation18_spill] sm:$0xff] }
 0x278   :  { %1220 = vst [vmem:[%s3170_s5 + $0xf0] sm:$0xff] %v1156_v22  ;;  %v1161_v0 = vsel %vm1032_vm7, %v967_v56, %v1097_v18  ;;  %v976_v62 = vadd.f32 %v3305_v54, %v2654_v60  ;;  %vm1036_vm11 = vcmp.gt.f32.partialorder %v971_v5, 0.0  ;;  %v1102_v21 = vmul.f32 %v2715_v51, %v972_v10  ;;  %v3315_v60 = vld [vmem:[#allocation12_spill] sm:$0xff] }
 0x279   :  { %1221 = vst [vmem:[%s3170_s5 + $0xf8] sm:$0xff] %v1157_v9  ;;  %v1162_v28 = vsel %vm1033_vm8, %v968_v58, %v1098_v32  ;;  %v977_v44 = vadd.f32 %v3305_v54, %v2658_v14  ;;  %vm1037_vm12 = vcmp.gt.f32.partialorder %v972_v10, 0.0  ;;  %v1103_v39 = vmul.f32 %v2715_v51, %v973_v17  ;;  %v3316_v14 = vld [vmem:[#allocation15_spill] sm:$0xff]  ;;  %v3322_v58 = vld [vmem:[#allocation16_spill] sm:$0xff] }
 0x27a   :  { %1222 = vst [vmem:[%s3170_s5 + $0x100] sm:$0xff] %v1158_v59  ;;  %v1163_v3 = vsel %vm1034_vm9, %v969_v61, %v1099_v8  ;;  %v978_v29 = vadd.f32 %v3305_v54, %v3315_v60  ;;  %vm1038_vm13 = vcmp.gt.f32.partialorder %v973_v17, 0.0  ;;  %v1104_v25 = vmul.f32 %v2715_v51, %v974_v24  ;;  %v3325_v9 = vld [vmem:[#allocation19_spill] sm:$0xff] }
 0x27b   :  { %1223 = vst [vmem:[%s3170_s5 + $0x108] sm:$0xff] %v1159_v35  ;;  %v1164_v38 = vsel %vm1035_vm10, %v970_v1, %v1100_v16  ;;  %v979_v47 = vadd.f32 %v3305_v54, %v3316_v14  ;;  %vm1039_vm14 = vcmp.gt.f32.partialorder %v974_v24, 0.0  ;;  %v1105_v20 = vmul.f32 %v2715_v51, %v975_v57  ;;  %v3327_v16 = vld [vmem:[#allocation14_spill] sm:$0xff] }
 0x27c   :  { %1224 = vst [vmem:[%s3170_s5 + $0x110] sm:$0xff] %v1160_v26  ;;  %v1165_v49 = vsel %vm1036_vm11, %v971_v5, %v1101_v37  ;;  %v980_v30 = vadd.f32 %v3305_v54, %v3317_v27  ;;  %vm1040_vm15 = vcmp.gt.f32.partialorder %v975_v57, 0.0  ;;  %v1106_v19 = vmul.f32 %v2715_v51, %v976_v62 }
 0x27d   :  { %1225 = vst [vmem:[%s3170_s5 + $0x118] sm:$0xff] %v1161_v0  ;;  %v1166_v12 = vsel %vm1037_vm12, %v972_v10, %v1102_v21  ;;  %v981_v40 = vadd.f32 %v3305_v54, %v3318_v2  ;;  %vm1041_vm0 = vcmp.gt.f32.partialorder %v976_v62, 0.0  ;;  %v1107_v15 = vmul.f32 %v2715_v51, %v977_v44  ;;  %v3328_v0 = vld [vmem:[#allocation3_spill] sm:$0xff] }
 0x27e   :  { %1226 = vst [vmem:[%s3170_s5 + $0x120] sm:$0xff] %v1162_v28  ;;  %v1167_v43 = vsel %vm1038_vm13, %v973_v17, %v1103_v39  ;;  %v982_v23 = vadd.f32 %v3305_v54, %v3319_v33  ;;  %vm1042_vm1 = vcmp.gt.f32.partialorder %v977_v44, 0.0  ;;  %v1108_v34 = vmul.f32 %v2715_v51, %v978_v29  ;;  %v3326_v17 = vld [vmem:[#allocation21_spill] sm:$0xff]  ;;  %v3331_v2 = vld [vmem:[#allocation23_spill] sm:$0xff] }
 0x27f   :  { %1227 = vst [vmem:[%s3170_s5 + $0x128] sm:$0xff] %v1163_v3  ;;  %v1168_v46 = vsel %vm1039_vm14, %v974_v24, %v1104_v25  ;;  %v983_v13 = vadd.f32 %v3305_v54, %v3320_v36  ;;  %vm1043_vm2 = vcmp.gt.f32.partialorder %v978_v29, 0.0  ;;  %v1109_v50 = vmul.f32 %v2715_v51, %v979_v47 }
 0x280   :  { %1228 = vst [vmem:[%s3170_s5 + $0x130] sm:$0xff] %v1164_v38  ;;  %v1169_v63 = vsel %vm1040_vm15, %v975_v57, %v1105_v20  ;;  %v984_v53 = vadd.f32 %v3305_v54, %v3321_v42  ;;  %vm1044_vm3 = vcmp.gt.f32.partialorder %v979_v47, 0.0  ;;  %v1110_v41 = vmul.f32 %v2715_v51, %v980_v30 }
 0x281   :  { %1229 = vst [vmem:[%s3170_s5 + $0x138] sm:$0xff] %v1165_v49  ;;  %v1170_v11 = vsel %vm1041_vm0, %v976_v62, %v1106_v19  ;;  %v985_v56 = vadd.f32 %v3305_v54, %v2690_v4  ;;  %vm1045_vm4 = vcmp.gt.f32.partialorder %v980_v30, 0.0  ;;  %v1111_v45 = vmul.f32 %v2715_v51, %v981_v40  ;;  %v3323_v4 = vld [vmem:[#allocation17_spill] sm:$0xff] }
 0x282   :  { %1230 = vst [vmem:[%s3170_s5 + $0x140] sm:$0xff] %v1166_v12  ;;  %v1171_v55 = vsel %vm1042_vm1, %v977_v44, %v1107_v15  ;;  %v986_v52 = vadd.f32 %v3305_v54, %v3322_v58  ;;  %vm1046_vm5 = vcmp.gt.f32.partialorder %v981_v40, 0.0  ;;  %v1112_v31 = vmul.f32 %v2715_v51, %v982_v23  ;;  %v3329_v44 = vld [vmem:[#allocation4_spill] sm:$0xff] }
 0x283   :  { %1231 = vst [vmem:[%s3170_s5 + $0x148] sm:$0xff] %v1167_v43  ;;  %v1172_v61 = vsel %vm1043_vm2, %v978_v29, %v1108_v34  ;;  %v987_v7 = vadd.f32 %v3305_v54, %v3323_v4  ;;  %vm1047_vm6 = vcmp.gt.f32.partialorder %v982_v23, 0.0  ;;  %v1113_v6 = vmul.f32 %v2715_v51, %v983_v13  ;;  %v3330_v29 = vld [vmem:[#allocation6_spill] sm:$0xff] }
 0x284   :  { %1232 = vst [vmem:[%s3170_s5 + $0x150] sm:$0xff] %v1168_v46  ;;  %v1173_v1 = vsel %vm1044_vm3, %v979_v47, %v1109_v50  ;;  %v988_v22 = vadd.f32 %v3305_v54, %v3324_v48  ;;  %vm1048_vm7 = vcmp.gt.f32.partialorder %v983_v13, 0.0  ;;  %v1114_v5 = vmul.f32 %v2715_v51, %v984_v53 }
 0x285   :  { %1233 = vst [vmem:[%s3170_s5 + $0x158] sm:$0xff] %v1169_v63  ;;  %v1174_v18 = vsel %vm1045_vm4, %v980_v30, %v1110_v41  ;;  %v989_v10 = vadd.f32 %v3305_v54, %v3325_v9  ;;  %vm1049_vm8 = vcmp.gt.f32.partialorder %v984_v53, 0.0  ;;  %v1115_v32 = vmul.f32 %v2715_v51, %v985_v56 }
 0x286   :  { %1234 = vst [vmem:[%s3170_s5 + $0x160] sm:$0xff] %v1170_v11  ;;  %v1175_v59 = vsel %vm1046_vm5, %v981_v40, %v1111_v45  ;;  %v990_v8 = vadd.f32 %v3305_v54, %v3326_v17  ;;  %vm1050_vm9 = vcmp.gt.f32.partialorder %v985_v56, 0.0  ;;  %v1116_v35 = vmul.f32 %v2715_v51, %v986_v52 }
 0x287   :  { %1235 = vst [vmem:[%s3170_s5 + $0x168] sm:$0xff] %v1171_v55  ;;  %v1176_v24 = vsel %vm1047_vm6, %v982_v23, %v1112_v31  ;;  %v991_v26 = vadd.f32 %v3305_v54, %v3327_v16  ;;  %vm1051_vm10 = vcmp.gt.f32.partialorder %v986_v52, 0.0  ;;  %v1117_v57 = vmul.f32 %v2715_v51, %v987_v7 }
 0x288   :  { %1236 = vst [vmem:[%s3170_s5 + $0x170] sm:$0xff] %v1172_v61  ;;  %v1177_v37 = vsel %vm1048_vm7, %v983_v13, %v1113_v6  ;;  %v992_v62 = vadd.f32 %v3305_v54, %v3328_v0  ;;  %vm1052_vm11 = vcmp.gt.f32.partialorder %v987_v7, 0.0  ;;  %v1118_v21 = vmul.f32 %v2715_v51, %v988_v22 }
 0x289   :  { %1237 = vst [vmem:[%s3170_s5 + $0x178] sm:$0xff] %v1173_v1  ;;  %v1178_v28 = vsel %vm1049_vm8, %v984_v53, %v1114_v5  ;;  %v993_v39 = vadd.f32 %v3305_v54, %v3329_v44  ;;  %vm1053_vm12 = vcmp.gt.f32.partialorder %v988_v22, 0.0  ;;  %v1119_v3 = vmul.f32 %v2715_v51, %v989_v10 }
 0x28a   :  { %1238 = vst [vmem:[%s3170_s5 + $0x180] sm:$0xff] %v1174_v18  ;;  %v1179_v60 = vsel %vm1050_vm9, %v985_v56, %v1115_v32  ;;  %v994_v25 = vadd.f32 %v3305_v54, %v3330_v29  ;;  %vm1054_vm13 = vcmp.gt.f32.partialorder %v989_v10, 0.0  ;;  %v1120_v38 = vmul.f32 %v2715_v51, %v990_v8 }
 0x28b   :  { %1239 = vst [vmem:[%s3170_s5 + $0x188] sm:$0xff] %v1175_v59  ;;  %v1180_v14 = vsel %vm1051_vm10, %v986_v52, %v1116_v35  ;;  %vm1055_vm14 = vcmp.gt.f32.partialorder %v990_v8, 0.0  ;;  %v1121_v47 = vmul.f32 %v2715_v51, %v991_v26  ;;  %v1181_v20 = vsel %vm1052_vm11, %v987_v7, %v1117_v57 }
 0x28c   :  { %1240 = vst [vmem:[%s3170_s5 + $0x190] sm:$0xff] %v1176_v24  ;;  %vm1056_vm15 = vcmp.gt.f32.partialorder %v991_v26, 0.0  ;;  %v1122_v54 = vmul.f32 %v2715_v51, %v992_v62  ;;  %v1182_v49 = vsel %vm1053_vm12, %v988_v22, %v1118_v21  ;;  %vm1057_vm0 = vcmp.gt.f32.partialorder %v992_v62, 0.0 }
 0x28d   :  { %1241 = vst [vmem:[%s3170_s5 + $0x198] sm:$0xff] %v1177_v37  ;;  %v1123_v27 = vmul.f32 %v2715_v51, %v993_v39  ;;  %v1183_v30 = vsel %vm1054_vm13, %v989_v10, %v1119_v3  ;;  %vm1058_vm1 = vcmp.gt.f32.partialorder %v993_v39, 0.0  ;;  %v1124_v19 = vmul.f32 %v2715_v51, %v994_v25 }
 0x28e   :  { %1242 = vst [vmem:[%s3170_s5 + $0x1a0] sm:$0xff] %v1178_v28  ;;  %v1184_v12 = vsel %vm1055_vm14, %v990_v8, %v1120_v38  ;;  %vm1059_vm2 = vcmp.gt.f32.partialorder %v994_v25, 0.0  ;;  %v1125_v40 = vmul.f32 %v2715_v51, %v3331_v2  ;;  %v1185_v15 = vsel %vm1056_vm15, %v991_v26, %v1121_v47 }
 0x28f   :  { %1243 = vst [vmem:[%s3170_s5 + $0x1a8] sm:$0xff] %v1179_v60  ;;  %vm1060_vm3 = vcmp.gt.f32.partialorder %v3331_v2, 0.0  ;;  %v1186_v43 = vsel %vm1057_vm0, %v992_v62, %v1122_v54  ;;  %v1187_v33 = vsel %vm1058_vm1, %v993_v39, %v1123_v27  ;;  %v1188_v23 = vsel %vm1059_vm2, %v994_v25, %v1124_v19 }
 0x290   :  { %1244 = vst [vmem:[%s3170_s5 + $0x1b0] sm:$0xff] %v1180_v14  ;;  %v1189_v51 = vsel %vm1060_vm3, %v3331_v2, %v1125_v40 }
 0x291   :  { %1245 = vst [vmem:[%s3170_s5 + $0x1b8] sm:$0xff] %v1181_v20 }
 0x292   :  { %1246 = vst [vmem:[%s3170_s5 + $0x1c0] sm:$0xff] %v1182_v49 }
 0x293   :  { %1247 = vst [vmem:[%s3170_s5 + $0x1c8] sm:$0xff] %v1183_v30 }
 0x294   :  { %1248 = vst [vmem:[%s3170_s5 + $0x1d0] sm:$0xff] %v1184_v12 }
 0x295   :  { %1249 = vst [vmem:[%s3170_s5 + $0x1d8] sm:$0xff] %v1185_v15 }
 0x296   :  { %1250 = vst [vmem:[%s3170_s5 + $0x1e0] sm:$0xff] %v1186_v43 }
 0x297   :  { %1251 = vst [vmem:[%s3170_s5 + $0x1e8] sm:$0xff] %v1187_v33 }
 0x298   :  { %1252 = vst [vmem:[%s3170_s5 + $0x1f0] sm:$0xff] %v1188_v23 }
 0x299   :  { %1253 = vst [vmem:[%s3170_s5 + $0x1f8] sm:$0xff] %v1189_v51 }

// kernel: _lambda_.9
= control target key start
LH: loop header
LB: loop body
LE: loop exit
PB: predicated region body
PF: predicated region fallthrough
CT: control target
= control target key end

     0   :  { %v529_v37 = vmov 128.0   ;;  %s748_s1 = inlined_call_operand.vmem [shape: bf16[128,128], index: 1, kind: input, shape index: {}]   ;;  %s749_s0 = inlined_call_operand.vmem [shape: bf16[128,128], index: 0, kind: input, shape index: {}]   ;;  %s750_s2 = inlined_call_operand.vmem [shape: f32[1,128], index: 2, kind: input, shape index: {}]   ;;  %s751_s3 = inlined_call_operand.vmem [shape: f32[1,128], index: 3, kind: input, shape index: {}]   ;;  %s752_s4 = inlined_call_operand.<no memory space> [shape: f32[1], index: 4, kind: input, shape index: {}]   ;;  %s753_s5 = inlined_call_operand.vmem [shape: f32[128,128], index: 5, kind: output, shape index: {}]  }
   0x1   :  { %v497_v0 = vld [vmem:[%s748_s1 + $0x38] sm:$0xff]  ;;  %v496_v1 = vld [vmem:[%s748_s1 + $0x30] sm:$0xff]  ;;  %v495_v2 = vld [vmem:[%s748_s1 + $0x28] sm:$0xff]  ;;  %525 = vrcp.f32 %v529_v37 }
   0x2   :  { %149 = vmatpush.bf16.msra.mxu0 %v497_v0  ;;  %498 = vmatpush.bf16.msra.mxu1 %v497_v0  ;;  %v494_v3 = vld [vmem:[%s748_s1 + $0x20] sm:$0xff]  ;;  %v493_v4 = vld [vmem:[%s748_s1 + $0x18] sm:$0xff]  ;;  %v492_v5 = vld [vmem:[%s748_s1 + $0x10] sm:$0xff] }
   0x3   :  { %499 = vmatpush.bf16.msra.mxu2 %v497_v0  ;;  %500 = vmatpush.bf16.msra.mxu3 %v497_v0  ;;  %v491_v6 = vld [vmem:[%s748_s1 + $0x8] sm:$0xff]  ;;  %v490_v7 = vld [vmem:[%s748_s1] sm:$0xff]  ;;  %v484_v9 = vld [vmem:[%s749_s0 + $0x10] sm:$0xff] }
   0x4   :  { %v482_v8 = vld [vmem:[%s749_s0] sm:$0xff]  ;;  %v488_v11 = vld [vmem:[%s749_s0 + $0x30] sm:$0xff]  ;;  %v483_v12 = vld [vmem:[%s749_s0 + $0x8] sm:$0xff] }
   0x5   :  { %v486_v10 = vld [vmem:[%s749_s0 + $0x20] sm:$0xff]  ;;  %v485_v13 = vld [vmem:[%s749_s0 + $0x18] sm:$0xff]  ;;  %v487_v14 = vld [vmem:[%s749_s0 + $0x28] sm:$0xff] }
   0x6   :  { %150 = vmatpush.bf16.msra.mxu0 %v496_v1  ;;  %501 = vmatpush.bf16.msra.mxu1 %v496_v1  ;;  %v489_v15 = vld [vmem:[%s749_s0 + $0x38] sm:$0xff] }
   0x7   :  { %502 = vmatpush.bf16.msra.mxu2 %v496_v1  ;;  %503 = vmatpush.bf16.msra.mxu3 %v496_v1  ;;  %v526_v42 = vpop.eup %525 }
   0x8   :  { %v220_v45 = vmul.f32 128.0, %v526_v42  ;;  %vm224_vm0 = vweird.f32 %v526_v42 }
   0xa   :  { %151 = vmatpush.bf16.msra.mxu0 %v495_v2  ;;  %504 = vmatpush.bf16.msra.mxu1 %v495_v2  ;;  %v221_v49 = vsub.f32 1.0, %v220_v45 }
   0xb   :  { %505 = vmatpush.bf16.msra.mxu2 %v495_v2  ;;  %506 = vmatpush.bf16.msra.mxu3 %v495_v2 }
   0xc   :  { %v222_v52 = vmul.f32 %v526_v42, %v221_v49 }
   0xe   :  { %152 = vmatpush.bf16.msra.mxu0 %v494_v3  ;;  %507 = vmatpush.bf16.msra.mxu1 %v494_v3  ;;  %v223_v55 = vadd.f32 %v526_v42, %v222_v52 }
   0xf   :  { %508 = vmatpush.bf16.msra.mxu2 %v494_v3  ;;  %509 = vmatpush.bf16.msra.mxu3 %v494_v3 }
  0x10   :  { %v225_v58 = vsel %vm224_vm0, %v526_v42, %v223_v55 }
  0x12   :  { %153 = vmatpush.bf16.msra.mxu0 %v493_v4  ;;  %510 = vmatpush.bf16.msra.mxu1 %v493_v4 }
  0x13   :  { %511 = vmatpush.bf16.msra.mxu2 %v493_v4  ;;  %512 = vmatpush.bf16.msra.mxu3 %v493_v4 }
  0x16   :  { %154 = vmatpush.bf16.msra.mxu0 %v492_v5  ;;  %513 = vmatpush.bf16.msra.mxu1 %v492_v5 }
  0x17   :  { %514 = vmatpush.bf16.msra.mxu2 %v492_v5  ;;  %515 = vmatpush.bf16.msra.mxu3 %v492_v5 }
  0x1a   :  { %155 = vmatpush.bf16.msra.mxu0 %v491_v6  ;;  %516 = vmatpush.bf16.msra.mxu1 %v491_v6 }
  0x1b   :  { %517 = vmatpush.bf16.msra.mxu2 %v491_v6  ;;  %518 = vmatpush.bf16.msra.mxu3 %v491_v6 }
  0x1e   :  { %156 = vmatpush.bf16.msra.mxu0 %v490_v7  ;;  %519 = vmatpush.bf16.msra.mxu1 %v490_v7 }
  0x1f   :  { %520 = vmatpush.bf16.msra.mxu2 %v490_v7  ;;  %521 = vmatpush.bf16.msra.mxu3 %v490_v7 }
  0x21   :  { %157 = vmatmul.bf16.vlgmr.msra.gmra.mxu0 %v482_v8  ;;  %167 = vmatmul.bf16.vlgmr.msra.gmra.mxu1 %v484_v9 }
  0x22   :  { %177 = vmatmul.bf16.vlgmr.msra.gmra.mxu2 %v486_v10  ;;  %187 = vmatmul.bf16.vlgmr.msra.gmra.mxu3 %v488_v11 }
  0x31   :  { %162 = vmatmul.bf16.gmra.mxu0 %v483_v12  ;;  %172 = vmatmul.bf16.gmra.mxu1 %v485_v13 }
  0x32   :  { %182 = vmatmul.bf16.gmra.mxu2 %v487_v14  ;;  %192 = vmatmul.bf16.gmra.mxu3 %v489_v15 }
  0x9e   :  { %v158_v16 = vpop.f32.mrf.mxu0  ;;  %v168_v17 = vpop.f32.mrf.mxu1 }
  0xa5   :  { %v178_v19 = vpop.f32.mrf.mxu2  ;;  %v608_v22 = vpop.f32.mrf.mxu3 }
  0xa6   :  { %v160_v18 = vpop.f32.mrf.mxu0  ;;  %v170_v20 = vpop.f32.mrf.mxu1 }
  0xa7   :  { %v198_v24 = vadd.f32 %v160_v18, %v158_v16 }
  0xad   :  { %v180_v23 = vpop.f32.mrf.mxu2  ;;  %v610_v30 = vpop.f32.mrf.mxu3 }
  0xae   :  { %v163_v21 = vpop.f32.mrf.mxu0  ;;  %v173_v25 = vpop.f32.mrf.mxu1 }
  0xaf   :  { %v199_v26 = vadd.f32 %v198_v24, %v163_v21 }
  0xb5   :  { %v183_v32 = vpop.f32.mrf.mxu2  ;;  %v193_v39 = vpop.f32.mrf.mxu3 }
  0xb6   :  { %v165_v27 = vpop.f32.mrf.mxu0  ;;  %v175_v34 = vpop.f32.mrf.mxu1 }
  0xb7   :  { %v200_v28 = vadd.f32 %v199_v26, %v165_v27 }
  0xb9   :  { %v201_v29 = vadd.f32 %v200_v28, %v168_v17 }
  0xbb   :  { %v202_v31 = vadd.f32 %v201_v29, %v170_v20 }
  0xbd   :  { %v203_v33 = vadd.f32 %v202_v31, %v173_v25  ;;  %v185_v41 = vpop.f32.mrf.mxu2  ;;  %v195_v48 = vpop.f32.mrf.mxu3 }
  0xbf   :  { %v204_v35 = vadd.f32 %v203_v33, %v175_v34 }
  0xc1   :  { %v205_v36 = vadd.f32 %v204_v35, %v178_v19 }
  0xc3   :  { %v206_v38 = vadd.f32 %v205_v36, %v180_v23 }
  0xc5   :  { %v207_v40 = vadd.f32 %v206_v38, %v183_v32 }
  0xc7   :  { %v208_v43 = vadd.f32 %v207_v40, %v185_v41 }
  0xc9   :  { %v209_v44 = vadd.f32 %v208_v43, %v608_v22 }
  0xcb   :  { %v210_v46 = vadd.f32 %v209_v44, %v610_v30 }
  0xcd   :  { %v211_v47 = vadd.f32 %v210_v46, %v193_v39 }
  0xcf   :  { %v212_v50 = vadd.f32 %v211_v47, %v195_v48 }
  0xd1   :  { %v213_v51 = vrot.slane %v212_v50, 4 }
  0xd3   :  { %v214_v53 = vadd.f32 %v213_v51, %v212_v50 }
  0xd5   :  { %v215_v54 = vrot.slane %v214_v53, 2 }
  0xd7   :  { %v216_v56 = vadd.f32 %v215_v54, %v214_v53 }
  0xd9   :  { %v217_v57 = vrot.slane %v216_v56, 1 }
  0xdb   :  { %v218_v59 = vadd.f32 %v217_v57, %v216_v56 }
  0xdd   :  { %v226_v60 = vmul.f32 %v225_v58, %v218_v59 }
  0xdf   :  { %v614_v61 = vsub.f32 %v158_v16, %v226_v60  ;;  %v616_v62 = vsub.f32 %v160_v18, %v226_v60  ;;  %v618_v63 = vsub.f32 %v163_v21, %v226_v60  ;;  %v624_v2 = vsub.f32 %v165_v27, %v226_v60 }
  0xe0   :  { %v626_v3 = vsub.f32 %v168_v17, %v226_v60  ;;  %v630_v6 = vsub.f32 %v170_v20, %v226_v60  ;;  %v233_v9 = vsub.f32 %v173_v25, %v226_v60  ;;  %v234_v12 = vsub.f32 %v175_v34, %v226_v60 }
  0xe1   :  { %v243_v0 = vmul.f32 %v614_v61, %v614_v61  ;;  %v244_v1 = vmul.f32 %v616_v62, %v616_v62  ;;  %v245_v4 = vmul.f32 %v618_v63, %v618_v63  ;;  %v246_v7 = vmul.f32 %v624_v2, %v624_v2 }
  0xe2   :  { %v247_v10 = vmul.f32 %v626_v3, %v626_v3  ;;  %v248_v13 = vmul.f32 %v630_v6, %v630_v6  ;;  %v638_v15 = vsub.f32 %v178_v19, %v226_v60  ;;  %v249_v16 = vmul.f32 %v233_v9, %v233_v9 }
  0xe3   :  { %v259_v5 = vadd.f32 %v244_v1, %v243_v0  ;;  %v236_v18 = vsub.f32 %v180_v23, %v226_v60  ;;  %v250_v20 = vmul.f32 %v234_v12, %v234_v12  ;;  %v237_v24 = vsub.f32 %v183_v32, %v226_v60 }
  0xe4   :  { %v251_v25 = vmul.f32 %v638_v15, %v638_v15  ;;  %v238_v27 = vsub.f32 %v185_v41, %v226_v60  ;;  %v239_v31 = vsub.f32 %v608_v22, %v226_v60  ;;  %v240_v19 = vsub.f32 %v610_v30, %v226_v60 }
  0xe5   :  { %v260_v8 = vadd.f32 %v259_v5, %v245_v4  ;;  %v252_v28 = vmul.f32 %v236_v18, %v236_v18  ;;  %v253_v33 = vmul.f32 %v237_v24, %v237_v24  ;;  %v241_v37 = vsub.f32 %v193_v39, %v226_v60 }
  0xe6   :  { %v254_v35 = vmul.f32 %v238_v27, %v238_v27  ;;  %v255_v23 = vmul.f32 %v239_v31, %v239_v31  ;;  %v242_v40 = vsub.f32 %v195_v48, %v226_v60  ;;  %v256_v32 = vmul.f32 %v240_v19, %v240_v19 }
  0xe7   :  { %v261_v11 = vadd.f32 %v260_v8, %v246_v7  ;;  %v257_v43 = vmul.f32 %v241_v37, %v241_v37 }
  0xe8   :  { %v258_v45 = vmul.f32 %v242_v40, %v242_v40 }
  0xe9   :  { %v262_v14 = vadd.f32 %v261_v11, %v247_v10  ;;  %v656_v10 = vstv %s752_s4 }
  0xeb   :  { %v263_v17 = vadd.f32 %v262_v14, %v248_v13  ;;  %v661_v13 = vld [vmem:[%s751_s3] ss:$0 sm:$0xff] }
  0xed   :  { %v264_v21 = vadd.f32 %v263_v17, %v249_v16 }
  0xef   :  { %v265_v26 = vadd.f32 %v264_v21, %v250_v20 }
  0xf1   :  { %v266_v29 = vadd.f32 %v265_v26, %v251_v25 }
  0xf3   :  { %v267_v34 = vadd.f32 %v266_v29, %v252_v28 }
  0xf5   :  { %v268_v36 = vadd.f32 %v267_v34, %v253_v33 }
  0xf7   :  { %v269_v38 = vadd.f32 %v268_v36, %v254_v35 }
  0xf9   :  { %v270_v42 = vadd.f32 %v269_v38, %v255_v23 }
  0xfb   :  { %v271_v44 = vadd.f32 %v270_v42, %v256_v32 }
  0xfd   :  { %v272_v41 = vadd.f32 %v271_v44, %v257_v43 }
  0xff   :  { %v273_v46 = vadd.f32 %v272_v41, %v258_v45 }
 0x101   :  { %v274_v47 = vrot.slane %v273_v46, 4 }
 0x103   :  { %v275_v49 = vadd.f32 %v274_v47, %v273_v46 }
 0x105   :  { %v276_v22 = vrot.slane %v275_v49, 2 }
 0x107   :  { %v277_v50 = vadd.f32 %v276_v22, %v275_v49 }
 0x109   :  { %v278_v51 = vrot.slane %v277_v50, 1 }
 0x10b   :  { %v279_v52 = vadd.f32 %v278_v51, %v277_v50 }
 0x10d   :  { %v280_v30 = vmul.f32 %v279_v52, %v225_v58  ;;  %v523_v58 = vld [vmem:[%s750_s2] ss:$0 sm:$0xff] }
 0x10f   :  { %v281_v53 = vadd.f32 1e-05, %v280_v30 }
 0x111   :  { %527 = vrsqrt.f32 %v281_v53  ;;  %vm288_vm2 = vweird.f32 %v281_v53 }
 0x117   :  { %v528_v39 = vpop.eup %527 }
 0x118   :  { %v283_v54 = vmul.f32 %v528_v39, %v281_v53  ;;  %vm289_vm1 = vweird.f32 %v528_v39 }
 0x119   :  { %vm290_vm3 = vmor %vm288_vm2, %vm289_vm1 }
 0x11a   :  { %v284_v55 = vmul.f32 %v528_v39, %v283_v54 }
 0x11c   :  { %v285_v48 = vmul.f32 0.5, %v284_v55 }
 0x11e   :  { %v286_v56 = vsub.f32 1.5, %v285_v48 }
 0x120   :  { %v287_v57 = vmul.f32 %v528_v39, %v286_v56 }
 0x122   :  { %v291_v59 = vsel %vm290_vm3, %v528_v39, %v287_v57 }
 0x123   :  { %v292_v60 = vmul.f32 %v291_v59, %v614_v61  ;;  %v293_v0 = vmul.f32 %v291_v59, %v616_v62  ;;  %v294_v1 = vmul.f32 %v291_v59, %v618_v63  ;;  %v295_v4 = vmul.f32 %v291_v59, %v624_v2 }
 0x124   :  { %v296_v5 = vmul.f32 %v291_v59, %v626_v3  ;;  %v297_v7 = vmul.f32 %v291_v59, %v630_v6  ;;  %v298_v8 = vmul.f32 %v291_v59, %v233_v9  ;;  %v299_v61 = vmul.f32 %v291_v59, %v234_v12 }
 0x125   :  { %v312_v62 = vmul.f32 %v523_v58, %v292_v60  ;;  %v313_v11 = vmul.f32 %v523_v58, %v293_v0  ;;  %v314_v63 = vmul.f32 %v523_v58, %v294_v1  ;;  %v300_v2 = vmul.f32 %v291_v59, %v638_v15 }
 0x126   :  { %v301_v3 = vmul.f32 %v291_v59, %v236_v18  ;;  %v302_v14 = vmul.f32 %v291_v59, %v237_v24  ;;  %v315_v6 = vmul.f32 %v523_v58, %v295_v4  ;;  %v303_v9 = vmul.f32 %v291_v59, %v238_v27 }
 0x127   :  { %v304_v16 = vmul.f32 %v291_v59, %v239_v31  ;;  %v305_v17 = vmul.f32 %v291_v59, %v240_v19  ;;  %v316_v20 = vmul.f32 %v523_v58, %v296_v5  ;;  %v306_v21 = vmul.f32 %v291_v59, %v241_v37 }
 0x128   :  { %v307_v25 = vmul.f32 %v291_v59, %v242_v40  ;;  %v317_v12 = vmul.f32 %v523_v58, %v297_v7  ;;  %v318_v26 = vmul.f32 %v523_v58, %v298_v8  ;;  %v319_v28 = vmul.f32 %v523_v58, %v299_v61 }
 0x129   :  { %v332_v29 = vadd.f32 %v661_v13, %v312_v62  ;;  %v333_v33 = vadd.f32 %v661_v13, %v313_v11  ;;  %v334_v34 = vadd.f32 %v661_v13, %v314_v63  ;;  %v320_v35 = vmul.f32 %v523_v58, %v300_v2 }
 0x12a   :  { %v321_v15 = vmul.f32 %v523_v58, %v301_v3  ;;  %v322_v18 = vmul.f32 %v523_v58, %v302_v14  ;;  %v335_v24 = vadd.f32 %v661_v13, %v315_v6  ;;  %v323_v27 = vmul.f32 %v523_v58, %v303_v9 }
 0x12b   :  { %v324_v31 = vmul.f32 %v523_v58, %v304_v16  ;;  %v325_v19 = vmul.f32 %v523_v58, %v305_v17  ;;  %v336_v36 = vadd.f32 %v661_v13, %v316_v20  ;;  %v326_v37 = vmul.f32 %v523_v58, %v306_v21 }
 0x12c   :  { %v327_v23 = vmul.f32 %v523_v58, %v307_v25  ;;  %v337_v38 = vadd.f32 %v661_v13, %v317_v12  ;;  %v338_v40 = vadd.f32 %v661_v13, %v318_v26  ;;  %v339_v32 = vadd.f32 %v661_v13, %v319_v28 }
 0x12d   :  { %v366_v42 = vmul.f32 %v656_v10, %v332_v29  ;;  %v367_v43 = vmul.f32 %v656_v10, %v333_v33  ;;  %v368_v44 = vmul.f32 %v656_v10, %v334_v34  ;;  %vm349_vm4 = vcmp.gt.f32.partialorder %v332_v29, 0.0 }
 0x12e   :  { %vm350_vm5 = vcmp.gt.f32.partialorder %v333_v33, 0.0  ;;  %vm351_vm6 = vcmp.gt.f32.partialorder %v334_v34, 0.0  ;;  %v369_v45 = vmul.f32 %v656_v10, %v335_v24  ;;  %v340_v41 = vadd.f32 %v661_v13, %v320_v35 }
 0x12f   :  { %v341_v46 = vadd.f32 %v661_v13, %v321_v15  ;;  %vm352_vm7 = vcmp.gt.f32.partialorder %v335_v24, 0.0  ;;  %v370_v47 = vmul.f32 %v656_v10, %v336_v36  ;;  %v342_v49 = vadd.f32 %v661_v13, %v322_v18 }
 0x130   :  { %vm353_vm8 = vcmp.gt.f32.partialorder %v336_v36, 0.0  ;;  %vm354_vm9 = vcmp.gt.f32.partialorder %v337_v38, 0.0  ;;  %v371_v22 = vmul.f32 %v656_v10, %v337_v38  ;;  %v372_v50 = vmul.f32 %v656_v10, %v338_v40 }
 0x131   :  { %v382_v51 = vsel %vm349_vm4, %v332_v29, %v366_v42  ;;  %v383_v52 = vsel %vm350_vm5, %v333_v33, %v367_v43  ;;  %v384_v30 = vsel %vm351_vm6, %v334_v34, %v368_v44  ;;  %v343_v53 = vadd.f32 %v661_v13, %v323_v27 }
 0x132   :  { %vm355_vm10 = vcmp.gt.f32.partialorder %v338_v40, 0.0  ;;  %v373_v39 = vmul.f32 %v656_v10, %v339_v32  ;;  %v385_v54 = vsel %vm352_vm7, %v335_v24, %v369_v45  ;;  %398 = vst [vmem:[%s753_s5] sm:$0xff] %v382_v51  ;;  %v344_v55 = vadd.f32 %v661_v13, %v324_v31 }
 0x133   :  { %vm356_vm11 = vcmp.gt.f32.partialorder %v339_v32, 0.0  ;;  %v374_v48 = vmul.f32 %v656_v10, %v340_v41  ;;  %v386_v56 = vsel %vm353_vm8, %v336_v36, %v370_v47  ;;  %399 = vst [vmem:[%s753_s5 + $0x8] sm:$0xff] %v383_v52  ;;  %v345_v57 = vadd.f32 %v661_v13, %v325_v19 }
 0x134   :  { %vm357_vm12 = vcmp.gt.f32.partialorder %v340_v41, 0.0  ;;  %v375_v59 = vmul.f32 %v656_v10, %v341_v46  ;;  %v387_v60 = vsel %vm354_vm9, %v337_v38, %v371_v22  ;;  %400 = vst [vmem:[%s753_s5 + $0x10] sm:$0xff] %v384_v30  ;;  %v346_v0 = vadd.f32 %v661_v13, %v326_v37 }
 0x135   :  { %vm358_vm13 = vcmp.gt.f32.partialorder %v341_v46, 0.0  ;;  %v376_v1 = vmul.f32 %v656_v10, %v342_v49  ;;  %v388_v58 = vsel %vm355_vm10, %v338_v40, %v372_v50  ;;  %401 = vst [vmem:[%s753_s5 + $0x18] sm:$0xff] %v385_v54  ;;  %v347_v4 = vadd.f32 %v661_v13, %v327_v23 }
 0x136   :  { %vm359_vm14 = vcmp.gt.f32.partialorder %v342_v49, 0.0  ;;  %v377_v5 = vmul.f32 %v656_v10, %v343_v53  ;;  %v389_v7 = vsel %vm356_vm11, %v339_v32, %v373_v39  ;;  %402 = vst [vmem:[%s753_s5 + $0x20] sm:$0xff] %v386_v56  ;;  %vm360_vm15 = vcmp.gt.f32.partialorder %v343_v53, 0.0 }
 0x137   :  { %v378_v8 = vmul.f32 %v656_v10, %v344_v55  ;;  %v390_v61 = vsel %vm357_vm12, %v340_v41, %v374_v48  ;;  %403 = vst [vmem:[%s753_s5 + $0x28] sm:$0xff] %v387_v60  ;;  %vm361_vm0 = vcmp.gt.f32.partialorder %v344_v55, 0.0  ;;  %v379_v62 = vmul.f32 %v656_v10, %v345_v57 }
 0x138   :  { %v391_v11 = vsel %vm358_vm13, %v341_v46, %v375_v59  ;;  %404 = vst [vmem:[%s753_s5 + $0x30] sm:$0xff] %v388_v58  ;;  %vm362_vm1 = vcmp.gt.f32.partialorder %v345_v57, 0.0  ;;  %v380_v63 = vmul.f32 %v656_v10, %v346_v0  ;;  %v392_v13 = vsel %vm359_vm14, %v342_v49, %v376_v1 }
 0x139   :  { %405 = vst [vmem:[%s753_s5 + $0x38] sm:$0xff] %v389_v7  ;;  %vm363_vm2 = vcmp.gt.f32.partialorder %v346_v0, 0.0  ;;  %v381_v2 = vmul.f32 %v656_v10, %v347_v4  ;;  %v393_v3 = vsel %vm360_vm15, %v343_v53, %v377_v5  ;;  %vm364_vm3 = vcmp.gt.f32.partialorder %v347_v4, 0.0 }
 0x13a   :  { %406 = vst [vmem:[%s753_s5 + $0x40] sm:$0xff] %v390_v61  ;;  %v394_v14 = vsel %vm361_vm0, %v344_v55, %v378_v8  ;;  %v395_v6 = vsel %vm362_vm1, %v345_v57, %v379_v62  ;;  %v396_v9 = vsel %vm363_vm2, %v346_v0, %v380_v63 }
 0x13b   :  { %407 = vst [vmem:[%s753_s5 + $0x48] sm:$0xff] %v391_v11  ;;  %v397_v10 = vsel %vm364_vm3, %v347_v4, %v381_v2 }
 0x13c   :  { %408 = vst [vmem:[%s753_s5 + $0x50] sm:$0xff] %v392_v13 }
 0x13d   :  { %409 = vst [vmem:[%s753_s5 + $0x58] sm:$0xff] %v393_v3 }
 0x13e   :  { %410 = vst [vmem:[%s753_s5 + $0x60] sm:$0xff] %v394_v14 }
 0x13f   :  { %411 = vst [vmem:[%s753_s5 + $0x68] sm:$0xff] %v395_v6 }
 0x140   :  { %412 = vst [vmem:[%s753_s5 + $0x70] sm:$0xff] %v396_v9 }
 0x141   :  { %413 = vst [vmem:[%s753_s5 + $0x78] sm:$0xff] %v397_v10 }

// kernel: _lambda_.10
= control target key start
LH: loop header
LB: loop body
LE: loop exit
PB: predicated region body
PF: predicated region fallthrough
CT: control target
= control target key end

     0   :  { %vm30_vm0 = vcmask 130048   ;;  %v217_v7 = vmov 64.0   ;;  %vm86_vm2 = vcmask 1041409   ;;  %s485_s1 = inlined_call_operand.vmem [shape: f32[16,128], index: 1, kind: input, shape index: {}]   ;;  %s486_s0 = inlined_call_operand.vmem [shape: f32[2,64,16], index: 0, kind: input, shape index: {}]   ;;  %s487_s2 = inlined_call_operand.vmem [shape: f32[128,16], index: 2, kind: input, shape index: {}]   ;;  %s488_s3 = inlined_call_operand.vmem [shape: f32[2,64,16], index: 3, kind: output, shape index: {}]  }
   0x1   :  { %v83_v0 = vld [vmem:[%s485_s1 + $0x8] sm:$0xff]  ;;  %v82_v1 = vld [vmem:[%s485_s1] sm:$0xff]  ;;  %v257_v4 = vld [vmem:[%s486_s0 + $0x10] sm:$0xff]  ;;  %211 = vrcp.f32 %v217_v7 }
   0x2   :  { %v247_v2 = vld [vmem:[%s486_s0] sm:$0xff]  ;;  %104 = vmatpush.msra.mxu0 %v83_v0  ;;  %v252_v3 = vld [vmem:[%s486_s0 + $0x8] sm:$0xff]  ;;  %v262_v5 = vld [vmem:[%s486_s0 + $0x18] sm:$0xff]  ;;  %v34_v9 = vsel %vm30_vm0, %v257_v4, 0.0 }
   0x3   :  { %v31_v6 = vsel %vm30_vm0, %v247_v2, 0.0  ;;  %v32_v8 = vsel %vm30_vm0, %v252_v3, 0.0  ;;  %v273_v10 = vld [vmem:[%s486_s0 + $0x20] sm:$0xff]  ;;  %v283_v12 = vld [vmem:[%s486_s0 + $0x48] sm:$0xff]  ;;  %v288_v14 = vld [vmem:[%s486_s0 + $0x50] sm:$0xff]  ;;  %v36_v16 = vsel %vm30_vm0, %v262_v5, 0.0 }
   0x4   :  { %105 = vmatpush.msra.mxu0 %v82_v1  ;;  %v278_v11 = vld [vmem:[%s486_s0 + $0x40] sm:$0xff]  ;;  %v33_v13 = vadd.f32 %v32_v8, %v31_v6  ;;  %v293_v15 = vld [vmem:[%s486_s0 + $0x58] sm:$0xff]  ;;  %v53_v18 = vsel %vm30_vm0, %v283_v12, 0.0  ;;  %v304_v19 = vld [vmem:[%s486_s0 + $0x28] sm:$0xff]  ;;  %v55_v23 = vsel %vm30_vm0, %v288_v14, 0.0  ;;  %v38_v24 = vsel %vm30_vm0, %v273_v10, 0.0 }
   0x5   :  { %v52_v17 = vsel %vm30_vm0, %v278_v11, 0.0  ;;  %v309_v20 = vld [vmem:[%s486_s0 + $0x60] sm:$0xff]  ;;  %v57_v25 = vsel %vm30_vm0, %v293_v15, 0.0  ;;  %v126_v26 = vld [vmem:[%s487_s2 + $0x78] sm:$0xff]  ;;  %v125_v27 = vld [vmem:[%s487_s2 + $0x70] sm:$0xff]  ;;  %v40_v33 = vsel %vm30_vm0, %v304_v19, 0.0 }
   0x6   :  { %v35_v21 = vadd.f32 %v34_v9, %v33_v13  ;;  %v54_v22 = vadd.f32 %v53_v18, %v52_v17  ;;  %v326_v29 = vld [vmem:[%s486_s0 + $0x30] sm:$0xff]  ;;  %v331_v30 = vld [vmem:[%s486_s0 + $0x68] sm:$0xff]  ;;  %127 = vmatpush.msra.mxu1 %v126_v26  ;;  %v59_v34 = vsel %vm30_vm0, %v309_v20, 0.0  ;;  %v343_v36 = vld [vmem:[%s486_s0 + $0x38] sm:$0xff] }
   0x7   :  { %v212_v28 = vpop.eup %211  ;;  %v124_v35 = vld [vmem:[%s487_s2 + $0x68] sm:$0xff]  ;;  %v348_v37 = vld [vmem:[%s486_s0 + $0x70] sm:$0xff]  ;;  %v42_v40 = vsel %vm30_vm0, %v326_v29, 0.0  ;;  %v61_v41 = vsel %vm30_vm0, %v331_v30, 0.0  ;;  %v123_v43 = vld [vmem:[%s487_s2 + $0x60] sm:$0xff]  ;;  %v44_v47 = vsel %vm30_vm0, %v343_v36, 0.0 }
   0x8   :  { %v37_v31 = vadd.f32 %v36_v16, %v35_v21  ;;  %v56_v32 = vadd.f32 %v55_v23, %v54_v22  ;;  %128 = vmatpush.msra.mxu1 %v125_v27  ;;  %v74_v42 = vmul.f32 64.0, %v212_v28  ;;  %v360_v44 = vld [vmem:[%s486_s0 + $0x78] sm:$0xff]  ;;  %v63_v48 = vsel %vm30_vm0, %v348_v37, 0.0  ;;  %v121_v54 = vld [vmem:[%s487_s2 + $0x50] sm:$0xff]  ;;  %v120_v57 = vld [vmem:[%s487_s2 + $0x48] sm:$0xff] }
   0x9   :  { %v122_v49 = vld [vmem:[%s487_s2 + $0x58] sm:$0xff]  ;;  %v65_v52 = vsel %vm30_vm0, %v360_v44, 0.0  ;;  %v119_v61 = vld [vmem:[%s487_s2 + $0x40] sm:$0xff]  ;;  %v117_v8 = vld [vmem:[%s487_s2 + $0x30] sm:$0xff]  ;;  %vm78_vm1 = vweird.f32 %v212_v28 }
   0xa   :  { %v39_v38 = vadd.f32 %v38_v24, %v37_v31  ;;  %v58_v39 = vadd.f32 %v57_v25, %v56_v32  ;;  %129 = vmatpush.msra.mxu1 %v124_v35  ;;  %v75_v53 = vsub.f32 1.0, %v74_v42  ;;  %v118_v0 = vld [vmem:[%s487_s2 + $0x38] sm:$0xff]  ;;  %v116_v16 = vld [vmem:[%s487_s2 + $0x28] sm:$0xff]  ;;  %v115_v22 = vld [vmem:[%s487_s2 + $0x20] sm:$0xff] }
   0xb   :  { %v114_v25 = vld [vmem:[%s487_s2 + $0x18] sm:$0xff]  ;;  %v113_v31 = vld [vmem:[%s487_s2 + $0x10] sm:$0xff] }
   0xc   :  { %v41_v45 = vadd.f32 %v40_v33, %v39_v38  ;;  %v60_v46 = vadd.f32 %v59_v34, %v58_v39  ;;  %130 = vmatpush.msra.mxu1 %v123_v43  ;;  %v76_v60 = vmul.f32 %v212_v28, %v75_v53  ;;  %v112_v33 = vld [vmem:[%s487_s2 + $0x8] sm:$0xff]  ;;  %v111_v34 = vld [vmem:[%s487_s2] sm:$0xff] }
   0xe   :  { %v43_v50 = vadd.f32 %v42_v40, %v41_v45  ;;  %v62_v51 = vadd.f32 %v61_v41, %v60_v46  ;;  %131 = vmatpush.msra.mxu1 %v122_v49  ;;  %v77_v7 = vadd.f32 %v212_v28, %v76_v60 }
  0x10   :  { %v45_v55 = vadd.f32 %v44_v47, %v43_v50  ;;  %v64_v56 = vadd.f32 %v63_v48, %v62_v51  ;;  %132 = vmatpush.msra.mxu1 %v121_v54  ;;  %v79_v21 = vsel %vm78_vm1, %v212_v28, %v77_v7 }
  0x12   :  { %v46_v58 = vrot.slane %v45_v55, 4  ;;  %v66_v59 = vadd.f32 %v65_v52, %v64_v56  ;;  %133 = vmatpush.msra.mxu1 %v120_v57 }
  0x14   :  { %v47_v62 = vadd.f32 %v46_v58, %v45_v55  ;;  %v67_v63 = vrot.slane %v66_v59, 4  ;;  %134 = vmatpush.msra.mxu1 %v119_v61 }
  0x16   :  { %v48_v1 = vrot.slane %v47_v62, 2  ;;  %v68_v6 = vadd.f32 %v67_v63, %v66_v59  ;;  %135 = vmatpush.msra.mxu1 %v118_v0 }
  0x18   :  { %v49_v9 = vadd.f32 %v48_v1, %v47_v62  ;;  %v69_v13 = vrot.slane %v68_v6, 2  ;;  %136 = vmatpush.msra.mxu1 %v117_v8 }
  0x1a   :  { %v50_v17 = vrot.slane %v49_v9, 1  ;;  %v70_v18 = vadd.f32 %v69_v13, %v68_v6  ;;  %137 = vmatpush.msra.mxu1 %v116_v16 }
  0x1c   :  { %v51_v23 = vadd.f32 %v50_v17, %v49_v9  ;;  %v71_v24 = vrot.slane %v70_v18, 1  ;;  %138 = vmatpush.msra.mxu1 %v115_v22 }
  0x1e   :  { %v72_v26 = vadd.f32 %v71_v24, %v70_v18  ;;  %v80_v27 = vmul.f32 %v79_v21, %v51_v23  ;;  %139 = vmatpush.msra.mxu1 %v114_v25 }
  0x20   :  { %v81_v28 = vmul.f32 %v79_v21, %v72_v26  ;;  %140 = vmatpush.msra.mxu1 %v113_v31 }
  0x22   :  { %v87_v32 = vsel %vm86_vm2, %v81_v28, %v80_v27  ;;  %141 = vmatpush.msra.mxu1 %v112_v33 }
  0x23   :  { %208 = vmatmul.msk.f32.vlgmr.msra.gmra.mxu0 %vm30_vm0, %v87_v32 }
  0x24   :  { %142 = vmatpush.msra.mxu1 %v111_v34 }
  0xa0   :  { %v107_v35 = vpop.f32.mrf.mxu0 }
  0xa1   :  { %v110_v38 = vmax.f32 %v107_v35, 0.0 }
  0xa3   :  { %143 = vmatmul.f32.vlgmr.msra.gmra.mxu1 %v110_v38 }
 0x120   :  { %v144_v39 = vpop.f32.mrf.mxu1 }
 0x121   :  { %v209_v40 = vmul.f32 -1.442695, %v144_v39 }
 0x123   :  { %213 = vpow2.f32 %v209_v40 }
 0x129   :  { %v214_v41 = vpop.eup %213 }
 0x12a   :  { %v150_v42 = vadd.f32 1.0, %v214_v41 }
 0x12c   :  { %215 = vrcp.f32 %v150_v42  ;;  %v162_v47 = vand.u32 2147483648, %v150_v42  ;;  %v160_v49 = vand.u32 2147483647, %v150_v42  ;;  %vm156_vm4 = vweird.f32 %v150_v42 }
 0x12e   :  { %v163_v51 = vor.u32 1.1754944e-38, %v162_v47  ;;  %vm161_vm6 = vcmp.eq.f32.partialorder %v160_v49, 8.507059e+37 }
 0x132   :  { %v216_v43 = vpop.eup %215 }
 0x133   :  { %v152_v45 = vmul.f32 %v216_v43, %v150_v42  ;;  %vm157_vm3 = vweird.f32 %v216_v43 }
 0x134   :  { %vm158_vm5 = vmor %vm156_vm4, %vm157_vm3 }
 0x135   :  { %v153_v46 = vsub.f32 1.0, %v152_v45 }
 0x137   :  { %v154_v48 = vmul.f32 %v216_v43, %v153_v46 }
 0x139   :  { %v155_v50 = vadd.f32 %v216_v43, %v154_v48 }
 0x13b   :  { %v159_v52 = vsel %vm158_vm5, %v216_v43, %v155_v50 }
 0x13c   :  { %v164_v53 = vsel %vm161_vm6, %v163_v51, %v159_v52 }
 0x13d   :  { %v167_v54 = vrot.slane %v164_v53, 1  ;;  %v168_v55 = vperm.slane %v164_v53, 0 }
 0x13f   :  { %v172_v56 = vmul.f32 %v168_v55, %v247_v2  ;;  %v173_v57 = vmul.f32 %v168_v55, %v252_v3  ;;  %v174_v58 = vmul.f32 %v168_v55, %v257_v4  ;;  %v175_v59 = vmul.f32 %v168_v55, %v262_v5 }
 0x140   :  { %v169_v60 = vperm.slane %v167_v54, 0  ;;  %v176_v61 = vmul.f32 %v168_v55, %v273_v10  ;;  %v177_v62 = vmul.f32 %v168_v55, %v304_v19  ;;  %v178_v2 = vmul.f32 %v168_v55, %v326_v29 }
 0x141   :  { %188 = vst.msk [vmem:[%s488_s3] sm:$0xff] %vm30_vm0, %v172_v56  ;;  %v179_v3 = vmul.f32 %v168_v55, %v343_v36 }
 0x142   :  { %189 = vst.msk [vmem:[%s488_s3 + $0x8] sm:$0xff] %vm30_vm0, %v173_v57  ;;  %v180_v4 = vmul.f32 %v169_v60, %v278_v11  ;;  %v181_v5 = vmul.f32 %v169_v60, %v283_v12  ;;  %v182_v10 = vmul.f32 %v169_v60, %v288_v14  ;;  %v183_v11 = vmul.f32 %v169_v60, %v293_v15 }
 0x143   :  { %190 = vst.msk [vmem:[%s488_s3 + $0x10] sm:$0xff] %vm30_vm0, %v174_v58  ;;  %v184_v12 = vmul.f32 %v169_v60, %v309_v20  ;;  %v185_v14 = vmul.f32 %v169_v60, %v331_v30  ;;  %v186_v15 = vmul.f32 %v169_v60, %v348_v37  ;;  %v187_v19 = vmul.f32 %v169_v60, %v360_v44 }
 0x144   :  { %191 = vst.msk [vmem:[%s488_s3 + $0x18] sm:$0xff] %vm30_vm0, %v175_v59 }
 0x145   :  { %192 = vst.msk [vmem:[%s488_s3 + $0x20] sm:$0xff] %vm30_vm0, %v176_v61 }
 0x146   :  { %193 = vst.msk [vmem:[%s488_s3 + $0x28] sm:$0xff] %vm30_vm0, %v177_v62 }
 0x147   :  { %194 = vst.msk [vmem:[%s488_s3 + $0x30] sm:$0xff] %vm30_vm0, %v178_v2 }
 0x148   :  { %195 = vst.msk [vmem:[%s488_s3 + $0x38] sm:$0xff] %vm30_vm0, %v179_v3 }
 0x149   :  { %196 = vst.msk [vmem:[%s488_s3 + $0x40] sm:$0xff] %vm30_vm0, %v180_v4 }
 0x14a   :  { %197 = vst.msk [vmem:[%s488_s3 + $0x48] sm:$0xff] %vm30_vm0, %v181_v5 }
 0x14b   :  { %198 = vst.msk [vmem:[%s488_s3 + $0x50] sm:$0xff] %vm30_vm0, %v182_v10 }
 0x14c   :  { %199 = vst.msk [vmem:[%s488_s3 + $0x58] sm:$0xff] %vm30_vm0, %v183_v11 }
 0x14d   :  { %200 = vst.msk [vmem:[%s488_s3 + $0x60] sm:$0xff] %vm30_vm0, %v184_v12 }
 0x14e   :  { %201 = vst.msk [vmem:[%s488_s3 + $0x68] sm:$0xff] %vm30_vm0, %v185_v14 }
 0x14f   :  { %202 = vst.msk [vmem:[%s488_s3 + $0x70] sm:$0xff] %vm30_vm0, %v186_v15 }
 0x150   :  { %203 = vst.msk [vmem:[%s488_s3 + $0x78] sm:$0xff] %vm30_vm0, %v187_v19 }

// kernel: _lambda_.12
= control target key start
LH: loop header
LB: loop body
LE: loop exit
PB: predicated region body
PF: predicated region fallthrough
CT: control target
= control target key end

     0   :  { %s56_s0 = inlined_call_operand.vmem [shape: f32[2,1024], index: 0, kind: input, shape index: {}]   ;;  %s57_s1 = inlined_call_operand.vmem [shape: f32[2,1024], index: 1, kind: input, shape index: {}]   ;;  %s58_s2 = inlined_call_operand.vmem [shape: f32[2,1024], index: 2, kind: output, shape index: {}]  }
   0x1   :  { %v11_v0 = vld [vmem:[%s56_s0] sm:$0xff]  ;;  %v12_v2 = vld [vmem:[%s56_s0 + $0x8] sm:$0xff] }
   0x2   :  { %v13_v1 = vld [vmem:[%s57_s1] sm:$0xff]  ;;  %v14_v4 = vld [vmem:[%s57_s1 + $0x8] sm:$0xff] }
   0x3   :  { %v15_v3 = vadd.f32 %v13_v1, %v11_v0  ;;  %v16_v5 = vadd.f32 %v14_v4, %v12_v2 }
   0x5   :  { %17 = vst [vmem:[%s58_s2] sm:$0xff] %v15_v3 }
   0x6   :  { %18 = vst [vmem:[%s58_s2 + $0x8] sm:$0xff] %v16_v5 }

// kernel: _lambda_.11
= control target key start
LH: loop header
LB: loop body
LE: loop exit
PB: predicated region body
PF: predicated region fallthrough
CT: control target
= control target key end

     0   :  { %s1053_s1 = inlined_call_operand.vmem [shape: bf16[256,128], index: 1, kind: input, shape index: {}]   ;;  %s1054_s0 = inlined_call_operand.vmem [shape: bf16[128,256], index: 0, kind: input, shape index: {}]   ;;  %s1055_s2 = inlined_call_operand.vmem [shape: f32[1,128], index: 2, kind: input, shape index: {}]   ;;  %s1056_s3 = inlined_call_operand.vmem [shape: f32[1,128], index: 3, kind: input, shape index: {}]   ;;  %s1057_s4 = inlined_call_operand.<no memory space> [shape: f32[1], index: 4, kind: input, shape index: {}]   ;;  %s1058_s5 = inlined_call_operand.vmem [shape: f32[128,128], index: 5, kind: output, shape index: {}]  }
   0x1   :  { %v714_v0 = vld [vmem:[%s1053_s1 + $0x38] sm:$0xff]  ;;  %v713_v2 = vld [vmem:[%s1053_s1 + $0x30] sm:$0xff]  ;;  %v712_v4 = vld [vmem:[%s1053_s1 + $0x28] sm:$0xff] }
   0x2   :  { %v722_v1 = vld [vmem:[%s1053_s1 + $0x78] sm:$0xff]  ;;  %245 = vmatpush.bf16.msra.mxu0 %v714_v0  ;;  %v721_v3 = vld [vmem:[%s1053_s1 + $0x70] sm:$0xff]  ;;  %723 = vmatpush.bf16.msra.mxu2 %v714_v0  ;;  %v720_v5 = vld [vmem:[%s1053_s1 + $0x68] sm:$0xff] }
   0x3   :  { %294 = vmatpush.bf16.msra.mxu1 %v722_v1  ;;  %731 = vmatpush.bf16.msra.mxu3 %v722_v1  ;;  %v711_v6 = vld [vmem:[%s1053_s1 + $0x20] sm:$0xff]  ;;  %v710_v8 = vld [vmem:[%s1053_s1 + $0x18] sm:$0xff]  ;;  %v709_v10 = vld [vmem:[%s1053_s1 + $0x10] sm:$0xff] }
   0x4   :  { %v719_v7 = vld [vmem:[%s1053_s1 + $0x60] sm:$0xff]  ;;  %v718_v9 = vld [vmem:[%s1053_s1 + $0x58] sm:$0xff]  ;;  %v717_v11 = vld [vmem:[%s1053_s1 + $0x50] sm:$0xff] }
   0x5   :  { %v708_v12 = vld [vmem:[%s1053_s1 + $0x8] sm:$0xff]  ;;  %v707_v14 = vld [vmem:[%s1053_s1] sm:$0xff]  ;;  %v573_v28 = vld [vmem:[%s1054_s0 + $0x10] sm:$0xf] }
   0x6   :  { %246 = vmatpush.bf16.msra.mxu0 %v713_v2  ;;  %724 = vmatpush.bf16.msra.mxu2 %v713_v2  ;;  %v716_v13 = vld [vmem:[%s1053_s1 + $0x48] sm:$0xff]  ;;  %v715_v15 = vld [vmem:[%s1053_s1 + $0x40] sm:$0xff]  ;;  %v694_v29 = vld [vmem:[%s1054_s0 + $0x14] sm:$0xf0] }
   0x7   :  { %295 = vmatpush.bf16.msra.mxu1 %v721_v3  ;;  %732 = vmatpush.bf16.msra.mxu3 %v721_v3  ;;  %v565_v16 = vld [vmem:[%s1054_s0] sm:$0xf]  ;;  %v692_v17 = vld [vmem:[%s1054_s0 + $0x4] sm:$0xf0]  ;;  %v691_v18 = vld [vmem:[%s1054_s0 + $0x4] sm:$0xf]  ;;  %v574_v36 = vor.u32 %v694_v29, %v573_v28 }
   0x8   :  { %v567_v19 = vld [vmem:[%s1054_s0 + $0x8] sm:$0xf0]  ;;  %v597_v20 = vld [vmem:[%s1054_s0 + $0x40] sm:$0xf]  ;;  %v700_v21 = vld [vmem:[%s1054_s0 + $0x44] sm:$0xf0]  ;;  %v566_v24 = vor.u32 %v692_v17, %v565_v16 }
   0x9   :  { %v699_v22 = vld [vmem:[%s1054_s0 + $0x44] sm:$0xf]  ;;  %v599_v23 = vld [vmem:[%s1054_s0 + $0x48] sm:$0xf0]  ;;  %v570_v25 = vor.u32 %v691_v18, %v567_v19  ;;  %v598_v26 = vor.u32 %v700_v21, %v597_v20  ;;  %v693_v30 = vld [vmem:[%s1054_s0 + $0x14] sm:$0xf] }
   0xa   :  { %247 = vmatpush.bf16.msra.mxu0 %v712_v4  ;;  %725 = vmatpush.bf16.msra.mxu2 %v712_v4  ;;  %v602_v27 = vor.u32 %v699_v22, %v599_v23  ;;  %v575_v31 = vld [vmem:[%s1054_s0 + $0x18] sm:$0xf0]  ;;  %v605_v32 = vld [vmem:[%s1054_s0 + $0x50] sm:$0xf]  ;;  %v702_v33 = vld [vmem:[%s1054_s0 + $0x54] sm:$0xf0] }
   0xb   :  { %296 = vmatpush.bf16.msra.mxu1 %v720_v5  ;;  %733 = vmatpush.bf16.msra.mxu3 %v720_v5  ;;  %v701_v34 = vld [vmem:[%s1054_s0 + $0x54] sm:$0xf]  ;;  %v607_v35 = vld [vmem:[%s1054_s0 + $0x58] sm:$0xf0]  ;;  %v578_v37 = vor.u32 %v693_v30, %v575_v31  ;;  %v606_v38 = vor.u32 %v702_v33, %v605_v32  ;;  %v581_v40 = vld [vmem:[%s1054_s0 + $0x20] sm:$0xf] }
   0xc   :  { %v610_v39 = vor.u32 %v701_v34, %v607_v35  ;;  %v696_v41 = vld [vmem:[%s1054_s0 + $0x24] sm:$0xf0]  ;;  %v695_v42 = vld [vmem:[%s1054_s0 + $0x24] sm:$0xf]  ;;  %v583_v43 = vld [vmem:[%s1054_s0 + $0x28] sm:$0xf0] }
   0xd   :  { %v613_v44 = vld [vmem:[%s1054_s0 + $0x60] sm:$0xf]  ;;  %v704_v45 = vld [vmem:[%s1054_s0 + $0x64] sm:$0xf0]  ;;  %v703_v46 = vld [vmem:[%s1054_s0 + $0x64] sm:$0xf]  ;;  %v582_v48 = vor.u32 %v696_v41, %v581_v40  ;;  %v586_v49 = vor.u32 %v695_v42, %v583_v43 }
   0xe   :  { %248 = vmatpush.bf16.msra.mxu0 %v711_v6  ;;  %726 = vmatpush.bf16.msra.mxu2 %v711_v6  ;;  %v615_v47 = vld [vmem:[%s1054_s0 + $0x68] sm:$0xf0]  ;;  %v614_v50 = vor.u32 %v704_v45, %v613_v44  ;;  %v589_v52 = vld [vmem:[%s1054_s0 + $0x30] sm:$0xf]  ;;  %v698_v53 = vld [vmem:[%s1054_s0 + $0x34] sm:$0xf0] }
   0xf   :  { %297 = vmatpush.bf16.msra.mxu1 %v719_v7  ;;  %734 = vmatpush.bf16.msra.mxu3 %v719_v7  ;;  %v618_v51 = vor.u32 %v703_v46, %v615_v47  ;;  %v697_v54 = vld [vmem:[%s1054_s0 + $0x34] sm:$0xf]  ;;  %v591_v55 = vld [vmem:[%s1054_s0 + $0x38] sm:$0xf0]  ;;  %v621_v56 = vld [vmem:[%s1054_s0 + $0x70] sm:$0xf]  ;;  %v590_v60 = vor.u32 %v698_v53, %v589_v52 }
  0x10   :  { %v706_v57 = vld [vmem:[%s1054_s0 + $0x74] sm:$0xf0]  ;;  %v705_v58 = vld [vmem:[%s1054_s0 + $0x74] sm:$0xf]  ;;  %v623_v59 = vld [vmem:[%s1054_s0 + $0x78] sm:$0xf0]  ;;  %v594_v61 = vor.u32 %v697_v54, %v591_v55 }
  0x11   :  { %v622_v62 = vor.u32 %v706_v57, %v621_v56  ;;  %v626_v63 = vor.u32 %v705_v58, %v623_v59 }
  0x12   :  { %249 = vmatpush.bf16.msra.mxu0 %v710_v8  ;;  %727 = vmatpush.bf16.msra.mxu2 %v710_v8 }
  0x13   :  { %298 = vmatpush.bf16.msra.mxu1 %v718_v9  ;;  %735 = vmatpush.bf16.msra.mxu3 %v718_v9 }
  0x16   :  { %250 = vmatpush.bf16.msra.mxu0 %v709_v10  ;;  %728 = vmatpush.bf16.msra.mxu2 %v709_v10 }
  0x17   :  { %299 = vmatpush.bf16.msra.mxu1 %v717_v11  ;;  %736 = vmatpush.bf16.msra.mxu3 %v717_v11 }
  0x1a   :  { %251 = vmatpush.bf16.msra.mxu0 %v708_v12  ;;  %729 = vmatpush.bf16.msra.mxu2 %v708_v12 }
  0x1b   :  { %300 = vmatpush.bf16.msra.mxu1 %v716_v13  ;;  %737 = vmatpush.bf16.msra.mxu3 %v716_v13 }
  0x1e   :  { %252 = vmatpush.bf16.msra.mxu0 %v707_v14  ;;  %730 = vmatpush.bf16.msra.mxu2 %v707_v14 }
  0x1f   :  { %301 = vmatpush.bf16.msra.mxu1 %v715_v15  ;;  %738 = vmatpush.bf16.msra.mxu3 %v715_v15 }
  0x21   :  { %253 = vmatmul.bf16.vlgmr.msra.gmra.mxu0 %v566_v24  ;;  %273 = vmatmul.bf16.vlgmr.msra.gmra.mxu2 %v598_v26 }
  0x22   :  { %302 = vmatmul.bf16.vlgmr.msra.gmra.mxu1 %v570_v25  ;;  %322 = vmatmul.bf16.vlgmr.msra.gmra.mxu3 %v602_v27 }
  0x31   :  { %258 = vmatmul.bf16.gmra.mxu0 %v574_v36  ;;  %278 = vmatmul.bf16.gmra.mxu2 %v606_v38 }
  0x32   :  { %307 = vmatmul.bf16.gmra.mxu1 %v578_v37  ;;  %327 = vmatmul.bf16.gmra.mxu3 %v610_v39 }
  0x41   :  { %263 = vmatmul.bf16.gmra.mxu0 %v582_v48  ;;  %283 = vmatmul.bf16.gmra.mxu2 %v614_v50  ;;  %v746_v48 = vmov 128.0  }
  0x42   :  { %312 = vmatmul.bf16.gmra.mxu1 %v586_v49  ;;  %332 = vmatmul.bf16.gmra.mxu3 %v618_v51  ;;  %742 = vrcp.f32 %v746_v48 }
  0x48   :  { %v743_v53 = vpop.eup %742 }
  0x49   :  { %vm369_vm0 = vweird.f32 %v743_v53 }
  0x51   :  { %268 = vmatmul.bf16.gmra.mxu0 %v590_v60  ;;  %288 = vmatmul.bf16.gmra.mxu2 %v622_v62  ;;  %v365_v60 = vmul.f32 128.0, %v743_v53 }
  0x52   :  { %317 = vmatmul.bf16.gmra.mxu1 %v594_v61  ;;  %337 = vmatmul.bf16.gmra.mxu3 %v626_v63 }
  0x9e   :  { %v254_v0 = vpop.f32.mrf.mxu0 }
  0x9f   :  { %v303_v1 = vpop.f32.mrf.mxu1 }
  0xa0   :  { %v304_v23 = vadd.f32 %v303_v1, %v254_v0  ;;  %v366_v1 = vsub.f32 1.0, %v365_v60 }
  0xa4   :  { %v274_v2 = vpop.f32.mrf.mxu2 }
  0xa5   :  { %v323_v3 = vpop.f32.mrf.mxu3 }
  0xa6   :  { %v256_v4 = vpop.f32.mrf.mxu0  ;;  %v324_v42 = vadd.f32 %v323_v3, %v274_v2 }
  0xa7   :  { %v305_v5 = vpop.f32.mrf.mxu1 }
  0xa8   :  { %v306_v22 = vadd.f32 %v305_v5, %v256_v4  ;;  %v367_v4 = vmul.f32 %v743_v53, %v366_v1 }
  0xaa   :  { %v343_v25 = vadd.f32 %v306_v22, %v304_v23 }
  0xac   :  { %v276_v6 = vpop.f32.mrf.mxu2 }
  0xad   :  { %v325_v7 = vpop.f32.mrf.mxu3 }
  0xae   :  { %v259_v8 = vpop.f32.mrf.mxu0  ;;  %v326_v46 = vadd.f32 %v325_v7, %v276_v6  ;;  %v368_v7 = vadd.f32 %v743_v53, %v367_v4 }
  0xaf   :  { %v308_v9 = vpop.f32.mrf.mxu1 }
  0xb0   :  { %v309_v24 = vadd.f32 %v308_v9, %v259_v8 }
  0xb2   :  { %v344_v29 = vadd.f32 %v343_v25, %v309_v24 }
  0xb4   :  { %v279_v10 = vpop.f32.mrf.mxu2 }
  0xb5   :  { %v328_v11 = vpop.f32.mrf.mxu3 }
  0xb6   :  { %v261_v12 = vpop.f32.mrf.mxu0  ;;  %v329_v49 = vadd.f32 %v328_v11, %v279_v10  ;;  %v370_v10 = vsel %vm369_vm0, %v743_v53, %v368_v7 }
  0xb7   :  { %v310_v13 = vpop.f32.mrf.mxu1 }
  0xb8   :  { %v311_v26 = vadd.f32 %v310_v13, %v261_v12 }
  0xba   :  { %v345_v33 = vadd.f32 %v344_v29, %v311_v26 }
  0xbc   :  { %v281_v14 = vpop.f32.mrf.mxu2 }
  0xbd   :  { %v330_v15 = vpop.f32.mrf.mxu3 }
  0xbe   :  { %v264_v16 = vpop.f32.mrf.mxu0  ;;  %v331_v51 = vadd.f32 %v330_v15, %v281_v14 }
  0xbf   :  { %v313_v17 = vpop.f32.mrf.mxu1 }
  0xc0   :  { %v314_v30 = vadd.f32 %v313_v17, %v264_v16 }
  0xc2   :  { %v346_v35 = vadd.f32 %v345_v33, %v314_v30 }
  0xc4   :  { %v284_v18 = vpop.f32.mrf.mxu2 }
  0xc5   :  { %v333_v19 = vpop.f32.mrf.mxu3 }
  0xc6   :  { %v266_v20 = vpop.f32.mrf.mxu0  ;;  %v334_v54 = vadd.f32 %v333_v19, %v284_v18 }
  0xc7   :  { %v315_v21 = vpop.f32.mrf.mxu1 }
  0xc8   :  { %v316_v34 = vadd.f32 %v315_v21, %v266_v20 }
  0xca   :  { %v347_v37 = vadd.f32 %v346_v35, %v316_v34 }
  0xcc   :  { %v286_v31 = vpop.f32.mrf.mxu2 }
  0xcd   :  { %v335_v32 = vpop.f32.mrf.mxu3 }
  0xce   :  { %v269_v27 = vpop.f32.mrf.mxu0  ;;  %v336_v56 = vadd.f32 %v335_v32, %v286_v31 }
  0xcf   :  { %v318_v28 = vpop.f32.mrf.mxu1 }
  0xd0   :  { %v319_v36 = vadd.f32 %v318_v28, %v269_v27 }
  0xd2   :  { %v348_v40 = vadd.f32 %v347_v37, %v319_v36 }
  0xd4   :  { %v289_v44 = vpop.f32.mrf.mxu2 }
  0xd5   :  { %v338_v45 = vpop.f32.mrf.mxu3 }
  0xd6   :  { %v271_v38 = vpop.f32.mrf.mxu0  ;;  %v339_v61 = vadd.f32 %v338_v45, %v289_v44 }
  0xd7   :  { %v320_v39 = vpop.f32.mrf.mxu1 }
  0xd8   :  { %v321_v41 = vadd.f32 %v320_v39, %v271_v38 }
  0xda   :  { %v349_v43 = vadd.f32 %v348_v40, %v321_v41 }
  0xdc   :  { %v350_v47 = vadd.f32 %v349_v43, %v324_v42  ;;  %v291_v58 = vpop.f32.mrf.mxu2 }
  0xdd   :  { %v340_v59 = vpop.f32.mrf.mxu3 }
  0xde   :  { %v351_v50 = vadd.f32 %v350_v47, %v326_v46  ;;  %v341_v0 = vadd.f32 %v340_v59, %v291_v58 }
  0xe0   :  { %v352_v52 = vadd.f32 %v351_v50, %v329_v49 }
  0xe2   :  { %v353_v55 = vadd.f32 %v352_v52, %v331_v51 }
  0xe4   :  { %v354_v57 = vadd.f32 %v353_v55, %v334_v54 }
  0xe6   :  { %v355_v62 = vadd.f32 %v354_v57, %v336_v56 }
  0xe8   :  { %v356_v63 = vadd.f32 %v355_v62, %v339_v61 }
  0xea   :  { %v357_v2 = vadd.f32 %v356_v63, %v341_v0 }
  0xec   :  { %v358_v3 = vrot.slane %v357_v2, 4 }
  0xee   :  { %v359_v5 = vadd.f32 %v358_v3, %v357_v2 }
  0xf0   :  { %v360_v6 = vrot.slane %v359_v5, 2 }
  0xf2   :  { %v361_v8 = vadd.f32 %v360_v6, %v359_v5 }
  0xf4   :  { %v362_v9 = vrot.slane %v361_v8, 1 }
  0xf6   :  { %v363_v11 = vadd.f32 %v362_v9, %v361_v8 }
  0xf8   :  { %v371_v12 = vmul.f32 %v370_v10, %v363_v11 }
  0xfa   :  { %v921_v13 = vsub.f32 %v304_v23, %v371_v12  ;;  %v923_v14 = vsub.f32 %v306_v22, %v371_v12  ;;  %v925_v15 = vsub.f32 %v309_v24, %v371_v12  ;;  %v931_v18 = vsub.f32 %v311_v26, %v371_v12 }
  0xfb   :  { %v933_v19 = vsub.f32 %v314_v30, %v371_v12  ;;  %v937_v23 = vsub.f32 %v316_v34, %v371_v12  ;;  %v378_v25 = vsub.f32 %v319_v36, %v371_v12  ;;  %v379_v29 = vsub.f32 %v321_v41, %v371_v12 }
  0xfc   :  { %v388_v16 = vmul.f32 %v921_v13, %v921_v13  ;;  %v389_v17 = vmul.f32 %v923_v14, %v923_v14  ;;  %v390_v20 = vmul.f32 %v925_v15, %v925_v15  ;;  %v391_v22 = vmul.f32 %v931_v18, %v931_v18 }
  0xfd   :  { %v392_v27 = vmul.f32 %v933_v19, %v933_v19  ;;  %v393_v26 = vmul.f32 %v937_v23, %v937_v23  ;;  %v945_v31 = vsub.f32 %v324_v42, %v371_v12  ;;  %v394_v32 = vmul.f32 %v378_v25, %v378_v25 }
  0xfe   :  { %v404_v21 = vadd.f32 %v389_v17, %v388_v16  ;;  %v381_v34 = vsub.f32 %v326_v46, %v371_v12  ;;  %v395_v35 = vmul.f32 %v379_v29, %v379_v29  ;;  %v382_v38 = vsub.f32 %v329_v49, %v371_v12 }
  0xff   :  { %v396_v36 = vmul.f32 %v945_v31, %v945_v31  ;;  %v383_v40 = vsub.f32 %v331_v51, %v371_v12  ;;  %v384_v41 = vsub.f32 %v334_v54, %v371_v12  ;;  %v385_v48 = vsub.f32 %v336_v56, %v371_v12 }
 0x100   :  { %v405_v24 = vadd.f32 %v404_v21, %v390_v20  ;;  %v397_v43 = vmul.f32 %v381_v34, %v381_v34  ;;  %v398_v45 = vmul.f32 %v382_v38, %v382_v38  ;;  %v386_v52 = vsub.f32 %v339_v61, %v371_v12 }
 0x101   :  { %v399_v50 = vmul.f32 %v383_v40, %v383_v40  ;;  %v400_v53 = vmul.f32 %v384_v41, %v384_v41  ;;  %v387_v46 = vsub.f32 %v341_v0, %v371_v12  ;;  %v401_v57 = vmul.f32 %v385_v48, %v385_v48 }
 0x102   :  { %v406_v28 = vadd.f32 %v405_v24, %v391_v22  ;;  %v402_v49 = vmul.f32 %v386_v52, %v386_v52 }
 0x103   :  { %v403_v60 = vmul.f32 %v387_v46, %v387_v46 }
 0x104   :  { %v407_v30 = vadd.f32 %v406_v28, %v392_v27  ;;  %v961_v27 = vstv %s1057_s4 }
 0x106   :  { %v408_v33 = vadd.f32 %v407_v30, %v393_v26  ;;  %v966_v26 = vld [vmem:[%s1056_s3] ss:$0 sm:$0xff] }
 0x108   :  { %v409_v37 = vadd.f32 %v408_v33, %v394_v32 }
 0x10a   :  { %v410_v39 = vadd.f32 %v409_v37, %v395_v35 }
 0x10c   :  { %v411_v44 = vadd.f32 %v410_v39, %v396_v36 }
 0x10e   :  { %v412_v47 = vadd.f32 %v411_v44, %v397_v43 }
 0x110   :  { %v413_v42 = vadd.f32 %v412_v47, %v398_v45 }
 0x112   :  { %v414_v55 = vadd.f32 %v413_v42, %v399_v50 }
 0x114   :  { %v415_v58 = vadd.f32 %v414_v55, %v400_v53 }
 0x116   :  { %v416_v59 = vadd.f32 %v415_v58, %v401_v57 }
 0x118   :  { %v417_v62 = vadd.f32 %v416_v59, %v402_v49 }
 0x11a   :  { %v418_v63 = vadd.f32 %v417_v62, %v403_v60 }
 0x11c   :  { %v419_v51 = vrot.slane %v418_v63, 4 }
 0x11e   :  { %v420_v1 = vadd.f32 %v419_v51, %v418_v63 }
 0x120   :  { %v421_v2 = vrot.slane %v420_v1, 2 }
 0x122   :  { %v422_v54 = vadd.f32 %v421_v2, %v420_v1 }
 0x124   :  { %v423_v3 = vrot.slane %v422_v54, 1 }
 0x126   :  { %v424_v4 = vadd.f32 %v423_v3, %v422_v54 }
 0x128   :  { %v425_v56 = vmul.f32 %v424_v4, %v370_v10  ;;  %v740_v10 = vld [vmem:[%s1055_s2] ss:$0 sm:$0xff] }
 0x12a   :  { %v426_v5 = vadd.f32 1e-05, %v425_v56 }
 0x12c   :  { %744 = vrsqrt.f32 %v426_v5  ;;  %vm433_vm2 = vweird.f32 %v426_v5 }
 0x132   :  { %v745_v61 = vpop.eup %744 }
 0x133   :  { %v428_v6 = vmul.f32 %v745_v61, %v426_v5  ;;  %vm434_vm1 = vweird.f32 %v745_v61 }
 0x134   :  { %vm435_vm3 = vmor %vm433_vm2, %vm434_vm1 }
 0x135   :  { %v429_v7 = vmul.f32 %v745_v61, %v428_v6 }
 0x137   :  { %v430_v0 = vmul.f32 0.5, %v429_v7 }
 0x139   :  { %v431_v8 = vsub.f32 1.5, %v430_v0 }
 0x13b   :  { %v432_v9 = vmul.f32 %v745_v61, %v431_v8 }
 0x13d   :  { %v436_v11 = vsel %vm435_vm3, %v745_v61, %v432_v9 }
 0x13e   :  { %v437_v12 = vmul.f32 %v436_v11, %v921_v13  ;;  %v438_v16 = vmul.f32 %v436_v11, %v923_v14  ;;  %v439_v17 = vmul.f32 %v436_v11, %v925_v15  ;;  %v440_v20 = vmul.f32 %v436_v11, %v931_v18 }
 0x13f   :  { %v441_v21 = vmul.f32 %v436_v11, %v933_v19  ;;  %v442_v22 = vmul.f32 %v436_v11, %v937_v23  ;;  %v443_v24 = vmul.f32 %v436_v11, %v378_v25  ;;  %v444_v13 = vmul.f32 %v436_v11, %v379_v29 }
 0x140   :  { %v457_v14 = vmul.f32 %v740_v10, %v437_v12  ;;  %v458_v28 = vmul.f32 %v740_v10, %v438_v16  ;;  %v459_v15 = vmul.f32 %v740_v10, %v439_v17  ;;  %v445_v18 = vmul.f32 %v436_v11, %v945_v31 }
 0x141   :  { %v446_v19 = vmul.f32 %v436_v11, %v381_v34  ;;  %v447_v30 = vmul.f32 %v436_v11, %v382_v38  ;;  %v460_v23 = vmul.f32 %v740_v10, %v440_v20  ;;  %v448_v25 = vmul.f32 %v436_v11, %v383_v40 }
 0x142   :  { %v449_v32 = vmul.f32 %v436_v11, %v384_v41  ;;  %v450_v33 = vmul.f32 %v436_v11, %v385_v48  ;;  %v461_v35 = vmul.f32 %v740_v10, %v441_v21  ;;  %v451_v37 = vmul.f32 %v436_v11, %v386_v52 }
 0x143   :  { %v452_v36 = vmul.f32 %v436_v11, %v387_v46  ;;  %v462_v29 = vmul.f32 %v740_v10, %v442_v22  ;;  %v463_v39 = vmul.f32 %v740_v10, %v443_v24  ;;  %v464_v43 = vmul.f32 %v740_v10, %v444_v13 }
 0x144   :  { %v477_v44 = vadd.f32 %v966_v26, %v457_v14  ;;  %v478_v45 = vadd.f32 %v966_v26, %v458_v28  ;;  %v479_v47 = vadd.f32 %v966_v26, %v459_v15  ;;  %v465_v50 = vmul.f32 %v740_v10, %v445_v18 }
 0x145   :  { %v466_v31 = vmul.f32 %v740_v10, %v446_v19  ;;  %v467_v34 = vmul.f32 %v740_v10, %v447_v30  ;;  %v480_v38 = vadd.f32 %v966_v26, %v460_v23  ;;  %v468_v40 = vmul.f32 %v740_v10, %v448_v25 }
 0x146   :  { %v469_v41 = vmul.f32 %v740_v10, %v449_v32  ;;  %v470_v48 = vmul.f32 %v740_v10, %v450_v33  ;;  %v481_v42 = vadd.f32 %v966_v26, %v461_v35  ;;  %v471_v52 = vmul.f32 %v740_v10, %v451_v37 }
 0x147   :  { %v472_v53 = vmul.f32 %v740_v10, %v452_v36  ;;  %v482_v55 = vadd.f32 %v966_v26, %v462_v29  ;;  %v483_v46 = vadd.f32 %v966_v26, %v463_v39  ;;  %v484_v57 = vadd.f32 %v966_v26, %v464_v43 }
 0x148   :  { %v511_v58 = vmul.f32 %v961_v27, %v477_v44  ;;  %v512_v49 = vmul.f32 %v961_v27, %v478_v45  ;;  %v513_v59 = vmul.f32 %v961_v27, %v479_v47  ;;  %vm494_vm4 = vcmp.gt.f32.partialorder %v477_v44, 0.0 }
 0x149   :  { %vm495_vm5 = vcmp.gt.f32.partialorder %v478_v45, 0.0  ;;  %vm496_vm6 = vcmp.gt.f32.partialorder %v479_v47, 0.0  ;;  %v514_v60 = vmul.f32 %v961_v27, %v480_v38  ;;  %v485_v62 = vadd.f32 %v966_v26, %v465_v50 }
 0x14a   :  { %v486_v63 = vadd.f32 %v966_v26, %v466_v31  ;;  %vm497_vm7 = vcmp.gt.f32.partialorder %v480_v38, 0.0  ;;  %v515_v51 = vmul.f32 %v961_v27, %v481_v42  ;;  %v487_v1 = vadd.f32 %v966_v26, %v467_v34 }
 0x14b   :  { %vm498_vm8 = vcmp.gt.f32.partialorder %v481_v42, 0.0  ;;  %vm499_vm9 = vcmp.gt.f32.partialorder %v482_v55, 0.0  ;;  %v516_v2 = vmul.f32 %v961_v27, %v482_v55  ;;  %v517_v54 = vmul.f32 %v961_v27, %v483_v46 }
 0x14c   :  { %v527_v3 = vsel %vm494_vm4, %v477_v44, %v511_v58  ;;  %v528_v4 = vsel %vm495_vm5, %v478_v45, %v512_v49  ;;  %v529_v56 = vsel %vm496_vm6, %v479_v47, %v513_v59  ;;  %v488_v5 = vadd.f32 %v966_v26, %v468_v40 }
 0x14d   :  { %vm500_vm10 = vcmp.gt.f32.partialorder %v483_v46, 0.0  ;;  %v518_v61 = vmul.f32 %v961_v27, %v484_v57  ;;  %v530_v6 = vsel %vm497_vm7, %v480_v38, %v514_v60  ;;  %543 = vst [vmem:[%s1058_s5] sm:$0xff] %v527_v3  ;;  %v489_v7 = vadd.f32 %v966_v26, %v469_v41 }
 0x14e   :  { %vm501_vm11 = vcmp.gt.f32.partialorder %v484_v57, 0.0  ;;  %v519_v0 = vmul.f32 %v961_v27, %v485_v62  ;;  %v531_v8 = vsel %vm498_vm8, %v481_v42, %v515_v51  ;;  %544 = vst [vmem:[%s1058_s5 + $0x8] sm:$0xff] %v528_v4  ;;  %v490_v9 = vadd.f32 %v966_v26, %v470_v48 }
 0x14f   :  { %vm502_vm12 = vcmp.gt.f32.partialorder %v485_v62, 0.0  ;;  %v520_v11 = vmul.f32 %v961_v27, %v486_v63  ;;  %v532_v12 = vsel %vm499_vm9, %v482_v55, %v516_v2  ;;  %545 = vst [vmem:[%s1058_s5 + $0x10] sm:$0xff] %v529_v56  ;;  %v491_v16 = vadd.f32 %v966_v26, %v471_v52 }
 0x150   :  { %vm503_vm13 = vcmp.gt.f32.partialorder %v486_v63, 0.0  ;;  %v521_v17 = vmul.f32 %v961_v27, %v487_v1  ;;  %v533_v10 = vsel %vm500_vm10, %v483_v46, %v517_v54  ;;  %546 = vst [vmem:[%s1058_s5 + $0x18] sm:$0xff] %v530_v6  ;;  %v492_v20 = vadd.f32 %v966_v26, %v472_v53 }
 0x151   :  { %vm504_vm14 = vcmp.gt.f32.partialorder %v487_v1, 0.0  ;;  %v522_v21 = vmul.f32 %v961_v27, %v488_v5  ;;  %v534_v22 = vsel %vm501_vm11, %v484_v57, %v518_v61  ;;  %547 = vst [vmem:[%s1058_s5 + $0x20] sm:$0xff] %v531_v8  ;;  %vm505_vm15 = vcmp.gt.f32.partialorder %v488_v5, 0.0 }
 0x152   :  { %v523_v24 = vmul.f32 %v961_v27, %v489_v7  ;;  %v535_v13 = vsel %vm502_vm12, %v485_v62, %v519_v0  ;;  %548 = vst [vmem:[%s1058_s5 + $0x28] sm:$0xff] %v532_v12  ;;  %vm506_vm0 = vcmp.gt.f32.partialorder %v489_v7, 0.0  ;;  %v524_v14 = vmul.f32 %v961_v27, %v490_v9 }
 0x153   :  { %v536_v28 = vsel %vm503_vm13, %v486_v63, %v520_v11  ;;  %549 = vst [vmem:[%s1058_s5 + $0x30] sm:$0xff] %v533_v10  ;;  %vm507_vm1 = vcmp.gt.f32.partialorder %v490_v9, 0.0  ;;  %v525_v15 = vmul.f32 %v961_v27, %v491_v16  ;;  %v537_v26 = vsel %vm504_vm14, %v487_v1, %v521_v17 }
 0x154   :  { %550 = vst [vmem:[%s1058_s5 + $0x38] sm:$0xff] %v534_v22  ;;  %vm508_vm2 = vcmp.gt.f32.partialorder %v491_v16, 0.0  ;;  %v526_v18 = vmul.f32 %v961_v27, %v492_v20  ;;  %v538_v19 = vsel %vm505_vm15, %v488_v5, %v522_v21  ;;  %vm509_vm3 = vcmp.gt.f32.partialorder %v492_v20, 0.0 }
 0x155   :  { %551 = vst [vmem:[%s1058_s5 + $0x40] sm:$0xff] %v535_v13  ;;  %v539_v30 = vsel %vm506_vm0, %v489_v7, %v523_v24  ;;  %v540_v23 = vsel %vm507_vm1, %v490_v9, %v524_v14  ;;  %v541_v25 = vsel %vm508_vm2, %v491_v16, %v525_v15 }
 0x156   :  { %552 = vst [vmem:[%s1058_s5 + $0x48] sm:$0xff] %v536_v28  ;;  %v542_v27 = vsel %vm509_vm3, %v492_v20, %v526_v18 }
 0x157   :  { %553 = vst [vmem:[%s1058_s5 + $0x50] sm:$0xff] %v537_v26 }
 0x158   :  { %554 = vst [vmem:[%s1058_s5 + $0x58] sm:$0xff] %v538_v19 }
 0x159   :  { %555 = vst [vmem:[%s1058_s5 + $0x60] sm:$0xff] %v539_v30 }
 0x15a   :  { %556 = vst [vmem:[%s1058_s5 + $0x68] sm:$0xff] %v540_v23 }
 0x15b   :  { %557 = vst [vmem:[%s1058_s5 + $0x70] sm:$0xff] %v541_v25 }
 0x15c   :  { %558 = vst [vmem:[%s1058_s5 + $0x78] sm:$0xff] %v542_v27 }

// kernel: _lambda_.13
= control target key start
LH: loop header
LB: loop body
LE: loop exit
PB: predicated region body
PF: predicated region fallthrough
CT: control target
= control target key end

     0   :  { %s665_s17 = smov 0   ;;  %s767_s0 = inlined_call_operand.vmem [shape: bf16[512,128], index: 0, kind: input, shape index: {}]   ;;  %s768_s1 = inlined_call_operand.vmem [shape: bf16[128,128], index: 1, kind: input, shape index: {}]   ;;  %s769_s2 = inlined_call_operand.vmem [shape: f32[1,128], index: 2, kind: input, shape index: {}]   ;;  %s770_s3 = inlined_call_operand.<no memory space> [shape: f32[1], index: 3, kind: input, shape index: {}]   ;;  %s771_s4 = inlined_call_operand.vmem [shape: f32[512,128], index: 4, kind: output, shape index: {}]  }
   0x1   :  { %9 = sst [smem:[#allocation2]] %s770_s3 }
   0x2 LB: > { %s505_s18 = sadd.s32 4294967295, %s635_s17   ;;  %p509_p0 = scmp.ge.s32.totalorder %s635_s17, 1  ;;  %s635_s17 = sphi %s665_s17, %s15_s17  }
   0x3   : > { %p164_p1 = scmp.lt.s32.totalorder %s635_s17, 5 }
   0x5   : > { %p165_p2 = pnand %p509_p0, %p164_p1 }
   0x6   : > { %s510_s26 = sshll.u32 (!%p165_p2), %s505_s18, 4  ;;  %s383_s13 = sld [smem:[#allocation2]] (!%p165_p2) }
   0x7   : > { %168 = sbr.rel (%p165_p2) target bundleno = 208 (0xd0), region = 36  ;;  %p191_p3 = scmp.lt.s32.totalorder (!%p165_p2), %s510_s26, 63 }
   0xc   : > { %v595_v0 = vld [vmem:[%s768_s1 + $0x38] sm:$0xff]  ;;  %v594_v1 = vld [vmem:[%s768_s1 + $0x30] sm:$0xff]  ;;  %v593_v2 = vld [vmem:[%s768_s1 + $0x28] sm:$0xff]  ;;  %s773_s26 = smov (!%p191_p3, %s510_s26), 63  ;;  %v709_v18 = vstv %s383_s13 }
   0xd   : > { %334 = vmatpush.bf16.msra.mxu0 %v595_v0  ;;  %596 = vmatpush.bf16.msra.mxu1 %v595_v0  ;;  %v592_v3 = vld [vmem:[%s768_s1 + $0x20] sm:$0xff]  ;;  %v591_v4 = vld [vmem:[%s768_s1 + $0x18] sm:$0xff]  ;;  %v590_v5 = vld [vmem:[%s768_s1 + $0x10] sm:$0xff]  ;;  %s511_s7 = sshll.u32 %s773_s26, 2  ;;  %s513_s16 = sshll.u32 %s773_s26, 3 }
   0xe   : > { %597 = vmatpush.bf16.msra.mxu2 %v595_v0  ;;  %598 = vmatpush.bf16.msra.mxu3 %v595_v0  ;;  %v589_v6 = vld [vmem:[%s768_s1 + $0x8] sm:$0xff]  ;;  %v588_v7 = vld [vmem:[%s768_s1] sm:$0xff]  ;;  %s194_s12 = scalar_lea.vmem %s767_s0, %s511_s7  ;;  %s716_s20 = scalar_lea.vmem %s771_s4, %s513_s16 }
   0xf   : > { %v580_v8 = vld [vmem:[%s194_s12] sm:$0xff]  ;;  %v582_v9 = vld [vmem:[%s194_s12 + $0x10] sm:$0xff]  ;;  %v581_v12 = vld [vmem:[%s194_s12 + $0x8] sm:$0xff] }
  0x10   : > { %v584_v10 = vld [vmem:[%s194_s12 + $0x20] sm:$0xff]  ;;  %v586_v11 = vld [vmem:[%s194_s12 + $0x30] sm:$0xff]  ;;  %v583_v13 = vld [vmem:[%s194_s12 + $0x18] sm:$0xff] }
  0x11   : > { %335 = vmatpush.bf16.msra.mxu0 %v594_v1  ;;  %599 = vmatpush.bf16.msra.mxu1 %v594_v1  ;;  %v585_v14 = vld [vmem:[%s194_s12 + $0x28] sm:$0xff]  ;;  %v587_v15 = vld [vmem:[%s194_s12 + $0x38] sm:$0xff]  ;;  %v706_v16 = vld [vmem:[%s769_s2] ss:$0 sm:$0xff] }
  0x12   : > { %600 = vmatpush.bf16.msra.mxu2 %v594_v1  ;;  %601 = vmatpush.bf16.msra.mxu3 %v594_v1 }
  0x15   : > { %336 = vmatpush.bf16.msra.mxu0 %v593_v2  ;;  %602 = vmatpush.bf16.msra.mxu1 %v593_v2 }
  0x16   : > { %603 = vmatpush.bf16.msra.mxu2 %v593_v2  ;;  %604 = vmatpush.bf16.msra.mxu3 %v593_v2 }
  0x19   : > { %337 = vmatpush.bf16.msra.mxu0 %v592_v3  ;;  %605 = vmatpush.bf16.msra.mxu1 %v592_v3 }
  0x1a   : > { %606 = vmatpush.bf16.msra.mxu2 %v592_v3  ;;  %607 = vmatpush.bf16.msra.mxu3 %v592_v3 }
  0x1d   : > { %338 = vmatpush.bf16.msra.mxu0 %v591_v4  ;;  %608 = vmatpush.bf16.msra.mxu1 %v591_v4 }
  0x1e   : > { %609 = vmatpush.bf16.msra.mxu2 %v591_v4  ;;  %610 = vmatpush.bf16.msra.mxu3 %v591_v4 }
  0x21   : > { %339 = vmatpush.bf16.msra.mxu0 %v590_v5  ;;  %611 = vmatpush.bf16.msra.mxu1 %v590_v5 }
  0x22   : > { %612 = vmatpush.bf16.msra.mxu2 %v590_v5  ;;  %613 = vmatpush.bf16.msra.mxu3 %v590_v5 }
  0x25   : > { %340 = vmatpush.bf16.msra.mxu0 %v589_v6  ;;  %614 = vmatpush.bf16.msra.mxu1 %v589_v6 }
  0x26   : > { %615 = vmatpush.bf16.msra.mxu2 %v589_v6  ;;  %616 = vmatpush.bf16.msra.mxu3 %v589_v6 }
  0x29   : > { %341 = vmatpush.bf16.msra.mxu0 %v588_v7  ;;  %617 = vmatpush.bf16.msra.mxu1 %v588_v7 }
  0x2a   : > { %618 = vmatpush.bf16.msra.mxu2 %v588_v7  ;;  %619 = vmatpush.bf16.msra.mxu3 %v588_v7 }
  0x2c   : > { %342 = vmatmul.bf16.vlgmr.msra.gmra.mxu0 %v580_v8  ;;  %352 = vmatmul.bf16.vlgmr.msra.gmra.mxu1 %v582_v9 }
  0x2d   : > { %362 = vmatmul.bf16.vlgmr.msra.gmra.mxu2 %v584_v10  ;;  %372 = vmatmul.bf16.vlgmr.msra.gmra.mxu3 %v586_v11 }
  0x3c   : > { %347 = vmatmul.bf16.gmra.mxu0 %v581_v12  ;;  %357 = vmatmul.bf16.gmra.mxu1 %v583_v13 }
  0x3d   : > { %367 = vmatmul.bf16.gmra.mxu2 %v585_v14  ;;  %377 = vmatmul.bf16.gmra.mxu3 %v587_v15 }
  0xa9   : > { %v343_v17 = vpop.f32.mrf.mxu0  ;;  %v353_v19 = vpop.f32.mrf.mxu1 }
  0xaa   : > { %v344_v20 = vadd.f32 %v706_v16, %v343_v17  ;;  %v354_v21 = vadd.f32 %v706_v16, %v353_v19 }
  0xac   : > { %vm384_vm0 = vcmp.gt.f32.partialorder %v344_v20, 0.0  ;;  %v401_v22 = vmul.f32 %v709_v18, %v344_v20  ;;  %vm388_vm1 = vcmp.gt.f32.partialorder %v354_v21, 0.0  ;;  %v405_v23 = vmul.f32 %v709_v18, %v354_v21 }
  0xae   : > { %v417_v24 = vsel %vm384_vm0, %v344_v20, %v401_v22  ;;  %v421_v25 = vsel %vm388_vm1, %v354_v21, %v405_v23 }
  0xaf   : > { %433 = vst [vmem:[%s716_s20] sm:$0xff] %v417_v24 }
  0xb0   : > { %437 = vst [vmem:[%s716_s20 + $0x20] sm:$0xff] %v421_v25  ;;  %v363_v26 = vpop.f32.mrf.mxu2  ;;  %v373_v27 = vpop.f32.mrf.mxu3 }
  0xb1   : > { %v364_v28 = vadd.f32 %v706_v16, %v363_v26  ;;  %v374_v29 = vadd.f32 %v706_v16, %v373_v27  ;;  %v345_v30 = vpop.f32.mrf.mxu0  ;;  %v355_v31 = vpop.f32.mrf.mxu1 }
  0xb2   : > { %v346_v32 = vadd.f32 %v706_v16, %v345_v30  ;;  %v356_v33 = vadd.f32 %v706_v16, %v355_v31 }
  0xb3   : > { %vm392_vm2 = vcmp.gt.f32.partialorder %v364_v28, 0.0  ;;  %v409_v34 = vmul.f32 %v709_v18, %v364_v28  ;;  %vm396_vm3 = vcmp.gt.f32.partialorder %v374_v29, 0.0  ;;  %v413_v35 = vmul.f32 %v709_v18, %v374_v29 }
  0xb4   : > { %vm385_vm4 = vcmp.gt.f32.partialorder %v346_v32, 0.0  ;;  %v402_v36 = vmul.f32 %v709_v18, %v346_v32  ;;  %vm389_vm5 = vcmp.gt.f32.partialorder %v356_v33, 0.0  ;;  %v406_v37 = vmul.f32 %v709_v18, %v356_v33 }
  0xb5   : > { %v425_v38 = vsel %vm392_vm2, %v364_v28, %v409_v34  ;;  %v429_v39 = vsel %vm396_vm3, %v374_v29, %v413_v35 }
  0xb6   : > { %441 = vst [vmem:[%s716_s20 + $0x40] sm:$0xff] %v425_v38  ;;  %v418_v40 = vsel %vm385_vm4, %v346_v32, %v402_v36  ;;  %v422_v41 = vsel %vm389_vm5, %v356_v33, %v406_v37 }
  0xb7   : > { %445 = vst [vmem:[%s716_s20 + $0x60] sm:$0xff] %v429_v39 }
  0xb8   : > { %434 = vst [vmem:[%s716_s20 + $0x8] sm:$0xff] %v418_v40  ;;  %v365_v42 = vpop.f32.mrf.mxu2  ;;  %v375_v43 = vpop.f32.mrf.mxu3 }
  0xb9   : > { %438 = vst [vmem:[%s716_s20 + $0x28] sm:$0xff] %v422_v41  ;;  %v366_v44 = vadd.f32 %v706_v16, %v365_v42  ;;  %v376_v45 = vadd.f32 %v706_v16, %v375_v43  ;;  %v348_v46 = vpop.f32.mrf.mxu0  ;;  %v358_v47 = vpop.f32.mrf.mxu1 }
  0xba   : > { %v349_v48 = vadd.f32 %v706_v16, %v348_v46  ;;  %v359_v49 = vadd.f32 %v706_v16, %v358_v47 }
  0xbb   : > { %vm393_vm6 = vcmp.gt.f32.partialorder %v366_v44, 0.0  ;;  %v410_v50 = vmul.f32 %v709_v18, %v366_v44  ;;  %vm397_vm7 = vcmp.gt.f32.partialorder %v376_v45, 0.0  ;;  %v414_v51 = vmul.f32 %v709_v18, %v376_v45 }
  0xbc   : > { %vm386_vm8 = vcmp.gt.f32.partialorder %v349_v48, 0.0  ;;  %v403_v52 = vmul.f32 %v709_v18, %v349_v48  ;;  %vm390_vm9 = vcmp.gt.f32.partialorder %v359_v49, 0.0  ;;  %v407_v53 = vmul.f32 %v709_v18, %v359_v49 }
  0xbd   : > { %v426_v54 = vsel %vm393_vm6, %v366_v44, %v410_v50  ;;  %v430_v55 = vsel %vm397_vm7, %v376_v45, %v414_v51 }
  0xbe   : > { %442 = vst [vmem:[%s716_s20 + $0x48] sm:$0xff] %v426_v54  ;;  %v419_v56 = vsel %vm386_vm8, %v349_v48, %v403_v52  ;;  %v423_v57 = vsel %vm390_vm9, %v359_v49, %v407_v53 }
  0xbf   : > { %446 = vst [vmem:[%s716_s20 + $0x68] sm:$0xff] %v430_v55 }
  0xc0   : > { %435 = vst [vmem:[%s716_s20 + $0x10] sm:$0xff] %v419_v56  ;;  %v368_v58 = vpop.f32.mrf.mxu2  ;;  %v378_v59 = vpop.f32.mrf.mxu3 }
  0xc1   : > { %439 = vst [vmem:[%s716_s20 + $0x30] sm:$0xff] %v423_v57  ;;  %v369_v60 = vadd.f32 %v706_v16, %v368_v58  ;;  %v379_v61 = vadd.f32 %v706_v16, %v378_v59  ;;  %v350_v62 = vpop.f32.mrf.mxu0  ;;  %v360_v63 = vpop.f32.mrf.mxu1 }
  0xc2   : > { %v351_v0 = vadd.f32 %v706_v16, %v350_v62  ;;  %v361_v1 = vadd.f32 %v706_v16, %v360_v63 }
  0xc3   : > { %vm394_vm10 = vcmp.gt.f32.partialorder %v369_v60, 0.0  ;;  %v411_v2 = vmul.f32 %v709_v18, %v369_v60  ;;  %vm398_vm11 = vcmp.gt.f32.partialorder %v379_v61, 0.0  ;;  %v415_v3 = vmul.f32 %v709_v18, %v379_v61 }
  0xc4   : > { %vm387_vm12 = vcmp.gt.f32.partialorder %v351_v0, 0.0  ;;  %v404_v4 = vmul.f32 %v709_v18, %v351_v0  ;;  %vm391_vm13 = vcmp.gt.f32.partialorder %v361_v1, 0.0  ;;  %v408_v5 = vmul.f32 %v709_v18, %v361_v1 }
  0xc5   : > { %v427_v6 = vsel %vm394_vm10, %v369_v60, %v411_v2  ;;  %v431_v7 = vsel %vm398_vm11, %v379_v61, %v415_v3 }
  0xc6   : > { %443 = vst [vmem:[%s716_s20 + $0x50] sm:$0xff] %v427_v6  ;;  %v420_v8 = vsel %vm387_vm12, %v351_v0, %v404_v4  ;;  %v424_v9 = vsel %vm391_vm13, %v361_v1, %v408_v5 }
  0xc7   : > { %447 = vst [vmem:[%s716_s20 + $0x70] sm:$0xff] %v431_v7 }
  0xc8   : > { %436 = vst [vmem:[%s716_s20 + $0x18] sm:$0xff] %v420_v8  ;;  %v370_v10 = vpop.f32.mrf.mxu2  ;;  %v380_v11 = vpop.f32.mrf.mxu3 }
  0xc9   : > { %440 = vst [vmem:[%s716_s20 + $0x38] sm:$0xff] %v424_v9  ;;  %v371_v12 = vadd.f32 %v706_v16, %v370_v10  ;;  %v381_v13 = vadd.f32 %v706_v16, %v380_v11 }
  0xcb   : > { %vm395_vm14 = vcmp.gt.f32.partialorder %v371_v12, 0.0  ;;  %v412_v14 = vmul.f32 %v709_v18, %v371_v12  ;;  %vm399_vm15 = vcmp.gt.f32.partialorder %v381_v13, 0.0  ;;  %v416_v15 = vmul.f32 %v709_v18, %v381_v13 }
  0xcd   : > { %v428_v17 = vsel %vm395_vm14, %v371_v12, %v412_v14  ;;  %v432_v19 = vsel %vm399_vm15, %v381_v13, %v416_v15 }
  0xce   : > { %444 = vst [vmem:[%s716_s20 + $0x58] sm:$0xff] %v428_v17 }
  0xcf   : > { %448 = vst [vmem:[%s716_s20 + $0x78] sm:$0xff] %v432_v19 }
  0xd0 PF: > { %s15_s17 = sadd.s32 1, %s635_s17  }
  0xd1   : > { %p12_p4 = scmp.ge.s32.totalorder %s15_s17, 6  }
  0xd3   :  { %14 = sbr.rel (!%p12_p4) target bundleno = 2 (0x2), region = 66 }

</bundles_post_ra>
